<compile_context>
chip_gen: v5e
topology: v5e:2x2
jax: 0.10.0
libtpu: 0.0.40
codegen_flags: <defaults>
</compile_context>

<pallas_src>
import functools
import math

import jax
import jax.numpy as jnp
import numpy as np
from jax.experimental import pallas as pl
from jax.experimental.pallas import tpu as pltpu

_INV_SQRT2 = 1.0 / math.sqrt(2.0)


def _erf(x):
    # Abramowitz & Stegun 7.1.26 (|err| < 1.5e-7).  PyTorch nn.GELU() is the
    # exact erf GELU; the tanh-form / approx-reciprocal variants were
    # considered but kept out to stay safely inside the 2e-3 f32 tolerance.
    a1, a2, a3, a4, a5 = (0.254829592, -0.284496736, 1.421413741,
                          -1.453152027, 1.061405429)
    p = 0.3275911
    ax = jnp.abs(x)
    t = 1.0 / (1.0 + p * ax)
    poly = ((((a5 * t + a4) * t + a3) * t + a2) * t + a1) * t
    y = 1.0 - poly * jnp.exp(-ax * ax)
    return jnp.where(x >= 0.0, y, -y)


def _gelu(x):
    return 0.5 * x * (1.0 + _erf(x * _INV_SQRT2))


def _down_kernel(Wp, xc_ref, embT_ref, pT_ref, p_ref, s_ref, sT_ref, sc_ref,
                 scT_ref, w1a_ref, g1a_ref, b1a_ref, w1b_ref, g1b_ref, b1b_ref,
                 w2a_ref, g2a_ref, b2a_ref, w2b_ref, g2b_ref, b2b_ref, o_ref):
    f32 = jnp.float32
    P_T = pT_ref[...]          # (Mi, Mp)  compact -> padded scatter (0/1)
    P = p_ref[...]             # (Mp, Mi)  padded  -> compact gather (0/1)
    S = s_ref[...]             # (Mp, B)   per-sample interior selector
    S_T = sT_ref[...]          # (B,  Mp)
    Sc = sc_ref[...]           # (Mi, B)   per-sample selector, compact frame
    Sc_T = scT_ref[...]        # (B,  Mi)
    Mi = P.shape[1]
    B = S.shape[1]
    n_hw = Mi // B             # Hh * Wh

    def conv3x3(x, wT):
        # x: (Cin, Mp) zero-bordered padded-frame slab, wT: (Cout, 9*Cin).
        # K is built along sublanes from 9 lane-shifted copies; jnp.roll's
        # circular wrap only reaches border output lanes (discarded later).
        taps = []
        for ky in range(3):
            for kx in range(3):
                d = (ky - 1) * Wp + (kx - 1)
                taps.append(x if d == 0 else jnp.roll(x, -d, axis=1))
        patches = jnp.concatenate(taps, axis=0)                   # (9*Cin, Mp)
        return jnp.dot(wT, patches, preferred_element_type=f32)   # (Cout, Mp)

    def gn_padded(h, gamma, beta):
        # GroupNorm(1, C) per sample over interior positions only; the affine
        # broadcast (scale/shift @ S_T) also re-zeroes the border lanes so the
        # result is a valid zero-bordered conv input.
        c = h.shape[0]
        inv_n = 1.0 / (n_hw * c)
        s_cb = jnp.dot(h, S, preferred_element_type=f32)          # (C, B)
        ss_cb = jnp.dot(h * h, S, preferred_element_type=f32)     # (C, B)
        mu = jnp.sum(s_cb, axis=0, keepdims=True) * inv_n         # (1, B)
        var = jnp.sum(ss_cb, axis=0, keepdims=True) * inv_n - mu * mu
        rstd = jax.lax.rsqrt(jnp.maximum(var, 0.0) + 1e-5)        # (1, B)
        scale = gamma * rstd                                      # (C, B)
        shift = beta - mu * scale                                 # (C, B)
        return (h * jnp.dot(scale, S_T, preferred_element_type=f32)
                + jnp.dot(shift, S_T, preferred_element_type=f32))

    # Pooled input: compact (Cin, Mi) -> zero-bordered padded frame (Cin, Mp).
    x_c = xc_ref[0]
    xs = jnp.dot(x_c, P_T, preferred_element_type=f32)

    # DoubleConv(in, in, residual=True): gelu(x + GN(conv(GELU(GN(conv(x))))))
    h = conv3x3(xs, w1a_ref[...])
    h = _gelu(gn_padded(h, g1a_ref[...], b1a_ref[...]))
    h = conv3x3(h, w1b_ref[...])
    h = gn_padded(h, g1b_ref[...], b1b_ref[...])
    r = _gelu(xs + h)

    # DoubleConv(in, out): GN(conv(GELU(GN(conv(r)))))
    h = conv3x3(r, w2a_ref[...])
    h = _gelu(gn_padded(h, g2a_ref[...], b2a_ref[...]))
    h = conv3x3(h, w2b_ref[...])

    # Compact to (Cout, B*Hh*Wh); final GroupNorm + time-embedding add fused
    # into one FMA pass in the lane-dense compact frame, stored directly.
    hc = jnp.dot(h, P, preferred_element_type=f32)                # (Cout, Mi)
    c = hc.shape[0]
    inv_n = 1.0 / (n_hw * c)
    s_cb = jnp.dot(hc, Sc, preferred_element_type=f32)
    ss_cb = jnp.dot(hc * hc, Sc, preferred_element_type=f32)
    mu = jnp.sum(s_cb, axis=0, keepdims=True) * inv_n
    var = jnp.sum(ss_cb, axis=0, keepdims=True) * inv_n - mu * mu
    rstd = jax.lax.rsqrt(jnp.maximum(var, 0.0) + 1e-5)
    scale = g2b_ref[...] * rstd                                   # (Cout, B)
    shift = b2b_ref[...] - mu * scale + embT_ref[0]               # (Cout, B)
    o_ref[0] = (hc * jnp.dot(scale, Sc_T, preferred_element_type=f32)
                + jnp.dot(shift, Sc_T, preferred_element_type=f32)
                ).astype(o_ref.dtype)


# ----------------------------- host-side helpers -----------------------------
def _padded_bytes(shape, itemsize=4):
    """f32 bytes of `shape` after (8,128) tile padding of the last two dims."""
    shape = tuple(int(d) for d in shape)
    if len(shape) == 1:
        shape = (1,) + shape
    lead = 1
    for d in shape[:-2]:
        lead *= d
    sub = -(-shape[-2] // 8) * 8
    lane = -(-shape[-1] // 128) * 128
    return lead * sub * lane * itemsize


def _step_vmem_bytes(B, Hh, Wh, Cin, Cout):
    """Tile-padded per-grid-step VMEM footprint incl. double-buffered blocks."""
    Hp, Wp = Hh + 2, Wh + 2
    Mp, Mi = B * Hp * Wp, B * Hh * Wh
    Cmax = max(Cin, Cout)
    pb = _padded_bytes
    blocks = (pb((Cin, Mi)) + pb((Cout, B)) + pb((Cout, Mi))        # x, emb, out
              + pb((Mi, Mp)) + pb((Mp, Mi)) + pb((Mp, B)) + pb((B, Mp))
              + pb((Mi, B)) + pb((B, Mi))
              + 2 * pb((Cin, 9 * Cin)) + pb((Cout, 9 * Cin))
              + pb((Cout, 9 * Cout)) + 8 * pb((Cmax, 1)))
    live = pb((9 * Cmax, Mp)) + 8 * pb((Cmax, Mp)) + 2 * pb((Cmax, Mi))
    return 2 * blocks + live                # x2: double-buffered pipeline


def _pick_batch_block(N, Hh, Wh, Cin, Cout, budget):
    nhw = Hh * Wh
    cands = [b for b in range(1, N + 1)
             if N % b == 0 and _step_vmem_bytes(b, Hh, Wh, Cin, Cout) <= budget]
    if not cands:
        return 1
    # Prefer a lane-dense output block (multiple of 128 lanes), then G >= 2 so
    # both v7x TensorCores get grid steps, then the largest batch block.
    return max(cands, key=lambda b: ((b * nhw) % 128 == 0, (N // b) >= 2, b))


def _selector_mats(B, Hh, Wh):
    """0/1 matrices: repad/compact (P_T, P) and per-sample segments (S, Sc)."""
    Hp, Wp = Hh + 2, Wh + 2
    n_hw = Hh * Wh
    Mp, Mi = B * Hp * Wp, B * n_hw
    idx = np.arange(Mp)
    bb, rem = idx // (Hp * Wp), idx % (Hp * Wp)
    yy, xx = rem // Wp, rem % Wp
    inter = (yy >= 1) & (yy <= Hh) & (xx >= 1) & (xx <= Wh)
    comp = bb * n_hw + (yy - 1) * Wh + (xx - 1)
    S = np.zeros((Mp, B), np.float32)
    S[idx[inter], bb[inter]] = 1.0
    P = np.zeros((Mp, Mi), np.float32)
    P[idx[inter], comp[inter]] = 1.0
    Sc = np.zeros((Mi, B), np.float32)
    Sc[np.arange(Mi), np.arange(Mi) // n_hw] = 1.0
    return (jnp.asarray(P.T), jnp.asarray(P), jnp.asarray(S),
            jnp.asarray(S.T), jnp.asarray(Sc), jnp.asarray(Sc.T))


def _const_spec(a):
    nd = a.ndim
    return pl.BlockSpec(a.shape, lambda n, _nd=nd: (0,) * _nd)


def down_forward(x_nchw, t, params, *, batch_block=None):
    (w1a, g1a, b1a, w1b, g1b, b1b,
     w2a, g2a, b2a, w2b, g2b, b2b, ew, eb) = params

    x = x_nchw.astype(jnp.float32)
    N, Cin, H, W = x.shape
    assert H % 2 == 0 and W % 2 == 0, "MaxPool2d(2) requires even H, W"
    Hh, Wh = H // 2, W // 2
    Hp, Wp = Hh + 2, Wh + 2
    n_hw = Hh * Wh
    Cout = w2b.shape[-1]

    # ---- generation-aware VMEM budget & batch-block selection ---------------
    try:
        vmem_cap = int(pltpu.get_tpu_info().vmem_capacity_bytes)
    except Exception:
        vmem_cap = 64 * 2**20                       # conservative (v7x per-TC)
    budget = min(vmem_cap // 6, 12 * 2**20)
    B = batch_block if batch_block is not None else _pick_batch_block(
        N, Hh, Wh, Cin, Cout, budget)
    assert N % B == 0
    G = N // B
    Mp, Mi = B * Hp * Wp, B * n_hw

    # ---- cheap XLA glue (pool, channel-major packing, embedding Linear) -----
    xp = x.reshape(N, Cin, Hh, 2, Wh, 2).max(axis=(3, 5))         # (N,Cin,Hh,Wh)
    xc = xp.reshape(G, B, Cin, n_hw).transpose(0, 2, 1, 3).reshape(G, Cin, Mi)
    emb = jax.nn.silu(t.astype(jnp.float32)) @ ew + eb            # (N, Cout)
    embT = emb.reshape(G, B, Cout).transpose(0, 2, 1)             # (G, Cout, B)
    # im2col weights transposed for channel-major matmuls: (Cout, 9*Cin).
    w1aT = w1a.reshape(-1, w1a.shape[-1]).T
    w1bT = w1b.reshape(-1, w1b.shape[-1]).T
    w2aT = w2a.reshape(-1, w2a.shape[-1]).T
    w2bT = w2b.reshape(-1, w2b.shape[-1]).T
    # GroupNorm affines as (C, 1) columns (sublane = channel).
    g1ac, b1ac, g1bc, b1bc = g1a.T, b1a.T, g1b.T, b1b.T
    g2ac, b2ac, g2bc, b2bc = g2a.T, b2a.T, g2b.T, b2b.T
    P_T, P, S, S_T, Sc, Sc_T = _selector_mats(B, Hh, Wh)

    in_specs = [
        pl.BlockSpec((1, Cin, Mi), lambda n: (n, 0, 0)),
        pl.BlockSpec((1, Cout, B), lambda n: (n, 0, 0)),
        _const_spec(P_T), _const_spec(P), _const_spec(S), _const_spec(S_T),
        _const_spec(Sc), _const_spec(Sc_T),
        _const_spec(w1aT), _const_spec(g1ac), _const_spec(b1ac),
        _const_spec(w1bT), _const_spec(g1bc), _const_spec(b1bc),
        _const_spec(w2aT), _const_spec(g2ac), _const_spec(b2ac),
        _const_spec(w2bT), _const_spec(g2bc), _const_spec(b2bc),
    ]
    out_specs = pl.BlockSpec((1, Cout, Mi), lambda n: (n, 0, 0))

    step_bytes = _step_vmem_bytes(B, Hh, Wh, Cin, Cout)
    vmem_limit = None
    if step_bytes > 8 * 2**20:   # only raise the scoped limit when needed
        vmem_limit = int(min(step_bytes * 3 // 2 + (2 << 20),
                             vmem_cap * 9 // 20))

    out = pl.pallas_call(
        functools.partial(_down_kernel, Wp),
        out_shape=jax.ShapeDtypeStruct((G, Cout, Mi), jnp.float32),
        grid=(G,),
        in_specs=in_specs,
        out_specs=out_specs,
        compiler_params=pltpu.CompilerParams(
            dimension_semantics=("parallel",),
            vmem_limit_bytes=vmem_limit),
    )(xc, embT, P_T, P, S, S_T, Sc, Sc_T,
      w1aT, g1ac, b1ac, w1bT, g1bc, b1bc,
      w2aT, g2ac, b2ac, w2bT, g2bc, b2bc)

    out = out.reshape(G, Cout, B, Hh, Wh).transpose(0, 2, 1, 3, 4)
    return out.reshape(N, Cout, Hh, Wh)


# ------------------------------- test harness --------------------------------
def init_params(key, in_ch, out_ch, embed_dim):
    ks = jax.random.split(key, 16)

    def conv_w(k, cin, cout):
        return jax.random.normal(k, (3, 3, cin, cout), jnp.float32) / np.sqrt(9 * cin)

    w1a = conv_w(ks[0], in_ch, in_ch)
    w1b = conv_w(ks[1], in_ch, in_ch)
    w2a = conv_w(ks[2], in_ch, out_ch)
    w2b = conv_w(ks[3], out_ch, out_ch)
    g1a = 1.0 + 0.1 * jax.random.normal(ks[4], (1, in_ch), jnp.float32)
    b1a = 0.1 * jax.random.normal(ks[5], (1, in_ch), jnp.float32)
    g1b = 1.0 + 0.1 * jax.random.normal(ks[6], (1, in_ch), jnp.float32)
    b1b = 0.1 * jax.random.normal(ks[7], (1, in_ch), jnp.float32)
    g2a = 1.0 + 0.1 * jax.random.normal(ks[8], (1, out_ch), jnp.float32)
    b2a = 0.1 * jax.random.normal(ks[9], (1, out_ch), jnp.float32)
    g2b = 1.0 + 0.1 * jax.random.normal(ks[10], (1, out_ch), jnp.float32)
    b2b = 0.1 * jax.random.normal(ks[11], (1, out_ch), jnp.float32)
    ew = jax.random.normal(ks[12], (embed_dim, out_ch), jnp.float32) / np.sqrt(embed_dim)
    eb = 0.1 * jax.random.normal(ks[13], (1, out_ch), jnp.float32)
    return (w1a, g1a, b1a, w1b, g1b, b1b,
            w2a, g2a, b2a, w2b, g2b, b2b, ew, eb)


def down_reference(x_nchw, t, params):
    """Pure-JAX reference mirroring the PyTorch module."""
    (w1a, g1a, b1a, w1b, g1b, b1b,
     w2a, g2a, b2a, w2b, g2b, b2b, ew, eb) = params
    x = jnp.transpose(x_nchw, (0, 2, 3, 1))
    N, H, W, C = x.shape
    xp = x.reshape(N, H // 2, 2, W // 2, 2, C).max(axis=(2, 4))

    def conv(v, w):
        return jax.lax.conv_general_dilated(
            v, w, (1, 1), "SAME", dimension_numbers=("NHWC", "HWIO", "NHWC"))

    def gn(v, g, b, eps=1e-5):
        mu = v.mean(axis=(1, 2, 3), keepdims=True)
        var = ((v - mu) ** 2).mean(axis=(1, 2, 3), keepdims=True)
        return (v - mu) * jax.lax.rsqrt(var + eps) * g[0] + b[0]

    gelu = lambda v: jax.nn.gelu(v, approximate=False)
    h = gelu(gn(conv(xp, w1a), g1a, b1a))
    h = gn(conv(h, w1b), g1b, b1b)
    r = gelu(xp + h)
    h = gelu(gn(conv(r, w2a), g2a, b2a))
    h = gn(conv(h, w2b), g2b, b2b)
    emb = jax.nn.silu(t) @ ew + eb[0]
    out = h + emb[:, None, None, :]
    return jnp.transpose(out, (0, 3, 1, 2))


if __name__ == "__main__":
    N, Cin, Cout, H, W, E = 2, 4, 8, 16, 16, 32
    key = jax.random.PRNGKey(0)
    kx, kt, kp = jax.random.split(key, 3)
    x = jax.random.normal(kx, (N, Cin, H, W), jnp.float32)   # NCHW, like PyTorch
    t = jax.random.normal(kt, (N, E), jnp.float32)
    params = init_params(kp, Cin, Cout, E)

    out = down_forward(x, t, params)
    out = jax.block_until_ready(out)

    ref = down_reference(x, t, params)
    np.testing.assert_allclose(np.asarray(out), np.asarray(ref),
                               rtol=2e-3, atol=2e-3)
    print("KERNEL_OK")
</pallas_src>

<mosaic_0001>
module attributes {stable_mosaic.version = 11 : i64} {
  func.func @_down_kernel(%arg0: i32, %arg1: memref<1x4x128xf32, #tpu.memory_space<vmem>>, %arg2: memref<1x8x2xf32, #tpu.memory_space<vmem>>, %arg3: memref<128x200xf32, #tpu.memory_space<vmem>>, %arg4: memref<200x128xf32, #tpu.memory_space<vmem>>, %arg5: memref<200x2xf32, #tpu.memory_space<vmem>>, %arg6: memref<2x200xf32, #tpu.memory_space<vmem>>, %arg7: memref<128x2xf32, #tpu.memory_space<vmem>>, %arg8: memref<2x128xf32, #tpu.memory_space<vmem>>, %arg9: memref<4x36xf32, #tpu.memory_space<vmem>>, %arg10: memref<4x1xf32, #tpu.memory_space<vmem>>, %arg11: memref<4x1xf32, #tpu.memory_space<vmem>>, %arg12: memref<4x36xf32, #tpu.memory_space<vmem>>, %arg13: memref<4x1xf32, #tpu.memory_space<vmem>>, %arg14: memref<4x1xf32, #tpu.memory_space<vmem>>, %arg15: memref<8x36xf32, #tpu.memory_space<vmem>>, %arg16: memref<8x1xf32, #tpu.memory_space<vmem>>, %arg17: memref<8x1xf32, #tpu.memory_space<vmem>>, %arg18: memref<8x72xf32, #tpu.memory_space<vmem>>, %arg19: memref<8x1xf32, #tpu.memory_space<vmem>>, %arg20: memref<8x1xf32, #tpu.memory_space<vmem>>, %arg21: memref<1x8x128xf32, #tpu.memory_space<vmem>>) attributes {dimension_semantics = [#tpu.dimension_semantics<parallel>], iteration_bounds = array<i64: 1>, scalar_prefetch = 0 : i64, scratch_operands = 0 : i64, tpu.core_type = #tpu.core_type<tc>, window_params = [{transform_indices = @transform_0, window_bounds = array<i64: 1, 4, 128>}, {transform_indices = @transform_1, window_bounds = array<i64: 1, 8, 2>}, {pipeline_mode = #tpu.pipeline_mode<synchronous>, transform_indices = @transform_2, window_bounds = array<i64: 128, 200>}, {pipeline_mode = #tpu.pipeline_mode<synchronous>, transform_indices = @transform_3, window_bounds = array<i64: 200, 128>}, {pipeline_mode = #tpu.pipeline_mode<synchronous>, transform_indices = @transform_4, window_bounds = array<i64: 200, 2>}, {pipeline_mode = #tpu.pipeline_mode<synchronous>, transform_indices = @transform_5, window_bounds = array<i64: 2, 200>}, {pipeline_mode = #tpu.pipeline_mode<synchronous>, transform_indices = @transform_6, window_bounds = array<i64: 128, 2>}, {pipeline_mode = #tpu.pipeline_mode<synchronous>, transform_indices = @transform_7, window_bounds = array<i64: 2, 128>}, {pipeline_mode = #tpu.pipeline_mode<synchronous>, transform_indices = @transform_8, window_bounds = array<i64: 4, 36>}, {pipeline_mode = #tpu.pipeline_mode<synchronous>, transform_indices = @transform_9, window_bounds = array<i64: 4, 1>}, {pipeline_mode = #tpu.pipeline_mode<synchronous>, transform_indices = @transform_10, window_bounds = array<i64: 4, 1>}, {pipeline_mode = #tpu.pipeline_mode<synchronous>, transform_indices = @transform_11, window_bounds = array<i64: 4, 36>}, {pipeline_mode = #tpu.pipeline_mode<synchronous>, transform_indices = @transform_12, window_bounds = array<i64: 4, 1>}, {pipeline_mode = #tpu.pipeline_mode<synchronous>, transform_indices = @transform_13, window_bounds = array<i64: 4, 1>}, {pipeline_mode = #tpu.pipeline_mode<synchronous>, transform_indices = @transform_14, window_bounds = array<i64: 8, 36>}, {pipeline_mode = #tpu.pipeline_mode<synchronous>, transform_indices = @transform_15, window_bounds = array<i64: 8, 1>}, {pipeline_mode = #tpu.pipeline_mode<synchronous>, transform_indices = @transform_16, window_bounds = array<i64: 8, 1>}, {pipeline_mode = #tpu.pipeline_mode<synchronous>, transform_indices = @transform_17, window_bounds = array<i64: 8, 72>}, {pipeline_mode = #tpu.pipeline_mode<synchronous>, transform_indices = @transform_18, window_bounds = array<i64: 8, 1>}, {pipeline_mode = #tpu.pipeline_mode<synchronous>, transform_indices = @transform_19, window_bounds = array<i64: 8, 1>}, {transform_indices = @transform_20, window_bounds = array<i64: 1, 8, 128>}]} {
    %c0 = arith.constant 0 : index
    %c0_0 = arith.constant 0 : index
    %0 = vector.load %arg3[%c0, %c0_0] : memref<128x200xf32, #tpu.memory_space<vmem>>, vector<128x200xf32>
    %c0_1 = arith.constant 0 : index
    %c0_2 = arith.constant 0 : index
    %1 = vector.load %arg4[%c0_1, %c0_2] : memref<200x128xf32, #tpu.memory_space<vmem>>, vector<200x128xf32>
    %c0_3 = arith.constant 0 : index
    %c0_4 = arith.constant 0 : index
    %2 = vector.load %arg5[%c0_3, %c0_4] : memref<200x2xf32, #tpu.memory_space<vmem>>, vector<200x2xf32>
    %c0_5 = arith.constant 0 : index
    %c0_6 = arith.constant 0 : index
    %3 = vector.load %arg6[%c0_5, %c0_6] : memref<2x200xf32, #tpu.memory_space<vmem>>, vector<2x200xf32>
    %c0_7 = arith.constant 0 : index
    %c0_8 = arith.constant 0 : index
    %4 = vector.load %arg7[%c0_7, %c0_8] : memref<128x2xf32, #tpu.memory_space<vmem>>, vector<128x2xf32>
    %c0_9 = arith.constant 0 : index
    %c0_10 = arith.constant 0 : index
    %5 = vector.load %arg8[%c0_9, %c0_10] : memref<2x128xf32, #tpu.memory_space<vmem>>, vector<2x128xf32>
    %c0_11 = arith.constant 0 : index
    %c0_12 = arith.constant 0 : index
    %c0_13 = arith.constant 0 : index
    %6 = vector.load %arg1[%c0_11, %c0_12, %c0_13] : memref<1x4x128xf32, #tpu.memory_space<vmem>>, vector<1x4x128xf32>
    %7 = vector.shape_cast %6 : vector<1x4x128xf32> to vector<4x128xf32>
    %cst = arith.constant dense<0.000000e+00> : vector<4x200xf32>
    %8 = tpu.matmul %7, %0, %cst {dimension_numbers = #tpu.dot_dimension_numbers<[1], [0], [0], [1], [0, 0, 1, 1], [], []>} : vector<4x128xf32>, vector<128x200xf32>, vector<4x200xf32> -> vector<4x200xf32>
    %c0_14 = arith.constant 0 : index
    %c0_15 = arith.constant 0 : index
    %9 = vector.load %arg9[%c0_14, %c0_15] : memref<4x36xf32, #tpu.memory_space<vmem>>, vector<4x36xf32>
    %10 = vector.extract_strided_slice %8 {offsets = [0, 189], sizes = [4, 11], strides = [1, 1]} : vector<4x200xf32> to vector<4x11xf32>
    %11 = vector.extract_strided_slice %8 {offsets = [0, 0], sizes = [4, 189], strides = [1, 1]} : vector<4x200xf32> to vector<4x189xf32>
    %12 = tpu.concatenate %10, %11 in 1 : vector<4x11xf32>, vector<4x189xf32> -> vector<4x200xf32>
    %13 = vector.extract_strided_slice %8 {offsets = [0, 190], sizes = [4, 10], strides = [1, 1]} : vector<4x200xf32> to vector<4x10xf32>
    %14 = vector.extract_strided_slice %8 {offsets = [0, 0], sizes = [4, 190], strides = [1, 1]} : vector<4x200xf32> to vector<4x190xf32>
    %15 = tpu.concatenate %13, %14 in 1 : vector<4x10xf32>, vector<4x190xf32> -> vector<4x200xf32>
    %16 = vector.extract_strided_slice %8 {offsets = [0, 191], sizes = [4, 9], strides = [1, 1]} : vector<4x200xf32> to vector<4x9xf32>
    %17 = vector.extract_strided_slice %8 {offsets = [0, 0], sizes = [4, 191], strides = [1, 1]} : vector<4x200xf32> to vector<4x191xf32>
    %18 = tpu.concatenate %16, %17 in 1 : vector<4x9xf32>, vector<4x191xf32> -> vector<4x200xf32>
    %19 = vector.extract_strided_slice %8 {offsets = [0, 199], sizes = [4, 1], strides = [1, 1]} : vector<4x200xf32> to vector<4x1xf32>
    %20 = vector.extract_strided_slice %8 {offsets = [0, 0], sizes = [4, 199], strides = [1, 1]} : vector<4x200xf32> to vector<4x199xf32>
    %21 = tpu.concatenate %19, %20 in 1 : vector<4x1xf32>, vector<4x199xf32> -> vector<4x200xf32>
    %22 = vector.extract_strided_slice %8 {offsets = [0, 1], sizes = [4, 199], strides = [1, 1]} : vector<4x200xf32> to vector<4x199xf32>
    %23 = vector.extract_strided_slice %8 {offsets = [0, 0], sizes = [4, 1], strides = [1, 1]} : vector<4x200xf32> to vector<4x1xf32>
    %24 = tpu.concatenate %22, %23 in 1 : vector<4x199xf32>, vector<4x1xf32> -> vector<4x200xf32>
    %25 = vector.extract_strided_slice %8 {offsets = [0, 9], sizes = [4, 191], strides = [1, 1]} : vector<4x200xf32> to vector<4x191xf32>
    %26 = vector.extract_strided_slice %8 {offsets = [0, 0], sizes = [4, 9], strides = [1, 1]} : vector<4x200xf32> to vector<4x9xf32>
    %27 = tpu.concatenate %25, %26 in 1 : vector<4x191xf32>, vector<4x9xf32> -> vector<4x200xf32>
    %28 = vector.extract_strided_slice %8 {offsets = [0, 10], sizes = [4, 190], strides = [1, 1]} : vector<4x200xf32> to vector<4x190xf32>
    %29 = vector.extract_strided_slice %8 {offsets = [0, 0], sizes = [4, 10], strides = [1, 1]} : vector<4x200xf32> to vector<4x10xf32>
    %30 = tpu.concatenate %28, %29 in 1 : vector<4x190xf32>, vector<4x10xf32> -> vector<4x200xf32>
    %31 = vector.extract_strided_slice %8 {offsets = [0, 11], sizes = [4, 189], strides = [1, 1]} : vector<4x200xf32> to vector<4x189xf32>
    %32 = vector.extract_strided_slice %8 {offsets = [0, 0], sizes = [4, 11], strides = [1, 1]} : vector<4x200xf32> to vector<4x11xf32>
    %33 = tpu.concatenate %31, %32 in 1 : vector<4x189xf32>, vector<4x11xf32> -> vector<4x200xf32>
    %34 = tpu.concatenate %12, %15, %18, %21, %8, %24, %27, %30, %33 in 0 : vector<4x200xf32>, vector<4x200xf32>, vector<4x200xf32>, vector<4x200xf32>, vector<4x200xf32>, vector<4x200xf32>, vector<4x200xf32>, vector<4x200xf32>, vector<4x200xf32> -> vector<36x200xf32>
    %cst_16 = arith.constant dense<0.000000e+00> : vector<4x200xf32>
    %35 = tpu.matmul %9, %34, %cst_16 {dimension_numbers = #tpu.dot_dimension_numbers<[1], [0], [0], [1], [0, 0, 1, 1], [], []>} : vector<4x36xf32>, vector<36x200xf32>, vector<4x200xf32> -> vector<4x200xf32>
    %c0_17 = arith.constant 0 : index
    %c0_18 = arith.constant 0 : index
    %36 = vector.load %arg10[%c0_17, %c0_18] : memref<4x1xf32, #tpu.memory_space<vmem>>, vector<4x1xf32>
    %c0_19 = arith.constant 0 : index
    %c0_20 = arith.constant 0 : index
    %37 = vector.load %arg11[%c0_19, %c0_20] : memref<4x1xf32, #tpu.memory_space<vmem>>, vector<4x1xf32>
    %cst_21 = arith.constant dense<0.000000e+00> : vector<4x2xf32>
    %38 = tpu.matmul %35, %2, %cst_21 {dimension_numbers = #tpu.dot_dimension_numbers<[1], [0], [0], [1], [0, 0, 1, 1], [], []>} : vector<4x200xf32>, vector<200x2xf32>, vector<4x2xf32> -> vector<4x2xf32>
    %39 = arith.mulf %35, %35 : vector<4x200xf32>
    %cst_22 = arith.constant dense<0.000000e+00> : vector<4x2xf32>
    %40 = tpu.matmul %39, %2, %cst_22 {dimension_numbers = #tpu.dot_dimension_numbers<[1], [0], [0], [1], [0, 0, 1, 1], [], []>} : vector<4x200xf32>, vector<200x2xf32>, vector<4x2xf32> -> vector<4x2xf32>
    %cst_23 = arith.constant dense<0.000000e+00> : vector<2xf32>
    %41 = vector.multi_reduction <add>, %38, %cst_23 [0] : vector<4x2xf32> to vector<2xf32>
    %42 = vector.shape_cast %41 : vector<2xf32> to vector<1x2xf32>
    %cst_24 = arith.constant 3.906250e-03 : f32
    %43 = vector.broadcast %cst_24 : f32 to vector<1x2xf32>
    %44 = arith.mulf %42, %43 : vector<1x2xf32>
    %cst_25 = arith.constant dense<0.000000e+00> : vector<2xf32>
    %45 = vector.multi_reduction <add>, %40, %cst_25 [0] : vector<4x2xf32> to vector<2xf32>
    %46 = vector.shape_cast %45 : vector<2xf32> to vector<1x2xf32>
    %cst_26 = arith.constant 3.906250e-03 : f32
    %47 = vector.broadcast %cst_26 : f32 to vector<1x2xf32>
    %48 = arith.mulf %46, %47 : vector<1x2xf32>
    %49 = arith.mulf %44, %44 : vector<1x2xf32>
    %50 = arith.subf %48, %49 : vector<1x2xf32>
    %cst_27 = arith.constant 0.000000e+00 : f32
    %51 = vector.broadcast %cst_27 : f32 to vector<1x2xf32>
    %52 = arith.maximumf %50, %51 : vector<1x2xf32>
    %cst_28 = arith.constant 9.99999974E-6 : f32
    %53 = vector.broadcast %cst_28 : f32 to vector<1x2xf32>
    %54 = arith.addf %52, %53 : vector<1x2xf32>
    %55 = math.rsqrt %54 : vector<1x2xf32>
    %56 = vector.broadcast %36 : vector<4x1xf32> to vector<4x2xf32>
    %57 = vector.broadcast %55 : vector<1x2xf32> to vector<4x2xf32>
    %58 = arith.mulf %56, %57 : vector<4x2xf32>
    %59 = vector.broadcast %44 : vector<1x2xf32> to vector<4x2xf32>
    %60 = arith.mulf %59, %58 : vector<4x2xf32>
    %61 = vector.broadcast %37 : vector<4x1xf32> to vector<4x2xf32>
    %62 = arith.subf %61, %60 : vector<4x2xf32>
    %cst_29 = arith.constant dense<0.000000e+00> : vector<4x200xf32>
    %63 = tpu.matmul %58, %3, %cst_29 {dimension_numbers = #tpu.dot_dimension_numbers<[1], [0], [0], [1], [0, 0, 1, 1], [], []>} : vector<4x2xf32>, vector<2x200xf32>, vector<4x200xf32> -> vector<4x200xf32>
    %64 = arith.mulf %35, %63 : vector<4x200xf32>
    %cst_30 = arith.constant dense<0.000000e+00> : vector<4x200xf32>
    %65 = tpu.matmul %62, %3, %cst_30 {dimension_numbers = #tpu.dot_dimension_numbers<[1], [0], [0], [1], [0, 0, 1, 1], [], []>} : vector<4x2xf32>, vector<2x200xf32>, vector<4x200xf32> -> vector<4x200xf32>
    %66 = arith.addf %64, %65 : vector<4x200xf32>
    %cst_31 = arith.constant 5.000000e-01 : f32
    %67 = vector.broadcast %cst_31 : f32 to vector<4x200xf32>
    %68 = arith.mulf %67, %66 : vector<4x200xf32>
    %cst_32 = arith.constant 0.707106769 : f32
    %69 = vector.broadcast %cst_32 : f32 to vector<4x200xf32>
    %70 = arith.mulf %66, %69 : vector<4x200xf32>
    %71 = math.absf %70 : vector<4x200xf32>
    %cst_33 = arith.constant 0.327591091 : f32
    %72 = vector.broadcast %cst_33 : f32 to vector<4x200xf32>
    %73 = arith.mulf %72, %71 : vector<4x200xf32>
    %cst_34 = arith.constant 1.000000e+00 : f32
    %74 = vector.broadcast %cst_34 : f32 to vector<4x200xf32>
    %75 = arith.addf %74, %73 : vector<4x200xf32>
    %cst_35 = arith.constant 1.000000e+00 : f32
    %76 = vector.broadcast %cst_35 : f32 to vector<4x200xf32>
    %77 = arith.divf %76, %75 : vector<4x200xf32>
    %cst_36 = arith.constant 1.06140542 : f32
    %78 = vector.broadcast %cst_36 : f32 to vector<4x200xf32>
    %79 = arith.mulf %78, %77 : vector<4x200xf32>
    %cst_37 = arith.constant -1.45315206 : f32
    %80 = vector.broadcast %cst_37 : f32 to vector<4x200xf32>
    %81 = arith.addf %79, %80 : vector<4x200xf32>
    %82 = arith.mulf %81, %77 : vector<4x200xf32>
    %cst_38 = arith.constant 1.42141378 : f32
    %83 = vector.broadcast %cst_38 : f32 to vector<4x200xf32>
    %84 = arith.addf %82, %83 : vector<4x200xf32>
    %85 = arith.mulf %84, %77 : vector<4x200xf32>
    %cst_39 = arith.constant -0.284496725 : f32
    %86 = vector.broadcast %cst_39 : f32 to vector<4x200xf32>
    %87 = arith.addf %85, %86 : vector<4x200xf32>
    %88 = arith.mulf %87, %77 : vector<4x200xf32>
    %cst_40 = arith.constant 0.254829586 : f32
    %89 = vector.broadcast %cst_40 : f32 to vector<4x200xf32>
    %90 = arith.addf %88, %89 : vector<4x200xf32>
    %91 = arith.mulf %90, %77 : vector<4x200xf32>
    %cst_41 = arith.constant 0.000000e+00 : f32
    %92 = vector.broadcast %cst_41 : f32 to vector<4x200xf32>
    %93 = arith.subf %92, %71 : vector<4x200xf32>
    %94 = arith.mulf %93, %71 : vector<4x200xf32>
    %95 = math.exp %94 : vector<4x200xf32>
    %96 = arith.mulf %91, %95 : vector<4x200xf32>
    %cst_42 = arith.constant 1.000000e+00 : f32
    %97 = vector.broadcast %cst_42 : f32 to vector<4x200xf32>
    %98 = arith.subf %97, %96 : vector<4x200xf32>
    %cst_43 = arith.constant 0.000000e+00 : f32
    %99 = vector.broadcast %cst_43 : f32 to vector<4x200xf32>
    %100 = arith.cmpf oge, %70, %99 : vector<4x200xf32>
    %cst_44 = arith.constant 0.000000e+00 : f32
    %101 = vector.broadcast %cst_44 : f32 to vector<4x200xf32>
    %102 = arith.subf %101, %98 : vector<4x200xf32>
    %103 = arith.select %100, %98, %102 : vector<4x200xi1>, vector<4x200xf32>
    %cst_45 = arith.constant 1.000000e+00 : f32
    %104 = vector.broadcast %cst_45 : f32 to vector<4x200xf32>
    %105 = arith.addf %104, %103 : vector<4x200xf32>
    %106 = arith.mulf %68, %105 : vector<4x200xf32>
    %c0_46 = arith.constant 0 : index
    %c0_47 = arith.constant 0 : index
    %107 = vector.load %arg12[%c0_46, %c0_47] : memref<4x36xf32, #tpu.memory_space<vmem>>, vector<4x36xf32>
    %108 = vector.extract_strided_slice %106 {offsets = [0, 189], sizes = [4, 11], strides = [1, 1]} : vector<4x200xf32> to vector<4x11xf32>
    %109 = vector.extract_strided_slice %106 {offsets = [0, 0], sizes = [4, 189], strides = [1, 1]} : vector<4x200xf32> to vector<4x189xf32>
    %110 = tpu.concatenate %108, %109 in 1 : vector<4x11xf32>, vector<4x189xf32> -> vector<4x200xf32>
    %111 = vector.extract_strided_slice %106 {offsets = [0, 190], sizes = [4, 10], strides = [1, 1]} : vector<4x200xf32> to vector<4x10xf32>
    %112 = vector.extract_strided_slice %106 {offsets = [0, 0], sizes = [4, 190], strides = [1, 1]} : vector<4x200xf32> to vector<4x190xf32>
    %113 = tpu.concatenate %111, %112 in 1 : vector<4x10xf32>, vector<4x190xf32> -> vector<4x200xf32>
    %114 = vector.extract_strided_slice %106 {offsets = [0, 191], sizes = [4, 9], strides = [1, 1]} : vector<4x200xf32> to vector<4x9xf32>
    %115 = vector.extract_strided_slice %106 {offsets = [0, 0], sizes = [4, 191], strides = [1, 1]} : vector<4x200xf32> to vector<4x191xf32>
    %116 = tpu.concatenate %114, %115 in 1 : vector<4x9xf32>, vector<4x191xf32> -> vector<4x200xf32>
    %117 = vector.extract_strided_slice %106 {offsets = [0, 199], sizes = [4, 1], strides = [1, 1]} : vector<4x200xf32> to vector<4x1xf32>
    %118 = vector.extract_strided_slice %106 {offsets = [0, 0], sizes = [4, 199], strides = [1, 1]} : vector<4x200xf32> to vector<4x199xf32>
    %119 = tpu.concatenate %117, %118 in 1 : vector<4x1xf32>, vector<4x199xf32> -> vector<4x200xf32>
    %120 = vector.extract_strided_slice %106 {offsets = [0, 1], sizes = [4, 199], strides = [1, 1]} : vector<4x200xf32> to vector<4x199xf32>
    %121 = vector.extract_strided_slice %106 {offsets = [0, 0], sizes = [4, 1], strides = [1, 1]} : vector<4x200xf32> to vector<4x1xf32>
    %122 = tpu.concatenate %120, %121 in 1 : vector<4x199xf32>, vector<4x1xf32> -> vector<4x200xf32>
    %123 = vector.extract_strided_slice %106 {offsets = [0, 9], sizes = [4, 191], strides = [1, 1]} : vector<4x200xf32> to vector<4x191xf32>
    %124 = vector.extract_strided_slice %106 {offsets = [0, 0], sizes = [4, 9], strides = [1, 1]} : vector<4x200xf32> to vector<4x9xf32>
    %125 = tpu.concatenate %123, %124 in 1 : vector<4x191xf32>, vector<4x9xf32> -> vector<4x200xf32>
    %126 = vector.extract_strided_slice %106 {offsets = [0, 10], sizes = [4, 190], strides = [1, 1]} : vector<4x200xf32> to vector<4x190xf32>
    %127 = vector.extract_strided_slice %106 {offsets = [0, 0], sizes = [4, 10], strides = [1, 1]} : vector<4x200xf32> to vector<4x10xf32>
    %128 = tpu.concatenate %126, %127 in 1 : vector<4x190xf32>, vector<4x10xf32> -> vector<4x200xf32>
    %129 = vector.extract_strided_slice %106 {offsets = [0, 11], sizes = [4, 189], strides = [1, 1]} : vector<4x200xf32> to vector<4x189xf32>
    %130 = vector.extract_strided_slice %106 {offsets = [0, 0], sizes = [4, 11], strides = [1, 1]} : vector<4x200xf32> to vector<4x11xf32>
    %131 = tpu.concatenate %129, %130 in 1 : vector<4x189xf32>, vector<4x11xf32> -> vector<4x200xf32>
    %132 = tpu.concatenate %110, %113, %116, %119, %106, %122, %125, %128, %131 in 0 : vector<4x200xf32>, vector<4x200xf32>, vector<4x200xf32>, vector<4x200xf32>, vector<4x200xf32>, vector<4x200xf32>, vector<4x200xf32>, vector<4x200xf32>, vector<4x200xf32> -> vector<36x200xf32>
    %cst_48 = arith.constant dense<0.000000e+00> : vector<4x200xf32>
    %133 = tpu.matmul %107, %132, %cst_48 {dimension_numbers = #tpu.dot_dimension_numbers<[1], [0], [0], [1], [0, 0, 1, 1], [], []>} : vector<4x36xf32>, vector<36x200xf32>, vector<4x200xf32> -> vector<4x200xf32>
    %c0_49 = arith.constant 0 : index
    %c0_50 = arith.constant 0 : index
    %134 = vector.load %arg13[%c0_49, %c0_50] : memref<4x1xf32, #tpu.memory_space<vmem>>, vector<4x1xf32>
    %c0_51 = arith.constant 0 : index
    %c0_52 = arith.constant 0 : index
    %135 = vector.load %arg14[%c0_51, %c0_52] : memref<4x1xf32, #tpu.memory_space<vmem>>, vector<4x1xf32>
    %cst_53 = arith.constant dense<0.000000e+00> : vector<4x2xf32>
    %136 = tpu.matmul %133, %2, %cst_53 {dimension_numbers = #tpu.dot_dimension_numbers<[1], [0], [0], [1], [0, 0, 1, 1], [], []>} : vector<4x200xf32>, vector<200x2xf32>, vector<4x2xf32> -> vector<4x2xf32>
    %137 = arith.mulf %133, %133 : vector<4x200xf32>
    %cst_54 = arith.constant dense<0.000000e+00> : vector<4x2xf32>
    %138 = tpu.matmul %137, %2, %cst_54 {dimension_numbers = #tpu.dot_dimension_numbers<[1], [0], [0], [1], [0, 0, 1, 1], [], []>} : vector<4x200xf32>, vector<200x2xf32>, vector<4x2xf32> -> vector<4x2xf32>
    %cst_55 = arith.constant dense<0.000000e+00> : vector<2xf32>
    %139 = vector.multi_reduction <add>, %136, %cst_55 [0] : vector<4x2xf32> to vector<2xf32>
    %140 = vector.shape_cast %139 : vector<2xf32> to vector<1x2xf32>
    %cst_56 = arith.constant 3.906250e-03 : f32
    %141 = vector.broadcast %cst_56 : f32 to vector<1x2xf32>
    %142 = arith.mulf %140, %141 : vector<1x2xf32>
    %cst_57 = arith.constant dense<0.000000e+00> : vector<2xf32>
    %143 = vector.multi_reduction <add>, %138, %cst_57 [0] : vector<4x2xf32> to vector<2xf32>
    %144 = vector.shape_cast %143 : vector<2xf32> to vector<1x2xf32>
    %cst_58 = arith.constant 3.906250e-03 : f32
    %145 = vector.broadcast %cst_58 : f32 to vector<1x2xf32>
    %146 = arith.mulf %144, %145 : vector<1x2xf32>
    %147 = arith.mulf %142, %142 : vector<1x2xf32>
    %148 = arith.subf %146, %147 : vector<1x2xf32>
    %cst_59 = arith.constant 0.000000e+00 : f32
    %149 = vector.broadcast %cst_59 : f32 to vector<1x2xf32>
    %150 = arith.maximumf %148, %149 : vector<1x2xf32>
    %cst_60 = arith.constant 9.99999974E-6 : f32
    %151 = vector.broadcast %cst_60 : f32 to vector<1x2xf32>
    %152 = arith.addf %150, %151 : vector<1x2xf32>
    %153 = math.rsqrt %152 : vector<1x2xf32>
    %154 = vector.broadcast %134 : vector<4x1xf32> to vector<4x2xf32>
    %155 = vector.broadcast %153 : vector<1x2xf32> to vector<4x2xf32>
    %156 = arith.mulf %154, %155 : vector<4x2xf32>
    %157 = vector.broadcast %142 : vector<1x2xf32> to vector<4x2xf32>
    %158 = arith.mulf %157, %156 : vector<4x2xf32>
    %159 = vector.broadcast %135 : vector<4x1xf32> to vector<4x2xf32>
    %160 = arith.subf %159, %158 : vector<4x2xf32>
    %cst_61 = arith.constant dense<0.000000e+00> : vector<4x200xf32>
    %161 = tpu.matmul %156, %3, %cst_61 {dimension_numbers = #tpu.dot_dimension_numbers<[1], [0], [0], [1], [0, 0, 1, 1], [], []>} : vector<4x2xf32>, vector<2x200xf32>, vector<4x200xf32> -> vector<4x200xf32>
    %162 = arith.mulf %133, %161 : vector<4x200xf32>
    %cst_62 = arith.constant dense<0.000000e+00> : vector<4x200xf32>
    %163 = tpu.matmul %160, %3, %cst_62 {dimension_numbers = #tpu.dot_dimension_numbers<[1], [0], [0], [1], [0, 0, 1, 1], [], []>} : vector<4x2xf32>, vector<2x200xf32>, vector<4x200xf32> -> vector<4x200xf32>
    %164 = arith.addf %162, %163 : vector<4x200xf32>
    %165 = arith.addf %8, %164 : vector<4x200xf32>
    %cst_63 = arith.constant 5.000000e-01 : f32
    %166 = vector.broadcast %cst_63 : f32 to vector<4x200xf32>
    %167 = arith.mulf %166, %165 : vector<4x200xf32>
    %cst_64 = arith.constant 0.707106769 : f32
    %168 = vector.broadcast %cst_64 : f32 to vector<4x200xf32>
    %169 = arith.mulf %165, %168 : vector<4x200xf32>
    %170 = math.absf %169 : vector<4x200xf32>
    %cst_65 = arith.constant 0.327591091 : f32
    %171 = vector.broadcast %cst_65 : f32 to vector<4x200xf32>
    %172 = arith.mulf %171, %170 : vector<4x200xf32>
    %cst_66 = arith.constant 1.000000e+00 : f32
    %173 = vector.broadcast %cst_66 : f32 to vector<4x200xf32>
    %174 = arith.addf %173, %172 : vector<4x200xf32>
    %cst_67 = arith.constant 1.000000e+00 : f32
    %175 = vector.broadcast %cst_67 : f32 to vector<4x200xf32>
    %176 = arith.divf %175, %174 : vector<4x200xf32>
    %cst_68 = arith.constant 1.06140542 : f32
    %177 = vector.broadcast %cst_68 : f32 to vector<4x200xf32>
    %178 = arith.mulf %177, %176 : vector<4x200xf32>
    %cst_69 = arith.constant -1.45315206 : f32
    %179 = vector.broadcast %cst_69 : f32 to vector<4x200xf32>
    %180 = arith.addf %178, %179 : vector<4x200xf32>
    %181 = arith.mulf %180, %176 : vector<4x200xf32>
    %cst_70 = arith.constant 1.42141378 : f32
    %182 = vector.broadcast %cst_70 : f32 to vector<4x200xf32>
    %183 = arith.addf %181, %182 : vector<4x200xf32>
    %184 = arith.mulf %183, %176 : vector<4x200xf32>
    %cst_71 = arith.constant -0.284496725 : f32
    %185 = vector.broadcast %cst_71 : f32 to vector<4x200xf32>
    %186 = arith.addf %184, %185 : vector<4x200xf32>
    %187 = arith.mulf %186, %176 : vector<4x200xf32>
    %cst_72 = arith.constant 0.254829586 : f32
    %188 = vector.broadcast %cst_72 : f32 to vector<4x200xf32>
    %189 = arith.addf %187, %188 : vector<4x200xf32>
    %190 = arith.mulf %189, %176 : vector<4x200xf32>
    %cst_73 = arith.constant 0.000000e+00 : f32
    %191 = vector.broadcast %cst_73 : f32 to vector<4x200xf32>
    %192 = arith.subf %191, %170 : vector<4x200xf32>
    %193 = arith.mulf %192, %170 : vector<4x200xf32>
    %194 = math.exp %193 : vector<4x200xf32>
    %195 = arith.mulf %190, %194 : vector<4x200xf32>
    %cst_74 = arith.constant 1.000000e+00 : f32
    %196 = vector.broadcast %cst_74 : f32 to vector<4x200xf32>
    %197 = arith.subf %196, %195 : vector<4x200xf32>
    %cst_75 = arith.constant 0.000000e+00 : f32
    %198 = vector.broadcast %cst_75 : f32 to vector<4x200xf32>
    %199 = arith.cmpf oge, %169, %198 : vector<4x200xf32>
    %cst_76 = arith.constant 0.000000e+00 : f32
    %200 = vector.broadcast %cst_76 : f32 to vector<4x200xf32>
    %201 = arith.subf %200, %197 : vector<4x200xf32>
    %202 = arith.select %199, %197, %201 : vector<4x200xi1>, vector<4x200xf32>
    %cst_77 = arith.constant 1.000000e+00 : f32
    %203 = vector.broadcast %cst_77 : f32 to vector<4x200xf32>
    %204 = arith.addf %203, %202 : vector<4x200xf32>
    %205 = arith.mulf %167, %204 : vector<4x200xf32>
    %c0_78 = arith.constant 0 : index
    %c0_79 = arith.constant 0 : index
    %206 = vector.load %arg15[%c0_78, %c0_79] : memref<8x36xf32, #tpu.memory_space<vmem>>, vector<8x36xf32>
    %207 = vector.extract_strided_slice %205 {offsets = [0, 189], sizes = [4, 11], strides = [1, 1]} : vector<4x200xf32> to vector<4x11xf32>
    %208 = vector.extract_strided_slice %205 {offsets = [0, 0], sizes = [4, 189], strides = [1, 1]} : vector<4x200xf32> to vector<4x189xf32>
    %209 = tpu.concatenate %207, %208 in 1 : vector<4x11xf32>, vector<4x189xf32> -> vector<4x200xf32>
    %210 = vector.extract_strided_slice %205 {offsets = [0, 190], sizes = [4, 10], strides = [1, 1]} : vector<4x200xf32> to vector<4x10xf32>
    %211 = vector.extract_strided_slice %205 {offsets = [0, 0], sizes = [4, 190], strides = [1, 1]} : vector<4x200xf32> to vector<4x190xf32>
    %212 = tpu.concatenate %210, %211 in 1 : vector<4x10xf32>, vector<4x190xf32> -> vector<4x200xf32>
    %213 = vector.extract_strided_slice %205 {offsets = [0, 191], sizes = [4, 9], strides = [1, 1]} : vector<4x200xf32> to vector<4x9xf32>
    %214 = vector.extract_strided_slice %205 {offsets = [0, 0], sizes = [4, 191], strides = [1, 1]} : vector<4x200xf32> to vector<4x191xf32>
    %215 = tpu.concatenate %213, %214 in 1 : vector<4x9xf32>, vector<4x191xf32> -> vector<4x200xf32>
    %216 = vector.extract_strided_slice %205 {offsets = [0, 199], sizes = [4, 1], strides = [1, 1]} : vector<4x200xf32> to vector<4x1xf32>
    %217 = vector.extract_strided_slice %205 {offsets = [0, 0], sizes = [4, 199], strides = [1, 1]} : vector<4x200xf32> to vector<4x199xf32>
    %218 = tpu.concatenate %216, %217 in 1 : vector<4x1xf32>, vector<4x199xf32> -> vector<4x200xf32>
    %219 = vector.extract_strided_slice %205 {offsets = [0, 1], sizes = [4, 199], strides = [1, 1]} : vector<4x200xf32> to vector<4x199xf32>
    %220 = vector.extract_strided_slice %205 {offsets = [0, 0], sizes = [4, 1], strides = [1, 1]} : vector<4x200xf32> to vector<4x1xf32>
    %221 = tpu.concatenate %219, %220 in 1 : vector<4x199xf32>, vector<4x1xf32> -> vector<4x200xf32>
    %222 = vector.extract_strided_slice %205 {offsets = [0, 9], sizes = [4, 191], strides = [1, 1]} : vector<4x200xf32> to vector<4x191xf32>
    %223 = vector.extract_strided_slice %205 {offsets = [0, 0], sizes = [4, 9], strides = [1, 1]} : vector<4x200xf32> to vector<4x9xf32>
    %224 = tpu.concatenate %222, %223 in 1 : vector<4x191xf32>, vector<4x9xf32> -> vector<4x200xf32>
    %225 = vector.extract_strided_slice %205 {offsets = [0, 10], sizes = [4, 190], strides = [1, 1]} : vector<4x200xf32> to vector<4x190xf32>
    %226 = vector.extract_strided_slice %205 {offsets = [0, 0], sizes = [4, 10], strides = [1, 1]} : vector<4x200xf32> to vector<4x10xf32>
    %227 = tpu.concatenate %225, %226 in 1 : vector<4x190xf32>, vector<4x10xf32> -> vector<4x200xf32>
    %228 = vector.extract_strided_slice %205 {offsets = [0, 11], sizes = [4, 189], strides = [1, 1]} : vector<4x200xf32> to vector<4x189xf32>
    %229 = vector.extract_strided_slice %205 {offsets = [0, 0], sizes = [4, 11], strides = [1, 1]} : vector<4x200xf32> to vector<4x11xf32>
    %230 = tpu.concatenate %228, %229 in 1 : vector<4x189xf32>, vector<4x11xf32> -> vector<4x200xf32>
    %231 = tpu.concatenate %209, %212, %215, %218, %205, %221, %224, %227, %230 in 0 : vector<4x200xf32>, vector<4x200xf32>, vector<4x200xf32>, vector<4x200xf32>, vector<4x200xf32>, vector<4x200xf32>, vector<4x200xf32>, vector<4x200xf32>, vector<4x200xf32> -> vector<36x200xf32>
    %cst_80 = arith.constant dense<0.000000e+00> : vector<8x200xf32>
    %232 = tpu.matmul %206, %231, %cst_80 {dimension_numbers = #tpu.dot_dimension_numbers<[1], [0], [0], [1], [0, 0, 1, 1], [], []>} : vector<8x36xf32>, vector<36x200xf32>, vector<8x200xf32> -> vector<8x200xf32>
    %c0_81 = arith.constant 0 : index
    %c0_82 = arith.constant 0 : index
    %233 = vector.load %arg16[%c0_81, %c0_82] : memref<8x1xf32, #tpu.memory_space<vmem>>, vector<8x1xf32>
    %c0_83 = arith.constant 0 : index
    %c0_84 = arith.constant 0 : index
    %234 = vector.load %arg17[%c0_83, %c0_84] : memref<8x1xf32, #tpu.memory_space<vmem>>, vector<8x1xf32>
    %cst_85 = arith.constant dense<0.000000e+00> : vector<8x2xf32>
    %235 = tpu.matmul %232, %2, %cst_85 {dimension_numbers = #tpu.dot_dimension_numbers<[1], [0], [0], [1], [0, 0, 1, 1], [], []>} : vector<8x200xf32>, vector<200x2xf32>, vector<8x2xf32> -> vector<8x2xf32>
    %236 = arith.mulf %232, %232 : vector<8x200xf32>
    %cst_86 = arith.constant dense<0.000000e+00> : vector<8x2xf32>
    %237 = tpu.matmul %236, %2, %cst_86 {dimension_numbers = #tpu.dot_dimension_numbers<[1], [0], [0], [1], [0, 0, 1, 1], [], []>} : vector<8x200xf32>, vector<200x2xf32>, vector<8x2xf32> -> vector<8x2xf32>
    %cst_87 = arith.constant dense<0.000000e+00> : vector<2xf32>
    %238 = vector.multi_reduction <add>, %235, %cst_87 [0] : vector<8x2xf32> to vector<2xf32>
    %239 = vector.shape_cast %238 : vector<2xf32> to vector<1x2xf32>
    %cst_88 = arith.constant 0.001953125 : f32
    %240 = vector.broadcast %cst_88 : f32 to vector<1x2xf32>
    %241 = arith.mulf %239, %240 : vector<1x2xf32>
    %cst_89 = arith.constant dense<0.000000e+00> : vector<2xf32>
    %242 = vector.multi_reduction <add>, %237, %cst_89 [0] : vector<8x2xf32> to vector<2xf32>
    %243 = vector.shape_cast %242 : vector<2xf32> to vector<1x2xf32>
    %cst_90 = arith.constant 0.001953125 : f32
    %244 = vector.broadcast %cst_90 : f32 to vector<1x2xf32>
    %245 = arith.mulf %243, %244 : vector<1x2xf32>
    %246 = arith.mulf %241, %241 : vector<1x2xf32>
    %247 = arith.subf %245, %246 : vector<1x2xf32>
    %cst_91 = arith.constant 0.000000e+00 : f32
    %248 = vector.broadcast %cst_91 : f32 to vector<1x2xf32>
    %249 = arith.maximumf %247, %248 : vector<1x2xf32>
    %cst_92 = arith.constant 9.99999974E-6 : f32
    %250 = vector.broadcast %cst_92 : f32 to vector<1x2xf32>
    %251 = arith.addf %249, %250 : vector<1x2xf32>
    %252 = math.rsqrt %251 : vector<1x2xf32>
    %253 = vector.broadcast %233 : vector<8x1xf32> to vector<8x2xf32>
    %254 = vector.broadcast %252 : vector<1x2xf32> to vector<8x2xf32>
    %255 = arith.mulf %253, %254 : vector<8x2xf32>
    %256 = vector.broadcast %241 : vector<1x2xf32> to vector<8x2xf32>
    %257 = arith.mulf %256, %255 : vector<8x2xf32>
    %258 = vector.broadcast %234 : vector<8x1xf32> to vector<8x2xf32>
    %259 = arith.subf %258, %257 : vector<8x2xf32>
    %cst_93 = arith.constant dense<0.000000e+00> : vector<8x200xf32>
    %260 = tpu.matmul %255, %3, %cst_93 {dimension_numbers = #tpu.dot_dimension_numbers<[1], [0], [0], [1], [0, 0, 1, 1], [], []>} : vector<8x2xf32>, vector<2x200xf32>, vector<8x200xf32> -> vector<8x200xf32>
    %261 = arith.mulf %232, %260 : vector<8x200xf32>
    %cst_94 = arith.constant dense<0.000000e+00> : vector<8x200xf32>
    %262 = tpu.matmul %259, %3, %cst_94 {dimension_numbers = #tpu.dot_dimension_numbers<[1], [0], [0], [1], [0, 0, 1, 1], [], []>} : vector<8x2xf32>, vector<2x200xf32>, vector<8x200xf32> -> vector<8x200xf32>
    %263 = arith.addf %261, %262 : vector<8x200xf32>
    %cst_95 = arith.constant 5.000000e-01 : f32
    %264 = vector.broadcast %cst_95 : f32 to vector<8x200xf32>
    %265 = arith.mulf %264, %263 : vector<8x200xf32>
    %cst_96 = arith.constant 0.707106769 : f32
    %266 = vector.broadcast %cst_96 : f32 to vector<8x200xf32>
    %267 = arith.mulf %263, %266 : vector<8x200xf32>
    %268 = math.absf %267 : vector<8x200xf32>
    %cst_97 = arith.constant 0.327591091 : f32
    %269 = vector.broadcast %cst_97 : f32 to vector<8x200xf32>
    %270 = arith.mulf %269, %268 : vector<8x200xf32>
    %cst_98 = arith.constant 1.000000e+00 : f32
    %271 = vector.broadcast %cst_98 : f32 to vector<8x200xf32>
    %272 = arith.addf %271, %270 : vector<8x200xf32>
    %cst_99 = arith.constant 1.000000e+00 : f32
    %273 = vector.broadcast %cst_99 : f32 to vector<8x200xf32>
    %274 = arith.divf %273, %272 : vector<8x200xf32>
    %cst_100 = arith.constant 1.06140542 : f32
    %275 = vector.broadcast %cst_100 : f32 to vector<8x200xf32>
    %276 = arith.mulf %275, %274 : vector<8x200xf32>
    %cst_101 = arith.constant -1.45315206 : f32
    %277 = vector.broadcast %cst_101 : f32 to vector<8x200xf32>
    %278 = arith.addf %276, %277 : vector<8x200xf32>
    %279 = arith.mulf %278, %274 : vector<8x200xf32>
    %cst_102 = arith.constant 1.42141378 : f32
    %280 = vector.broadcast %cst_102 : f32 to vector<8x200xf32>
    %281 = arith.addf %279, %280 : vector<8x200xf32>
    %282 = arith.mulf %281, %274 : vector<8x200xf32>
    %cst_103 = arith.constant -0.284496725 : f32
    %283 = vector.broadcast %cst_103 : f32 to vector<8x200xf32>
    %284 = arith.addf %282, %283 : vector<8x200xf32>
    %285 = arith.mulf %284, %274 : vector<8x200xf32>
    %cst_104 = arith.constant 0.254829586 : f32
    %286 = vector.broadcast %cst_104 : f32 to vector<8x200xf32>
    %287 = arith.addf %285, %286 : vector<8x200xf32>
    %288 = arith.mulf %287, %274 : vector<8x200xf32>
    %cst_105 = arith.constant 0.000000e+00 : f32
    %289 = vector.broadcast %cst_105 : f32 to vector<8x200xf32>
    %290 = arith.subf %289, %268 : vector<8x200xf32>
    %291 = arith.mulf %290, %268 : vector<8x200xf32>
    %292 = math.exp %291 : vector<8x200xf32>
    %293 = arith.mulf %288, %292 : vector<8x200xf32>
    %cst_106 = arith.constant 1.000000e+00 : f32
    %294 = vector.broadcast %cst_106 : f32 to vector<8x200xf32>
    %295 = arith.subf %294, %293 : vector<8x200xf32>
    %cst_107 = arith.constant 0.000000e+00 : f32
    %296 = vector.broadcast %cst_107 : f32 to vector<8x200xf32>
    %297 = arith.cmpf oge, %267, %296 : vector<8x200xf32>
    %cst_108 = arith.constant 0.000000e+00 : f32
    %298 = vector.broadcast %cst_108 : f32 to vector<8x200xf32>
    %299 = arith.subf %298, %295 : vector<8x200xf32>
    %300 = arith.select %297, %295, %299 : vector<8x200xi1>, vector<8x200xf32>
    %cst_109 = arith.constant 1.000000e+00 : f32
    %301 = vector.broadcast %cst_109 : f32 to vector<8x200xf32>
    %302 = arith.addf %301, %300 : vector<8x200xf32>
    %303 = arith.mulf %265, %302 : vector<8x200xf32>
    %c0_110 = arith.constant 0 : index
    %c0_111 = arith.constant 0 : index
    %304 = vector.load %arg18[%c0_110, %c0_111] : memref<8x72xf32, #tpu.memory_space<vmem>>, vector<8x72xf32>
    %305 = vector.extract_strided_slice %303 {offsets = [0, 189], sizes = [8, 11], strides = [1, 1]} : vector<8x200xf32> to vector<8x11xf32>
    %306 = vector.extract_strided_slice %303 {offsets = [0, 0], sizes = [8, 189], strides = [1, 1]} : vector<8x200xf32> to vector<8x189xf32>
    %307 = tpu.concatenate %305, %306 in 1 : vector<8x11xf32>, vector<8x189xf32> -> vector<8x200xf32>
    %308 = vector.extract_strided_slice %303 {offsets = [0, 190], sizes = [8, 10], strides = [1, 1]} : vector<8x200xf32> to vector<8x10xf32>
    %309 = vector.extract_strided_slice %303 {offsets = [0, 0], sizes = [8, 190], strides = [1, 1]} : vector<8x200xf32> to vector<8x190xf32>
    %310 = tpu.concatenate %308, %309 in 1 : vector<8x10xf32>, vector<8x190xf32> -> vector<8x200xf32>
    %311 = vector.extract_strided_slice %303 {offsets = [0, 191], sizes = [8, 9], strides = [1, 1]} : vector<8x200xf32> to vector<8x9xf32>
    %312 = vector.extract_strided_slice %303 {offsets = [0, 0], sizes = [8, 191], strides = [1, 1]} : vector<8x200xf32> to vector<8x191xf32>
    %313 = tpu.concatenate %311, %312 in 1 : vector<8x9xf32>, vector<8x191xf32> -> vector<8x200xf32>
    %314 = vector.extract_strided_slice %303 {offsets = [0, 199], sizes = [8, 1], strides = [1, 1]} : vector<8x200xf32> to vector<8x1xf32>
    %315 = vector.extract_strided_slice %303 {offsets = [0, 0], sizes = [8, 199], strides = [1, 1]} : vector<8x200xf32> to vector<8x199xf32>
    %316 = tpu.concatenate %314, %315 in 1 : vector<8x1xf32>, vector<8x199xf32> -> vector<8x200xf32>
    %317 = vector.extract_strided_slice %303 {offsets = [0, 1], sizes = [8, 199], strides = [1, 1]} : vector<8x200xf32> to vector<8x199xf32>
    %318 = vector.extract_strided_slice %303 {offsets = [0, 0], sizes = [8, 1], strides = [1, 1]} : vector<8x200xf32> to vector<8x1xf32>
    %319 = tpu.concatenate %317, %318 in 1 : vector<8x199xf32>, vector<8x1xf32> -> vector<8x200xf32>
    %320 = vector.extract_strided_slice %303 {offsets = [0, 9], sizes = [8, 191], strides = [1, 1]} : vector<8x200xf32> to vector<8x191xf32>
    %321 = vector.extract_strided_slice %303 {offsets = [0, 0], sizes = [8, 9], strides = [1, 1]} : vector<8x200xf32> to vector<8x9xf32>
    %322 = tpu.concatenate %320, %321 in 1 : vector<8x191xf32>, vector<8x9xf32> -> vector<8x200xf32>
    %323 = vector.extract_strided_slice %303 {offsets = [0, 10], sizes = [8, 190], strides = [1, 1]} : vector<8x200xf32> to vector<8x190xf32>
    %324 = vector.extract_strided_slice %303 {offsets = [0, 0], sizes = [8, 10], strides = [1, 1]} : vector<8x200xf32> to vector<8x10xf32>
    %325 = tpu.concatenate %323, %324 in 1 : vector<8x190xf32>, vector<8x10xf32> -> vector<8x200xf32>
    %326 = vector.extract_strided_slice %303 {offsets = [0, 11], sizes = [8, 189], strides = [1, 1]} : vector<8x200xf32> to vector<8x189xf32>
    %327 = vector.extract_strided_slice %303 {offsets = [0, 0], sizes = [8, 11], strides = [1, 1]} : vector<8x200xf32> to vector<8x11xf32>
    %328 = tpu.concatenate %326, %327 in 1 : vector<8x189xf32>, vector<8x11xf32> -> vector<8x200xf32>
    %329 = tpu.concatenate %307, %310, %313, %316, %303, %319, %322, %325, %328 in 0 : vector<8x200xf32>, vector<8x200xf32>, vector<8x200xf32>, vector<8x200xf32>, vector<8x200xf32>, vector<8x200xf32>, vector<8x200xf32>, vector<8x200xf32>, vector<8x200xf32> -> vector<72x200xf32>
    %cst_112 = arith.constant dense<0.000000e+00> : vector<8x200xf32>
    %330 = tpu.matmul %304, %329, %cst_112 {dimension_numbers = #tpu.dot_dimension_numbers<[1], [0], [0], [1], [0, 0, 1, 1], [], []>} : vector<8x72xf32>, vector<72x200xf32>, vector<8x200xf32> -> vector<8x200xf32>
    %cst_113 = arith.constant dense<0.000000e+00> : vector<8x128xf32>
    %331 = tpu.matmul %330, %1, %cst_113 {dimension_numbers = #tpu.dot_dimension_numbers<[1], [0], [0], [1], [0, 0, 1, 1], [], []>} : vector<8x200xf32>, vector<200x128xf32>, vector<8x128xf32> -> vector<8x128xf32>
    %cst_114 = arith.constant dense<0.000000e+00> : vector<8x2xf32>
    %332 = tpu.matmul %331, %4, %cst_114 {dimension_numbers = #tpu.dot_dimension_numbers<[1], [0], [0], [1], [0, 0, 1, 1], [], []>} : vector<8x128xf32>, vector<128x2xf32>, vector<8x2xf32> -> vector<8x2xf32>
    %333 = arith.mulf %331, %331 : vector<8x128xf32>
    %cst_115 = arith.constant dense<0.000000e+00> : vector<8x2xf32>
    %334 = tpu.matmul %333, %4, %cst_115 {dimension_numbers = #tpu.dot_dimension_numbers<[1], [0], [0], [1], [0, 0, 1, 1], [], []>} : vector<8x128xf32>, vector<128x2xf32>, vector<8x2xf32> -> vector<8x2xf32>
    %cst_116 = arith.constant dense<0.000000e+00> : vector<2xf32>
    %335 = vector.multi_reduction <add>, %332, %cst_116 [0] : vector<8x2xf32> to vector<2xf32>
    %336 = vector.shape_cast %335 : vector<2xf32> to vector<1x2xf32>
    %cst_117 = arith.constant 0.001953125 : f32
    %337 = vector.broadcast %cst_117 : f32 to vector<1x2xf32>
    %338 = arith.mulf %336, %337 : vector<1x2xf32>
    %cst_118 = arith.constant dense<0.000000e+00> : vector<2xf32>
    %339 = vector.multi_reduction <add>, %334, %cst_118 [0] : vector<8x2xf32> to vector<2xf32>
    %340 = vector.shape_cast %339 : vector<2xf32> to vector<1x2xf32>
    %cst_119 = arith.constant 0.001953125 : f32
    %341 = vector.broadcast %cst_119 : f32 to vector<1x2xf32>
    %342 = arith.mulf %340, %341 : vector<1x2xf32>
    %343 = arith.mulf %338, %338 : vector<1x2xf32>
    %344 = arith.subf %342, %343 : vector<1x2xf32>
    %cst_120 = arith.constant 0.000000e+00 : f32
    %345 = vector.broadcast %cst_120 : f32 to vector<1x2xf32>
    %346 = arith.maximumf %344, %345 : vector<1x2xf32>
    %cst_121 = arith.constant 9.99999974E-6 : f32
    %347 = vector.broadcast %cst_121 : f32 to vector<1x2xf32>
    %348 = arith.addf %346, %347 : vector<1x2xf32>
    %349 = math.rsqrt %348 : vector<1x2xf32>
    %c0_122 = arith.constant 0 : index
    %c0_123 = arith.constant 0 : index
    %350 = vector.load %arg19[%c0_122, %c0_123] : memref<8x1xf32, #tpu.memory_space<vmem>>, vector<8x1xf32>
    %351 = vector.broadcast %350 : vector<8x1xf32> to vector<8x2xf32>
    %352 = vector.broadcast %349 : vector<1x2xf32> to vector<8x2xf32>
    %353 = arith.mulf %351, %352 : vector<8x2xf32>
    %c0_124 = arith.constant 0 : index
    %c0_125 = arith.constant 0 : index
    %354 = vector.load %arg20[%c0_124, %c0_125] : memref<8x1xf32, #tpu.memory_space<vmem>>, vector<8x1xf32>
    %355 = vector.broadcast %338 : vector<1x2xf32> to vector<8x2xf32>
    %356 = arith.mulf %355, %353 : vector<8x2xf32>
    %357 = vector.broadcast %354 : vector<8x1xf32> to vector<8x2xf32>
    %358 = arith.subf %357, %356 : vector<8x2xf32>
    %c0_126 = arith.constant 0 : index
    %c0_127 = arith.constant 0 : index
    %c0_128 = arith.constant 0 : index
    %359 = vector.load %arg2[%c0_126, %c0_127, %c0_128] : memref<1x8x2xf32, #tpu.memory_space<vmem>>, vector<1x8x2xf32>
    %360 = vector.shape_cast %359 : vector<1x8x2xf32> to vector<8x2xf32>
    %361 = arith.addf %358, %360 : vector<8x2xf32>
    %cst_129 = arith.constant dense<0.000000e+00> : vector<8x128xf32>
    %362 = tpu.matmul %353, %5, %cst_129 {dimension_numbers = #tpu.dot_dimension_numbers<[1], [0], [0], [1], [0, 0, 1, 1], [], []>} : vector<8x2xf32>, vector<2x128xf32>, vector<8x128xf32> -> vector<8x128xf32>
    %363 = arith.mulf %331, %362 : vector<8x128xf32>
    %cst_130 = arith.constant dense<0.000000e+00> : vector<8x128xf32>
    %364 = tpu.matmul %361, %5, %cst_130 {dimension_numbers = #tpu.dot_dimension_numbers<[1], [0], [0], [1], [0, 0, 1, 1], [], []>} : vector<8x2xf32>, vector<2x128xf32>, vector<8x128xf32> -> vector<8x128xf32>
    %365 = arith.addf %363, %364 : vector<8x128xf32>
    %c0_131 = arith.constant 0 : index
    %c0_132 = arith.constant 0 : index
    %c0_133 = arith.constant 0 : index
    %366 = vector.load %arg21[%c0_131, %c0_132, %c0_133] : memref<1x8x128xf32, #tpu.memory_space<vmem>>, vector<1x8x128xf32>
    %367 = vector.shape_cast %366 : vector<1x8x128xf32> to vector<8x128xf32>
    %368 = vector.shape_cast %365 : vector<8x128xf32> to vector<1x8x128xf32>
    tpu.vector_store %arg21[%c0_131, %c0_132, %c0_133], %368 {strides = array<i32>} : memref<1x8x128xf32, #tpu.memory_space<vmem>>, vector<1x8x128xf32>,
    return
  }
  func.func @transform_0(%arg0: i32) -> (i32, i32, i32) {
    %c0_i32 = arith.constant 0 : i32
    %c0_i32_0 = arith.constant 0 : i32
    %c0_i32_1 = arith.constant 0 : i32
    return %arg0, %c0_i32, %c0_i32_0 : i32, i32, i32
  }
  func.func @transform_1(%arg0: i32) -> (i32, i32, i32) {
    %c0_i32 = arith.constant 0 : i32
    %c0_i32_0 = arith.constant 0 : i32
    %c0_i32_1 = arith.constant 0 : i32
    return %arg0, %c0_i32, %c0_i32_0 : i32, i32, i32
  }
  func.func @transform_2(%arg0: i32) -> (i32, i32) {
    %c0_i32 = arith.constant 0 : i32
    %c0_i32_0 = arith.constant 0 : i32
    %c0_i32_1 = arith.constant 0 : i32
    return %c0_i32, %c0_i32_0 : i32, i32
  }
  func.func @transform_3(%arg0: i32) -> (i32, i32) {
    %c0_i32 = arith.constant 0 : i32
    %c0_i32_0 = arith.constant 0 : i32
    %c0_i32_1 = arith.constant 0 : i32
    return %c0_i32, %c0_i32_0 : i32, i32
  }
  func.func @transform_4(%arg0: i32) -> (i32, i32) {
    %c0_i32 = arith.constant 0 : i32
    %c0_i32_0 = arith.constant 0 : i32
    %c0_i32_1 = arith.constant 0 : i32
    return %c0_i32, %c0_i32_0 : i32, i32
  }
  func.func @transform_5(%arg0: i32) -> (i32, i32) {
    %c0_i32 = arith.constant 0 : i32
    %c0_i32_0 = arith.constant 0 : i32
    %c0_i32_1 = arith.constant 0 : i32
    return %c0_i32, %c0_i32_0 : i32, i32
  }
  func.func @transform_6(%arg0: i32) -> (i32, i32) {
    %c0_i32 = arith.constant 0 : i32
    %c0_i32_0 = arith.constant 0 : i32
    %c0_i32_1 = arith.constant 0 : i32
    return %c0_i32, %c0_i32_0 : i32, i32
  }
  func.func @transform_7(%arg0: i32) -> (i32, i32) {
    %c0_i32 = arith.constant 0 : i32
    %c0_i32_0 = arith.constant 0 : i32
    %c0_i32_1 = arith.constant 0 : i32
    return %c0_i32, %c0_i32_0 : i32, i32
  }
  func.func @transform_8(%arg0: i32) -> (i32, i32) {
    %c0_i32 = arith.constant 0 : i32
    %c0_i32_0 = arith.constant 0 : i32
    %c0_i32_1 = arith.constant 0 : i32
    return %c0_i32, %c0_i32_0 : i32, i32
  }
  func.func @transform_9(%arg0: i32) -> (i32, i32) {
    %c0_i32 = arith.constant 0 : i32
    %c0_i32_0 = arith.constant 0 : i32
    %c0_i32_1 = arith.constant 0 : i32
    return %c0_i32, %c0_i32_0 : i32, i32
  }
  func.func @transform_10(%arg0: i32) -> (i32, i32) {
    %c0_i32 = arith.constant 0 : i32
    %c0_i32_0 = arith.constant 0 : i32
    %c0_i32_1 = arith.constant 0 : i32
    return %c0_i32, %c0_i32_0 : i32, i32
  }
  func.func @transform_11(%arg0: i32) -> (i32, i32) {
    %c0_i32 = arith.constant 0 : i32
    %c0_i32_0 = arith.constant 0 : i32
    %c0_i32_1 = arith.constant 0 : i32
    return %c0_i32, %c0_i32_0 : i32, i32
  }
  func.func @transform_12(%arg0: i32) -> (i32, i32) {
    %c0_i32 = arith.constant 0 : i32
    %c0_i32_0 = arith.constant 0 : i32
    %c0_i32_1 = arith.constant 0 : i32
    return %c0_i32, %c0_i32_0 : i32, i32
  }
  func.func @transform_13(%arg0: i32) -> (i32, i32) {
    %c0_i32 = arith.constant 0 : i32
    %c0_i32_0 = arith.constant 0 : i32
    %c0_i32_1 = arith.constant 0 : i32
    return %c0_i32, %c0_i32_0 : i32, i32
  }
  func.func @transform_14(%arg0: i32) -> (i32, i32) {
    %c0_i32 = arith.constant 0 : i32
    %c0_i32_0 = arith.constant 0 : i32
    %c0_i32_1 = arith.constant 0 : i32
    return %c0_i32, %c0_i32_0 : i32, i32
  }
  func.func @transform_15(%arg0: i32) -> (i32, i32) {
    %c0_i32 = arith.constant 0 : i32
    %c0_i32_0 = arith.constant 0 : i32
    %c0_i32_1 = arith.constant 0 : i32
    return %c0_i32, %c0_i32_0 : i32, i32
  }
  func.func @transform_16(%arg0: i32) -> (i32, i32) {
    %c0_i32 = arith.constant 0 : i32
    %c0_i32_0 = arith.constant 0 : i32
    %c0_i32_1 = arith.constant 0 : i32
    return %c0_i32, %c0_i32_0 : i32, i32
  }
  func.func @transform_17(%arg0: i32) -> (i32, i32) {
    %c0_i32 = arith.constant 0 : i32
    %c0_i32_0 = arith.constant 0 : i32
    %c0_i32_1 = arith.constant 0 : i32
    return %c0_i32, %c0_i32_0 : i32, i32
  }
  func.func @transform_18(%arg0: i32) -> (i32, i32) {
    %c0_i32 = arith.constant 0 : i32
    %c0_i32_0 = arith.constant 0 : i32
    %c0_i32_1 = arith.constant 0 : i32
    return %c0_i32, %c0_i32_0 : i32, i32
  }
  func.func @transform_19(%arg0: i32) -> (i32, i32) {
    %c0_i32 = arith.constant 0 : i32
    %c0_i32_0 = arith.constant 0 : i32
    %c0_i32_1 = arith.constant 0 : i32
    return %c0_i32, %c0_i32_0 : i32, i32
  }
  func.func @transform_20(%arg0: i32) -> (i32, i32, i32) {
    %c0_i32 = arith.constant 0 : i32
    %c0_i32_0 = arith.constant 0 : i32
    %c0_i32_1 = arith.constant 0 : i32
    return %arg0, %c0_i32, %c0_i32_0 : i32, i32, i32
  }
}

</mosaic_0001>

<bundles_post_ra>
// kernel: tpu_custom_call.1
= control target key start
LH: loop header
LB: loop body
LE: loop exit
PB: predicated region body
PF: predicated region fallthrough
CT: control target
= control target key end

     0   :  { %s3391_s0 = inlined_call_operand.vmem [shape: f32[1,4,128], index: 0, kind: input, shape index: {}]   ;;  %s3392_s1 = inlined_call_operand.vmem [shape: f32[1,8,2], index: 1, kind: input, shape index: {}]   ;;  %s3393_s2 = inlined_call_operand.vmem [shape: f32[128,200], index: 2, kind: input, shape index: {}]   ;;  %s3394_s3 = inlined_call_operand.vmem [shape: f32[200,128], index: 3, kind: input, shape index: {}]   ;;  %s3395_s4 = inlined_call_operand.vmem [shape: f32[200,2], index: 4, kind: input, shape index: {}]   ;;  %s3396_s5 = inlined_call_operand.vmem [shape: f32[2,200], index: 5, kind: input, shape index: {}]   ;;  %s3397_s6 = inlined_call_operand.vmem [shape: f32[128,2], index: 6, kind: input, shape index: {}]   ;;  %s3398_s7 = inlined_call_operand.vmem [shape: f32[2,128], index: 7, kind: input, shape index: {}]   ;;  %s3399_s8 = inlined_call_operand.vmem [shape: f32[4,36], index: 8, kind: input, shape index: {}]   ;;  %s3400_s9 = inlined_call_operand.vmem [shape: f32[4,1], index: 9, kind: input, shape index: {}]   ;;  %s3401_s10 = inlined_call_operand.vmem [shape: f32[4,1], index: 10, kind: input, shape index: {}]   ;;  %s3402_s11 = inlined_call_operand.vmem [shape: f32[4,36], index: 11, kind: input, shape index: {}]   ;;  %s3403_s12 = inlined_call_operand.vmem [shape: f32[4,1], index: 12, kind: input, shape index: {}]   ;;  %s3404_s13 = inlined_call_operand.vmem [shape: f32[4,1], index: 13, kind: input, shape index: {}]   ;;  %s3405_s14 = inlined_call_operand.vmem [shape: f32[8,36], index: 14, kind: input, shape index: {}]   ;;  %s3406_s15 = inlined_call_operand.vmem [shape: f32[8,1], index: 15, kind: input, shape index: {}]   ;;  %s3407_s16 = inlined_call_operand.vmem [shape: f32[8,1], index: 16, kind: input, shape index: {}]   ;;  %s3408_s17 = inlined_call_operand.vmem [shape: f32[8,72], index: 17, kind: input, shape index: {}]   ;;  %s3409_s18 = inlined_call_operand.vmem [shape: f32[8,1], index: 18, kind: input, shape index: {}]   ;;  %s3410_s19 = inlined_call_operand.vmem [shape: f32[8,1], index: 19, kind: input, shape index: {}]   ;;  %s3411_s20 = inlined_call_operand.hbm [shape: f32[1,8,128], index: 20, kind: output, shape index: {}]  }
   0x1   :  { %3442 = sst [smem:[#allocation5_spill]] %s3391_s0 }
   0x2   :  { %3443 = sst [smem:[#allocation6_spill]] %s3392_s1 }
   0x3   :  { %3444 = sst [smem:[#allocation7_spill]] %s3393_s2 }
   0x4   :  { %3445 = sst [smem:[#allocation8_spill]] %s3394_s3 }
   0x5   :  { %3446 = sst [smem:[#allocation9_spill]] %s3395_s4 }
   0x6   :  { %s3447_s23 = sld [smem:[#allocation7_spill]] }
   0xc   :  { %v96_v0 = vld [vmem:[%s3447_s23 + $0xf0] sm:$0xff]  ;;  %v97_v1 = vld [vmem:[%s3447_s23 + $0xf8] sm:$0xff]  ;;  %v94_v2 = vld [vmem:[%s3447_s23 + $0xe0] sm:$0xff] }
   0xd   :  { %167 = vmatpush.msra.mxu0 %v96_v0  ;;  %187 = vmatpush.msra.mxu1 %v97_v1  ;;  %v95_v3 = vld [vmem:[%s3447_s23 + $0xe8] sm:$0xff]  ;;  %v92_v4 = vld [vmem:[%s3447_s23 + $0xd0] sm:$0xff]  ;;  %v93_v5 = vld [vmem:[%s3447_s23 + $0xd8] sm:$0xff] }
   0xe   :  { %v90_v6 = vld [vmem:[%s3447_s23 + $0xc0] sm:$0xff]  ;;  %v91_v7 = vld [vmem:[%s3447_s23 + $0xc8] sm:$0xff]  ;;  %v88_v8 = vld [vmem:[%s3447_s23 + $0xb0] sm:$0xff] }
   0xf   :  { %168 = vmatpush.msra.mxu0 %v94_v2  ;;  %188 = vmatpush.msra.mxu1 %v95_v3  ;;  %v89_v9 = vld [vmem:[%s3447_s23 + $0xb8] sm:$0xff]  ;;  %v86_v10 = vld [vmem:[%s3447_s23 + $0xa0] sm:$0xff]  ;;  %v87_v11 = vld [vmem:[%s3447_s23 + $0xa8] sm:$0xff] }
  0x10   :  { %v84_v12 = vld [vmem:[%s3447_s23 + $0x90] sm:$0xff]  ;;  %v85_v13 = vld [vmem:[%s3447_s23 + $0x98] sm:$0xff] }
  0x11   :  { %169 = vmatpush.msra.mxu0 %v92_v4  ;;  %189 = vmatpush.msra.mxu1 %v93_v5 }
  0x13   :  { %170 = vmatpush.msra.mxu0 %v90_v6  ;;  %190 = vmatpush.msra.mxu1 %v91_v7 }
  0x15   :  { %171 = vmatpush.msra.mxu0 %v88_v8  ;;  %191 = vmatpush.msra.mxu1 %v89_v9 }
  0x17   :  { %172 = vmatpush.msra.mxu0 %v86_v10  ;;  %192 = vmatpush.msra.mxu1 %v87_v11 }
  0x18   :  { %25 = vsyncpa [#allocation3], 0  ;;  %v82_v14 = vld [vmem:[%s3447_s23 + $0x80] sm:$0xff]  ;;  %v83_v15 = vld [vmem:[%s3447_s23 + $0x88] sm:$0xff]  ;;  %s3448_s29 = sld [smem:[#allocation5_spill]]  ;;  %s2286_s30 = smov 117  }
  0x19   :  { %173 = vmatpush.msra.mxu0 %v84_v12  ;;  %193 = vmatpush.msra.mxu1 %v85_v13  ;;  %v80_v16 = vld [vmem:[%s3447_s23 + $0x70] sm:$0xff]  ;;  %v81_v17 = vld [vmem:[%s3447_s23 + $0x78] sm:$0xff]  ;;  %v78_v18 = vld [vmem:[%s3447_s23 + $0x60] sm:$0xff]  ;;  %s2288_s0 = smov 118   ;;  %s2289_s21 = smov 61   ;;  %vm297_vm0 = vcmask 957440  }
  0x1a   :  { %v79_v19 = vld [vmem:[%s3447_s23 + $0x68] sm:$0xff]  ;;  %v76_v20 = vld [vmem:[%s3447_s23 + $0x50] sm:$0xff]  ;;  %v77_v21 = vld [vmem:[%s3447_s23 + $0x58] sm:$0xff]  ;;  %s3441_s1 = smov 71   ;;  %s2291_s22 = smov 62   ;;  %vm325_vm1 = vcmask 1043456  }
  0x1b   :  { %174 = vmatpush.msra.mxu0 %v82_v14  ;;  %194 = vmatpush.msra.mxu1 %v83_v15  ;;  %v74_v22 = vld [vmem:[%s3447_s23 + $0x40] sm:$0xff]  ;;  %v75_v23 = vld [vmem:[%s3447_s23 + $0x48] sm:$0xff]  ;;  %v72_v24 = vld [vmem:[%s3447_s23 + $0x30] sm:$0xff]  ;;  %s2292_s24 = smov 63   ;;  %s3415_s2 = smov 1   ;;  %vm303_vm2 = vcmask 498688  }
  0x1c   :  { %v73_v25 = vld [vmem:[%s3447_s23 + $0x38] sm:$0xff]  ;;  %v70_v26 = vld [vmem:[%s3447_s23 + $0x20] sm:$0xff]  ;;  %v71_v27 = vld [vmem:[%s3447_s23 + $0x28] sm:$0xff]  ;;  %s2294_s25 = smov 119   ;;  %s3429_s3 = smov 9   ;;  %vm266_vm3 = vcmask 580608  }
  0x1d   :  { %175 = vmatpush.msra.mxu0 %v80_v16  ;;  %195 = vmatpush.msra.mxu1 %v81_v17  ;;  %v68_v28 = vld [vmem:[%s3447_s23 + $0x10] sm:$0xff]  ;;  %v69_v29 = vld [vmem:[%s3447_s23 + $0x18] sm:$0xff]  ;;  %v66_v30 = vld [vmem:[%s3447_s23] sm:$0xff]  ;;  %s3427_s26 = smov 10   ;;  %s3425_s27 = smov 57   ;;  %vm291_vm4 = vcmask 506880  }
  0x1e   :  { %v67_v31 = vld [vmem:[%s3447_s23 + $0x8] sm:$0xff]  ;;  %v166_v32 = vld [vmem:[%s3448_s29] sm:$0xf]  ;;  %s3440_s23 = smov 127   ;;  %s3419_s28 = smov 66   ;;  %vm285_vm5 = vcmask 965632  }
  0x1f   :  { %176 = vmatpush.msra.mxu0 %v78_v18  ;;  %196 = vmatpush.msra.mxu1 %v79_v19  ;;  %s3423_s4 = smov 11   ;;  %s3421_s29 = smov 67   ;;  %vm260_vm6 = vcmask 1039360   ;;  %vm3439_vm7 = vcmask 973824   ;;  %vm279_vm8 = vcmask 515072   ;;  %vm3438_vm9 = vcmask 7168  }
  0x20   :  { %vm3435_vm10 = vcmask 72704   ;;  %vm229_vm11 = vcmask 80896   ;;  %vm3434_vm12 = vcmask 89088   ;;  %vm3433_vm13 = vcmask 293888  }
  0x21   :  { %177 = vmatpush.msra.mxu0 %v76_v20  ;;  %197 = vmatpush.msra.mxu1 %v77_v21  ;;  %vm3431_vm14 = vcmask 588800   ;;  %vm3437_vm15 = vcmask 1041408  }
  0x23   :  { %178 = vmatpush.msra.mxu0 %v74_v22  ;;  %198 = vmatpush.msra.mxu1 %v75_v23 }
  0x25   :  { %179 = vmatpush.msra.mxu0 %v72_v24  ;;  %199 = vmatpush.msra.mxu1 %v73_v25 }
  0x27   :  { %180 = vmatpush.msra.mxu0 %v70_v26  ;;  %200 = vmatpush.msra.mxu1 %v71_v27 }
  0x29   :  { %181 = vmatpush.msra.mxu0 %v68_v28  ;;  %201 = vmatpush.msra.mxu1 %v69_v29 }
  0x2b   :  { %182 = vmatpush.msra.mxu0 %v66_v30  ;;  %202 = vmatpush.msra.mxu1 %v67_v31 }
  0x2c   :  { %183 = vmatmul.f32.vlgmr.msra.gmra.mxu0 %v166_v32  ;;  %203 = vmatmul.f32.vlgmr.msra.gmra.mxu1 %v166_v32 }
  0xa9   :  { %v2508_v33 = vpop.f32.mrf.mxu0  ;;  %v2510_v34 = vpop.f32.mrf.mxu1 }
  0xaa   :  { %295 = vrot.lane.b32.xlu1 %v2510_v34, %s2286_s30  ;;  %v2070_v35 = vpack.i.bf16 %v2508_v33, %v2510_v34  ;;  %v2080_v36 = vpack.i.bf16 %v2510_v34, %v2508_v33 }
  0xac   :  { %2071 = vrot.lane.b32.xlu2 %v2070_v35, %s3440_s23  ;;  %2066 = vrot.lane.b32.xlu0 %v2070_v35, %s2288_s0 }
  0xb2   :  { %300 = vrot.lane.b32.xlu1 %v2508_v33, %s2289_s21 }
  0xb4   :  { %263 = vrot.lane.b32.xlu2 %v2508_v33, %s3441_s1  ;;  %288 = vrot.lane.b32.xlu0 %v2508_v33, %s2291_s22 }
  0xba   :  { %276 = vrot.lane.b32.xlu1 %v2508_v33, %s2292_s24 }
  0xbc   :  { %2081 = vrot.lane.b32.xlu2 %v2080_v36, %s3415_s2  ;;  %2076 = vrot.lane.b32.xlu0 %v2070_v35, %s2294_s25  ;;  %s3417_s2 = smov 65   ;;  %v207_v35 = vld [vmem:[%s3399_s8] sm:$0xf]  ;;  %s3457_s8 = smov 65  }
  0xc2   :  { %2091 = vrot.lane.b32.xlu1 %v2080_v36, %s3429_s3  ;;  %s3455_s3 = smov 67  }
  0xc4   :  { %293 = vrot.lane.b32.xlu2 %v2508_v33, %s2286_s30  ;;  %2086 = vrot.lane.b32.xlu0 %v2080_v36, %s3427_s26  ;;  %s3456_s26 = smov 66  }
  0xca   :  { %245 = vrot.lane.b32.xlu1 %v2510_v34, %s3425_s27  ;;  %s3453_s27 = smov 1  }
  0xcc   :  { %222 = vrot.lane.b32.xlu2 %v2510_v34, %s3419_s28  ;;  %2096 = vrot.lane.b32.xlu0 %v2080_v36, %s3423_s4  ;;  %s3452_s28 = smov 57   ;;  %s3454_s4 = smov 11  }
  0xd2   :  { %209 = vrot.lane.b32.xlu1 %v2510_v34, %s3421_s29  ;;  %s3449_s29 = sld [smem:[#allocation9_spill]] }
  0xd4   :  { %233 = vrot.lane.b32.xlu0 %v2510_v34, %s3417_s2  ;;  %s3451_s2 = smov 10  }
  0xd8   :  { %v2552_v52 = vld [vmem:[%s3449_s29 + $0xc0] sm:$0xff]  ;;  %v2562_v58 = vld [vmem:[%s3449_s29 + $0xb8] sm:$0xff]  ;;  %v2570_v3 = vld [vmem:[%s3449_s29 + $0xb0] sm:$0xff] }
  0xd9   :  { %461 = vmatpush.msrb.mxu0 %v2552_v52  ;;  %v2581_v9 = vld [vmem:[%s3449_s29 + $0xa8] sm:$0xff]  ;;  %v2591_v15 = vld [vmem:[%s3449_s29 + $0xa0] sm:$0xff]  ;;  %v2598_v19 = vld [vmem:[%s3449_s29 + $0x98] sm:$0xff] }
  0xda   :  { %v2605_v23 = vld [vmem:[%s3449_s29 + $0x90] sm:$0xff]  ;;  %v2611_v24 = vld [vmem:[%s3449_s29 + $0x88] sm:$0xff]  ;;  %v2618_v27 = vld [vmem:[%s3449_s29 + $0x80] sm:$0xff] }
  0xdb   :  { %462 = vmatpush.msrb.mxu0 %v2562_v58 }
  0xdd   :  { %463 = vmatpush.msrb.mxu0 %v2570_v3 }
  0xdf   :  { %464 = vmatpush.msrb.mxu0 %v2581_v9 }
  0xe1   :  { %465 = vmatpush.msrb.mxu0 %v2591_v15 }
  0xe3   :  { %466 = vmatpush.msrb.mxu0 %v2598_v19 }
  0xe5   :  { %467 = vmatpush.msrb.mxu0 %v2605_v23 }
  0xe7   :  { %468 = vmatpush.msrb.mxu0 %v2611_v24 }
  0xe9   :  { %469 = vmatpush.msrb.mxu0 %v2618_v27 }
 0x106   :  { %v2072_v37 = vpop.permute.xlu2 %2071 }
 0x107   :  { %v2074_v47 = vunpack.i.h.bf16 %v2072_v37  ;;  %v2073_v48 = vunpack.i.l.bf16 %v2072_v37 }
 0x109   :  { %v261_v56 = vsel %vm260_vm6, %v2074_v47, %v2073_v48 }
 0x10a   :  { %v316_v2 = vrot.slane %v261_v56, 4  ;;  %v2689_v56 = vld [vmem:[%s3449_s29 + $0x40] sm:$0xff] }
 0x10c   :  { %v330_v11 = vsel %vm325_vm1, %v2508_v33, %v316_v2  ;;  %v384_v2 = vld [vmem:[%s3401_s10] sm:$0xf] }
 0x10e   :  { %v264_v38 = vpop.permute.xlu2 %263 }
 0x10f   :  { %v267_v53 = vsel %vm266_vm3, %v2073_v48, %v264_v38  ;;  %v2639_v48 = vld [vmem:[%s3449_s29 + $0x78] sm:$0xff] }
 0x110   :  { %v317_v63 = vrot.slane %v267_v53, 4  ;;  %v2667_v53 = vld [vmem:[%s3449_s29 + $0x58] sm:$0xff] }
 0x112   :  { %v331_v12 = vsel %vm325_vm1, %v2510_v34, %v317_v63  ;;  %v2735_v63 = vld [vmem:[%s3449_s29 + $0x10] sm:$0xff] }
 0x116   :  { %v2543_v39 = vpop.permute.xlu2 %2081 }
 0x117   :  { %v2084_v59 = vunpack.i.h.bf16 %v2543_v39  ;;  %v2083_v60 = vunpack.i.l.bf16 %v2543_v39 }
 0x119   :  { %v253_v8 = vsel %vm3438_vm9, %v2083_v60, %v2084_v59  ;;  %v2703_v59 = vld [vmem:[%s3449_s29 + $0x30] sm:$0xff] }
 0x11a   :  { %v312_v17 = vrot.slane %v253_v8, 4 }
 0x11c   :  { %v296_v40 = vpop.permute.xlu1 %295 }
 0x11e   :  { %v294_v41 = vpop.permute.xlu2 %293  ;;  %v2067_v42 = vpop.permute.xlu0 %2066 }
 0x11f   :  { %v298_v43 = vsel %vm297_vm0, %v294_v41, %v296_v40  ;;  %v2069_v49 = vunpack.i.h.bf16 %v2067_v42  ;;  %v2068_v50 = vunpack.i.l.bf16 %v2067_v42 }
 0x120   :  { %1998 = vmatpush.msk.msra.mxu2 %vm325_vm1, %v298_v43 }
 0x121   :  { %v286_v55 = vsel %vm285_vm5, %v2069_v49, %v2068_v50  ;;  %v2646_v49 = vld [vmem:[%s3449_s29 + $0x70] sm:$0xff] }
 0x122   :  { %v321_v1 = vrot.slane %v286_v55, 4  ;;  %v2682_v55 = vld [vmem:[%s3449_s29 + $0x48] sm:$0xff] }
 0x124   :  { %v301_v44 = vpop.permute.xlu1 %300 }
 0x125   :  { %v304_v45 = vsel %vm303_vm2, %v296_v40, %v301_v44 }
 0x126   :  { %2000 = vmatpush.msk.msra.mxu3 %vm325_vm1, %v304_v45  ;;  %v289_v46 = vpop.permute.xlu0 %288  ;;  %v223_v38 = vpop.permute.xlu2 %222 }
 0x127   :  { %v292_v54 = vsel %vm291_vm4, %v2068_v50, %v289_v46  ;;  %v2653_v50 = vld [vmem:[%s3449_s29 + $0x68] sm:$0xff] }
 0x128   :  { %v322_v0 = vrot.slane %v292_v54, 4  ;;  %v2674_v54 = vld [vmem:[%s3449_s29 + $0x50] sm:$0xff] }
 0x12c   :  { %v277_v51 = vpop.permute.xlu1 %276 }
 0x12e   :  { %v2077_v57 = vpop.permute.xlu0 %2076 }
 0x12f   :  { %v2079_v61 = vunpack.i.h.bf16 %v2077_v57  ;;  %v2078_v62 = vunpack.i.l.bf16 %v2077_v57  ;;  %v2696_v57 = vld [vmem:[%s3449_s29 + $0x38] sm:$0xff] }
 0x131   :  { %v273_v4 = vsel %vm3439_vm7, %v2079_v61, %v2078_v62  ;;  %v280_v5 = vsel %vm279_vm8, %v2078_v62, %v277_v51  ;;  %v2660_v51 = vld [vmem:[%s3449_s29 + $0x60] sm:$0xff]  ;;  %v2730_v62 = vld [vmem:[%s3449_s29 + $0x18] sm:$0xff] }
 0x132   :  { %v332_v6 = vsel %vm325_vm1, %v273_v4, %v321_v1  ;;  %v333_v7 = vsel %vm325_vm1, %v280_v5, %v322_v0  ;;  %v2717_v61 = vld [vmem:[%s3449_s29 + $0x20] sm:$0xff]  ;;  %v2742_v0 = vld [vmem:[%s3449_s29 + $0x8] sm:$0xff]  ;;  %v2302_v5 = vmov 0  }
 0x133   :  { %355 = vmatpush.msra.mxu2 %v332_v6  ;;  %375 = vmatpush.msra.mxu3 %v333_v7  ;;  %v2751_v1 = vld [vmem:[%s3449_s29] sm:$0xff] }
 0x134   :  { %v2092_v10 = vpop.permute.xlu1 %2091  ;;  %v383_v4 = vld [vmem:[%s3400_s9] sm:$0xf]  ;;  %2101 = vset.pattern.permute.xlu0 %v2302_v5  ;;  %2100 = vset.pattern.permute.xlu2 %v2302_v5 }
 0x135   :  { %v2094_v13 = vunpack.i.h.bf16 %v2092_v10  ;;  %v2093_v14 = vunpack.i.l.bf16 %v2092_v10  ;;  %356 = vmatpush.msra.mxu2 %v330_v11  ;;  %376 = vmatpush.msra.mxu3 %v331_v12  ;;  %v2785_v11 = vld [vmem:[%s3396_s5] sm:$0xf]  ;;  %s3450_s5 = smov 9  }
 0x136   :  { %v2087_v16 = vpop.permute.xlu0 %2086  ;;  %514 = vperm.xlu0 %2101, %v384_v2   ;;  %507 = vperm.xlu2 %2100, %v383_v4   ;;  %519 = vst [vmem:[#allocation1] ss:$4 sm:$0xff] %v2785_v11 }
 0x137   :  { %v241_v18 = vsel %vm3435_vm10, %v2093_v14, %v2094_v13  ;;  %v2089_v21 = vunpack.i.h.bf16 %v2087_v16  ;;  %v2088_v22 = vunpack.i.l.bf16 %v2087_v16  ;;  %2137 = vset.pattern.permute.xlu1 %v2302_v5 }
 0x138   :  { %v329_v20 = vsel %vm325_vm1, %v241_v18, %v312_v17 }
 0x139   :  { %377 = vmatpush.msra.mxu3 %v329_v20  ;;  %v230_v26 = vsel %vm229_vm11, %v2088_v22, %v2089_v21  ;;  %v232_v40 = vsel %vm229_vm11, %v223_v38, %v2088_v22 }
 0x13a   :  { %v307_v31 = vrot.slane %v230_v26, 4  ;;  %v306_v46 = vrot.slane %v232_v40, 4 }
 0x13c   :  { %v246_v25 = vpop.permute.xlu1 %245 }
 0x13d   :  { %v255_v37 = vsel %vm3438_vm9, %v246_v25, %v2083_v60  ;;  %v2710_v60 = vld [vmem:[%s3449_s29 + $0x28] sm:$0xff]  ;;  %v520_v13 = vld.sshfl [vmem:[#allocation1] sm:$0xff pattern:$0x73625140] }
 0x13e   :  { %v2097_v28 = vpop.permute.xlu0 %2096  ;;  %v311_v41 = vrot.slane %v255_v37, 4  ;;  %2004 = vmatpush.msk.msrb.mxu1 %vm3437_vm15, %v520_v13 }
 0x13f   :  { %v2099_v29 = vunpack.i.h.bf16 %v2097_v28  ;;  %v2098_v30 = vunpack.i.l.bf16 %v2097_v28 }
 0x141   :  { %v218_v32 = vsel %vm3434_vm12, %v2098_v30, %v2099_v29 }
 0x142   :  { %v327_v36 = vsel %vm325_vm1, %v218_v32, %v307_v31 }
 0x143   :  { %378 = vmatpush.msra.mxu3 %v327_v36 }
 0x144   :  { %v210_v39 = vpop.permute.xlu1 %209  ;;  %2001 = vmatmul.msk.f32.vlgmr.msra.gmra.mxu3 %vm3433_vm13, %v207_v35 }
 0x145   :  { %416 = vmatpush.msrb.mxu3 %v2552_v52  ;;  %v221_v43 = vsel %vm3434_vm12, %v210_v39, %v2098_v30  ;;  %v521_v39 = vld.sshfl [vmem:[#allocation1 + $0x8] sm:$0xff pattern:$0x73625140] }
 0x146   :  { %v234_v42 = vpop.permute.xlu0 %233  ;;  %v326_v47 = vsel %vm325_vm1, %v221_v43, %v306_v46  ;;  %2006 = vmatpush.msk.msra.mxu1 %vm3437_vm15, %v521_v39  ;;  %573 = vst [vmem:[#allocation1] ss:$4 sm:$0xff] %v2785_v11 }
 0x147   :  { %v244_v44 = vsel %vm3435_vm10, %v234_v42, %v2093_v14  ;;  %417 = vmatpush.msrb.mxu3 %v2562_v58  ;;  %vm3436_vm10 = vcmask 15360  }
 0x148   :  { %v328_v45 = vsel %vm325_vm1, %v244_v44, %v311_v41 }
 0x149   :  { %357 = vmatpush.msra.mxu2 %v328_v45  ;;  %418 = vmatpush.msrb.mxu3 %v2570_v3 }
 0x14b   :  { %358 = vmatpush.msra.mxu2 %v326_v47  ;;  %419 = vmatpush.msrb.mxu3 %v2581_v9 }
 0x14c   :  { %1999 = vmatmul.msk.f32.vlgmr.msra.gmra.mxu2 %vm3433_vm13, %v207_v35 }
 0x14d   :  { %420 = vmatpush.msrb.mxu3 %v2591_v15  ;;  %389 = vmatpush.msrb.mxu2 %v2639_v48  ;;  %v574_v47 = vld.sshfl [vmem:[#allocation1] sm:$0xff pattern:$0x73625140]  ;;  %v575_v2 = vld.sshfl [vmem:[#allocation1 + $0x8] sm:$0xff pattern:$0x73625140] }
 0x14e   :  { %1000 = vst [vmem:[#allocation1] ss:$4 sm:$0xff] %v2785_v11 }
 0x14f   :  { %421 = vmatpush.msrb.mxu3 %v2598_v19  ;;  %390 = vmatpush.msrb.mxu2 %v2646_v49 }
 0x151   :  { %422 = vmatpush.msrb.mxu3 %v2605_v23  ;;  %391 = vmatpush.msrb.mxu2 %v2653_v50 }
 0x153   :  { %423 = vmatpush.msrb.mxu3 %v2611_v24  ;;  %392 = vmatpush.msrb.mxu2 %v2660_v51 }
 0x155   :  { %424 = vmatpush.msrb.mxu3 %v2618_v27  ;;  %393 = vmatpush.msrb.mxu2 %v2667_v53 }
 0x157   :  { %434 = vmatpush.msra.mxu3 %v2639_v48  ;;  %394 = vmatpush.msrb.mxu2 %v2674_v54 }
 0x159   :  { %435 = vmatpush.msra.mxu3 %v2646_v49  ;;  %395 = vmatpush.msrb.mxu2 %v2682_v55 }
 0x15b   :  { %436 = vmatpush.msra.mxu3 %v2653_v50  ;;  %396 = vmatpush.msrb.mxu2 %v2689_v56 }
 0x15d   :  { %437 = vmatpush.msra.mxu3 %v2660_v51  ;;  %397 = vmatpush.msrb.mxu2 %v2696_v57 }
 0x15f   :  { %438 = vmatpush.msra.mxu3 %v2667_v53  ;;  %398 = vmatpush.msrb.mxu2 %v2703_v59 }
 0x161   :  { %439 = vmatpush.msra.mxu3 %v2674_v54  ;;  %399 = vmatpush.msrb.mxu2 %v2710_v60 }
 0x163   :  { %440 = vmatpush.msra.mxu3 %v2682_v55  ;;  %400 = vmatpush.msrb.mxu2 %v2717_v61 }
 0x165   :  { %441 = vmatpush.msra.mxu3 %v2689_v56  ;;  %401 = vmatpush.msrb.mxu2 %v2730_v62 }
 0x167   :  { %442 = vmatpush.msra.mxu3 %v2696_v57  ;;  %402 = vmatpush.msrb.mxu2 %v2735_v63 }
 0x169   :  { %443 = vmatpush.msra.mxu3 %v2703_v59  ;;  %403 = vmatpush.msrb.mxu2 %v2742_v0 }
 0x16b   :  { %444 = vmatpush.msra.mxu3 %v2710_v60  ;;  %404 = vmatpush.msrb.mxu2 %v2751_v1 }
 0x16d   :  { %445 = vmatpush.msra.mxu3 %v2717_v61 }
 0x16f   :  { %446 = vmatpush.msra.mxu3 %v2730_v62 }
 0x171   :  { %447 = vmatpush.msra.mxu3 %v2735_v63 }
 0x173   :  { %448 = vmatpush.msra.mxu3 %v2742_v0 }
 0x175   :  { %449 = vmatpush.msra.mxu3 %v2751_v1 }
 0x190   :  { %v508_v13 = vpop.permute.xlu2 %507 }
 0x1c7   :  { %v2761_v6 = vpop.f32.mrf.mxu3 }
 0x1c8   :  { %v430_v7 = vmul.f32 %v2761_v6, %v2761_v6  ;;  %2002 = vmatmul.msk.f32.vlgmr.msrb.gmra.mxu3 %vm3431_vm14, %v2761_v6 }
 0x1c9   :  { %944 = vmatpush.msrb.mxu3 %v2552_v52 }
 0x1ca   :  { %2003 = vmatmul.msk.f32.vlgmr.msrb.gmra.mxu0 %vm3431_vm14, %v430_v7  ;;  %vm3432_vm14 = vcmask 11264  }
 0x1cb   :  { %945 = vmatpush.msrb.mxu3 %v2562_v58 }
 0x1cd   :  { %946 = vmatpush.msrb.mxu3 %v2570_v3 }
 0x1cf   :  { %v2771_v8 = vpop.f32.mrf.mxu2  ;;  %947 = vmatpush.msrb.mxu3 %v2581_v9 }
 0x1d0   :  { %v429_v10 = vmul.f32 %v2771_v8, %v2771_v8  ;;  %405 = vmatmul.f32.vlgmr.msrb.gmra.mxu2 %v2771_v8 }
 0x1d1   :  { %948 = vmatpush.msrb.mxu3 %v2591_v15 }
 0x1d2   :  { %450 = vmatmul.f32.vlgmr.msra.gmra.mxu3 %v429_v10 }
 0x1d3   :  { %949 = vmatpush.msrb.mxu3 %v2598_v19 }
 0x1d5   :  { %950 = vmatpush.msrb.mxu3 %v2605_v23 }
 0x1d7   :  { %951 = vmatpush.msrb.mxu3 %v2611_v24 }
 0x1d9   :  { %952 = vmatpush.msrb.mxu3 %v2618_v27 }
 0x247   :  { %v471_v17 = vpop.f32.mrf.mxu0 }
 0x24b   :  { %v426_v12 = vpop.f32.mrf.mxu3 }
 0x253   :  { %v406_v14 = vpop.f32.mrf.mxu2 }
 0x254   :  { %v427_v16 = vadd.f32 %v426_v12, %v406_v14 }
 0x255   :  { %v451_v18 = vpop.f32.mrf.mxu3 }
 0x256   :  { %v475_v20 = vsel %vm3432_vm14, %v427_v16, 0.0  ;;  %v472_v21 = vadd.f32 %v471_v17, %v451_v18 }
 0x257   :  { %v476_v22 = vrot.slane %v475_v20, 4 }
 0x258   :  { %v483_v25 = vsel %vm3432_vm14, %v472_v21, 0.0 }
 0x259   :  { %v477_v26 = vadd.f32 %v476_v22, %v475_v20  ;;  %v484_v28 = vrot.slane %v483_v25, 4  ;;  %v515_v20 = vpop.permute.xlu0 %514 }
 0x25b   :  { %v478_v29 = vrot.slane %v477_v26, 2  ;;  %v485_v30 = vadd.f32 %v484_v28, %v483_v25 }
 0x25d   :  { %v479_v31 = vadd.f32 %v478_v29, %v477_v26  ;;  %v486_v32 = vrot.slane %v485_v30, 2 }
 0x25f   :  { %v480_v35 = vrot.slane %v479_v31, 1  ;;  %v487_v36 = vadd.f32 %v486_v32, %v485_v30 }
 0x261   :  { %v481_v37 = vadd.f32 %v480_v35, %v479_v31  ;;  %v488_v38 = vrot.slane %v487_v36, 1 }
 0x263   :  { %v482_v40 = vmul.f32 0.00390625, %v481_v37  ;;  %v489_v41 = vadd.f32 %v488_v38, %v487_v36 }
 0x265   :  { %v491_v42 = vmul.f32 %v482_v40, %v482_v40  ;;  %v490_v43 = vmul.f32 0.00390625, %v489_v41 }
 0x267   :  { %v492_v44 = vsub.f32 %v490_v43, %v491_v42 }
 0x269   :  { %v493_v45 = vmax.f32 %v492_v44, 0.0 }
 0x26b   :  { %v494_v46 = vadd.f32 1e-05, %v493_v45 }
 0x26d   :  { %2203 = vrsqrt.f32 %v494_v46  ;;  %vm501_vm13 = vweird.f32 %v494_v46 }
 0x273   :  { %v2204_v4 = vpop.eup %2203 }
 0x274   :  { %v496_v5 = vmul.f32 %v2204_v4, %v494_v46  ;;  %vm502_vm14 = vweird.f32 %v2204_v4 }
 0x275   :  { %vm503_vm12 = vmor %vm501_vm13, %vm502_vm14 }
 0x276   :  { %v497_v7 = vmul.f32 %v2204_v4, %v496_v5 }
 0x278   :  { %v498_v10 = vmul.f32 0.5, %v497_v7 }
 0x27a   :  { %v499_v12 = vsub.f32 1.5, %v498_v10 }
 0x27c   :  { %v500_v14 = vmul.f32 %v2204_v4, %v499_v12 }
 0x27e   :  { %v504_v16 = vsel %vm503_vm12, %v2204_v4, %v500_v14 }
 0x27f   :  { %v510_v17 = vmul.f32 %v508_v13, %v504_v16 }
 0x281   :  { %2005 = vmatmul.msk.f32.vlgmr.msrb.gmra.mxu1 %vm3436_vm10, %v510_v17  ;;  %v511_v18 = vmul.f32 %v510_v17, %v482_v40 }
 0x282   :  { %2008 = vmatpush.msk.msrb.mxu1 %vm3437_vm15, %v574_v47 }
 0x283   :  { %v517_v21 = vsub.f32 %v515_v20, %v511_v18 }
 0x289   :  { %2007 = vmatmul.msk.f32.vlgmr.msra.gmra.mxu1 %vm3436_vm10, %v510_v17 }
 0x28a   :  { %2010 = vmatpush.msk.msra.mxu1 %vm3437_vm15, %v575_v2 }
 0x291   :  { %2009 = vmatmul.msk.f32.vlgmr.msrb.gmra.mxu1 %vm3436_vm10, %v517_v21 }
 0x292   :  { %872 = vmatpush.msrb.mxu1 %v2639_v48 }
 0x294   :  { %873 = vmatpush.msrb.mxu1 %v2646_v49 }
 0x296   :  { %874 = vmatpush.msrb.mxu1 %v2653_v50 }
 0x298   :  { %875 = vmatpush.msrb.mxu1 %v2660_v51 }
 0x299   :  { %2011 = vmatmul.msk.f32.vlgmr.msra.gmra.mxu1 %vm3436_vm10, %v517_v21 }
 0x29a   :  { %876 = vmatpush.msrb.mxu1 %v2667_v53 }
 0x29c   :  { %877 = vmatpush.msrb.mxu1 %v2674_v54 }
 0x29e   :  { %878 = vmatpush.msrb.mxu1 %v2682_v55 }
 0x2a0   :  { %879 = vmatpush.msrb.mxu1 %v2689_v56 }
 0x2a2   :  { %880 = vmatpush.msrb.mxu1 %v2696_v57 }
 0x2a4   :  { %881 = vmatpush.msrb.mxu1 %v2703_v59 }
 0x2a6   :  { %882 = vmatpush.msrb.mxu1 %v2710_v60 }
 0x2a8   :  { %883 = vmatpush.msrb.mxu1 %v2717_v61 }
 0x2aa   :  { %884 = vmatpush.msrb.mxu1 %v2730_v62 }
 0x2ac   :  { %885 = vmatpush.msrb.mxu1 %v2735_v63 }
 0x2ae   :  { %886 = vmatpush.msrb.mxu1 %v2742_v0 }
 0x2b0   :  { %887 = vmatpush.msrb.mxu1 %v2751_v1 }
 0x2fe   :  { %v548_v22 = vpop.f32.mrf.mxu1 }
 0x2ff   :  { %v571_v26 = vmul.f32 %v548_v22, %v2771_v8 }
 0x306   :  { %v568_v25 = vpop.f32.mrf.mxu1 }
 0x307   :  { %v572_v32 = vmul.f32 %v568_v25, %v2761_v6 }
 0x30e   :  { %v600_v28 = vpop.f32.mrf.mxu1 }
 0x30f   :  { %v2817_v29 = vadd.f32 %v600_v28, %v571_v26 }
 0x311   :  { %v2820_v30 = vmul.f32 0.70710677, %v2817_v29 }
 0x313   :  { %v629_v31 = vand.u32 2147483647, %v2820_v30 }
 0x315   :  { %v631_v35 = vmul.f32 0.3275911, %v629_v31  ;;  %v683_v10 = vsub.f32 0.0, %v629_v31 }
 0x316   :  { %v620_v36 = vpop.f32.mrf.mxu1 }
 0x317   :  { %v633_v37 = vadd.f32 1.0, %v631_v35  ;;  %v2824_v38 = vadd.f32 %v620_v36, %v572_v32  ;;  %v685_v18 = vmul.f32 %v683_v10, %v629_v31 }
 0x319   :  { %2205 = vrcp.f32 %v633_v37  ;;  %v2827_v39 = vmul.f32 0.70710677, %v2824_v38  ;;  %v646_v45 = vand.u32 2147483648, %v633_v37  ;;  %v644_v6 = vand.u32 2147483647, %v633_v37 }
 0x31a   :  { %vm640_vm13 = vweird.f32 %v633_v37  ;;  %v687_v32 = vmul.f32 1.442695, %v685_v18 }
 0x31b   :  { %v630_v8 = vand.u32 2147483647, %v2827_v39  ;;  %v647_v2 = vor.u32 1.1754944e-38, %v646_v45  ;;  %vm645_vm10 = vcmp.eq.f32.partialorder %v644_v6, 8.507059e+37 }
 0x31d   :  { %v632_v40 = vmul.f32 0.3275911, %v630_v8 }
 0x31f   :  { %v2206_v41 = vpop.eup %2205  ;;  %v634_v43 = vadd.f32 1.0, %v632_v40  ;;  %v684_v40 = vsub.f32 0.0, %v630_v8 }
 0x320   :  { %v636_v42 = vmul.f32 %v2206_v41, %v633_v37  ;;  %vm641_vm12 = vweird.f32 %v2206_v41 }
 0x321   :  { %2207 = vrcp.f32 %v634_v43  ;;  %vm642_vm14 = vmor %vm640_vm13, %vm641_vm12  ;;  %v661_v17 = vand.u32 2147483648, %v634_v43  ;;  %v659_v21 = vand.u32 2147483647, %v634_v43  ;;  %vm655_vm9 = vweird.f32 %v634_v43 }
 0x322   :  { %v637_v44 = vsub.f32 1.0, %v636_v42  ;;  %2209 = vpow2.f32 %v687_v32  ;;  %v686_v45 = vmul.f32 %v684_v40, %v630_v8 }
 0x323   :  { %v662_v28 = vor.u32 1.1754944e-38, %v661_v17  ;;  %vm660_vm13 = vcmp.eq.f32.partialorder %v659_v21, 8.507059e+37 }
 0x324   :  { %v638_v46 = vmul.f32 %v2206_v41, %v637_v44 }
 0x326   :  { %v639_v47 = vadd.f32 %v2206_v41, %v638_v46 }
 0x327   :  { %v2208_v4 = vpop.eup %2207 }
 0x328   :  { %v643_v5 = vsel %vm642_vm14, %v2206_v41, %v639_v47  ;;  %v651_v12 = vmul.f32 %v2208_v4, %v634_v43  ;;  %vm656_vm15 = vweird.f32 %v2208_v4  ;;  %v689_v43 = vmul.f32 1.442695, %v686_v45 }
 0x329   :  { %v648_v7 = vsel %vm645_vm10, %v647_v2, %v643_v5  ;;  %vm657_vm12 = vmor %vm655_vm9, %vm656_vm15  ;;  %v2210_v5 = vpop.eup %2209  ;;  %vm695_vm9 = vcmp.ge.f32.partialorder %v2820_v30, 0.0  ;;  %vm696_vm10 = vcmp.ge.f32.partialorder %v2827_v39, 0.0  ;;  %vm3458_vm15 = vcmask 7168  }
 0x32a   :  { %v665_v13 = vmul.f32 1.0614054, %v648_v7  ;;  %v652_v14 = vsub.f32 1.0, %v651_v12  ;;  %2211 = vpow2.f32 %v689_v43  ;;  %vm3459_vm14 = vmmov %vm3458_vm15 }
 0x32c   :  { %v667_v16 = vadd.f32 -1.4531521, %v665_v13  ;;  %v653_v20 = vmul.f32 %v2208_v4, %v652_v14 }
 0x32e   :  { %v669_v22 = vmul.f32 %v667_v16, %v648_v7  ;;  %v654_v25 = vadd.f32 %v2208_v4, %v653_v20  ;;  %v625_v20 = vmul.f32 0.5, %v2817_v29 }
 0x330   :  { %v671_v26 = vadd.f32 1.4214138, %v669_v22  ;;  %v658_v35 = vsel %vm657_vm12, %v2208_v4, %v654_v25  ;;  %v2212_v22 = vpop.eup %2211  ;;  %vm3460_vm12 = vcmask 72704  }
 0x331   :  { %v663_v37 = vsel %vm660_vm13, %v662_v28, %v658_v35  ;;  %v626_v28 = vmul.f32 0.5, %v2824_v38  ;;  %v868_v38 = vld [vmem:[%s3404_s13] sm:$0xf]  ;;  %vm3461_vm13 = vmmov %vm3460_vm12 }
 0x332   :  { %v673_v36 = vmul.f32 %v671_v26, %v648_v7  ;;  %v666_v41 = vmul.f32 1.0614054, %v663_v37 }
 0x334   :  { %v675_v42 = vadd.f32 -0.28449672, %v673_v36  ;;  %v668_v44 = vadd.f32 -1.4531521, %v666_v41 }
 0x336   :  { %v677_v31 = vmul.f32 %v675_v42, %v648_v7  ;;  %v670_v46 = vmul.f32 %v668_v44, %v663_v37 }
 0x338   :  { %v679_v6 = vadd.f32 0.2548296, %v677_v31  ;;  %v672_v47 = vadd.f32 1.4214138, %v670_v46 }
 0x33a   :  { %v681_v2 = vmul.f32 %v679_v6, %v648_v7  ;;  %v674_v10 = vmul.f32 %v672_v47, %v663_v37 }
 0x33c   :  { %v691_v12 = vmul.f32 %v2210_v5, %v681_v2  ;;  %v676_v13 = vadd.f32 -0.28449672, %v674_v10 }
 0x33e   :  { %v693_v4 = vsub.f32 1.0, %v691_v12  ;;  %v678_v14 = vmul.f32 %v676_v13, %v663_v37 }
 0x340   :  { %v697_v16 = vsub.f32 0.0, %v693_v4  ;;  %v680_v17 = vadd.f32 0.2548296, %v678_v14 }
 0x342   :  { %v699_v18 = vsel %vm695_vm9, %v693_v4, %v697_v16  ;;  %v682_v21 = vmul.f32 %v680_v17, %v663_v37  ;;  %vm3462_vm9 = vcmask 89088  }
 0x343   :  { %v701_v8 = vadd.f32 1.0, %v699_v18 }
 0x344   :  { %v692_v7 = vmul.f32 %v2212_v22, %v682_v21 }
 0x345   :  { %v2832_v25 = vmul.f32 %v701_v8, %v625_v20 }
 0x346   :  { %v694_v26 = vsub.f32 1.0, %v692_v7 }
 0x347   :  { %767 = vrot.lane.b32.xlu0 %v2832_v25, %s2292_s24  ;;  %756 = vrot.lane.b32.xlu1 %v2832_v25, %s3441_s1 }
 0x348   :  { %777 = vrot.lane.b32.xlu2 %v2832_v25, %s2291_s22  ;;  %v698_v30 = vsub.f32 0.0, %v694_v26 }
 0x34a   :  { %v700_v29 = vsel %vm696_vm10, %v694_v26, %v698_v30  ;;  %vm3463_vm10 = vcmask 293888  }
 0x34b   :  { %v702_v32 = vadd.f32 1.0, %v700_v29 }
 0x34d   :  { %v704_v35 = vmul.f32 %v702_v32, %v626_v28 }
 0x34f   :  { %781 = vrot.lane.b32.xlu1 %v2832_v25, %s2286_s30  ;;  %v2107_v36 = vpack.i.bf16 %v2832_v25, %v704_v35  ;;  %v2127_v39 = vpack.i.bf16 %v704_v35, %v2832_v25 }
 0x350   :  { %787 = vrot.lane.b32.xlu2 %v2832_v25, %s2289_s21 }
 0x351   :  { %2108 = vrot.lane.b32.xlu0 %v2107_v36, %s3440_s23 }
 0x357   :  { %2103 = vrot.lane.b32.xlu1 %v2107_v36, %s2288_s0 }
 0x358   :  { %2113 = vrot.lane.b32.xlu2 %v2107_v36, %s2294_s25 }
 0x359   :  { %2128 = vrot.lane.b32.xlu0 %v2127_v39, %s3450_s5 }
 0x35f   :  { %783 = vrot.lane.b32.xlu1 %v704_v35, %s2286_s30 }
 0x360   :  { %2123 = vrot.lane.b32.xlu2 %v2127_v39, %s3451_s2 }
 0x361   :  { %740 = vrot.lane.b32.xlu0 %v704_v35, %s3452_s28 }
 0x367   :  { %2118 = vrot.lane.b32.xlu1 %v2127_v39, %s3453_s27 }
 0x368   :  { %2133 = vrot.lane.b32.xlu2 %v2127_v39, %s3454_s4 }
 0x369   :  { %707 = vrot.lane.b32.xlu0 %v704_v35, %s3455_s3 }
 0x36f   :  { %719 = vrot.lane.b32.xlu1 %v704_v35, %s3456_s26 }
 0x370   :  { %729 = vrot.lane.b32.xlu2 %v704_v35, %s3457_s8 }
 0x378   :  { %996 = vperm.xlu2 %2100, %v868_v38  }
 0x3a2   :  { %v778_v37 = vpop.permute.xlu2 %777 }
 0x3aa   :  { %v788_v40 = vpop.permute.xlu2 %787 }
 0x3b2   :  { %v2114_v44 = vpop.permute.xlu2 %2113 }
 0x3b3   :  { %v2116_v4 = vunpack.i.h.bf16 %v2114_v44  ;;  %v2115_v14 = vunpack.i.l.bf16 %v2114_v44 }
 0x3b5   :  { %v764_v28 = vsel %vm3439_vm7, %v2116_v4, %v2115_v14 }
 0x3b9   :  { %v757_v41 = vpop.permute.xlu1 %756  ;;  %v768_v42 = vpop.permute.xlu0 %767 }
 0x3ba   :  { %v2863_v46 = vpop.permute.xlu2 %2123  ;;  %v770_v30 = vsel %vm279_vm8, %v2115_v14, %v768_v42 }
 0x3c1   :  { %v782_v31 = vpop.permute.xlu1 %781 }
 0x3c2   :  { %v2134_v29 = vpop.permute.xlu2 %2133 }
 0x3c3   :  { %v2109_v45 = vpop.permute.xlu0 %2108  ;;  %v2136_v42 = vunpack.i.h.bf16 %v2134_v29  ;;  %v2135_v44 = vunpack.i.l.bf16 %v2134_v29  ;;  %v867_v29 = vld [vmem:[%s3403_s12] sm:$0xf] }
 0x3c4   :  { %v2111_v43 = vunpack.i.h.bf16 %v2109_v45  ;;  %v2110_v5 = vunpack.i.l.bf16 %v2109_v45  ;;  %989 = vperm.xlu1 %2137, %v867_v29  }
 0x3c5   :  { %v715_v14 = vsel %vm3462_vm9, %v2135_v44, %v2136_v42 }
 0x3c6   :  { %v754_v16 = vsel %vm260_vm6, %v2111_v43, %v2110_v5  ;;  %v759_v17 = vsel %vm266_vm3, %v2110_v5, %v757_v41  ;;  %v2125_v41 = vunpack.i.l.bf16 %v2863_v46 }
 0x3c7   :  { %v802_v7 = vrot.slane %v754_v16, 4  ;;  %v803_v26 = vrot.slane %v759_v17, 4 }
 0x3c9   :  { %v2104_v6 = vpop.permute.xlu1 %2103  ;;  %v815_v39 = vsel %vm325_vm1, %v2832_v25, %v802_v7  ;;  %v816_v38 = vsel %vm325_vm1, %v704_v35, %v803_v26 }
 0x3ca   :  { %v2106_v47 = vunpack.i.h.bf16 %v2104_v6  ;;  %v2105_v2 = vunpack.i.l.bf16 %v2104_v6  ;;  %v730_v5 = vpop.permute.xlu2 %729 }
 0x3cb   :  { %v2129_v13 = vpop.permute.xlu0 %2128 }
 0x3cc   :  { %v775_v10 = vsel %vm285_vm5, %v2106_v47, %v2105_v2  ;;  %v780_v12 = vsel %vm291_vm4, %v2105_v2, %v778_v37  ;;  %v2131_v45 = vunpack.i.h.bf16 %v2129_v13  ;;  %v2130_v6 = vunpack.i.l.bf16 %v2129_v13 }
 0x3cd   :  { %v807_v18 = vrot.slane %v775_v10, 4  ;;  %v808_v20 = vrot.slane %v780_v12, 4 }
 0x3ce   :  { %v739_v4 = vsel %vm3460_vm12, %v730_v5, %v2130_v6  ;;  %vm3466_vm12 = vcmask 588800  }
 0x3cf   :  { %v817_v32 = vsel %vm325_vm1, %v764_v28, %v807_v18  ;;  %v818_v36 = vsel %vm325_vm1, %v770_v30, %v808_v20  ;;  %v705_v18 = vld [vmem:[%s3402_s11] sm:$0xf] }
 0x3d1   :  { %v784_v8 = vpop.permute.xlu1 %783 }
 0x3d2   :  { %v785_v21 = vsel %vm297_vm0, %v782_v31, %v784_v8  ;;  %v790_v22 = vsel %vm303_vm2, %v784_v8, %v788_v40  ;;  %v2126_v40 = vunpack.i.h.bf16 %v2863_v46  ;;  %v736_v46 = vsel %vm3461_vm13, %v2130_v6, %v2131_v45  ;;  %vm3467_vm13 = vmmov %vm3466_vm12  ;;  %v997_v29 = vpop.permute.xlu2 %996 }
 0x3d3   :  { %2012 = vmatpush.msk.msra.mxu0 %vm325_vm1, %v785_v21  ;;  %2014 = vmatpush.msk.msra.mxu2 %vm325_vm1, %v790_v22  ;;  %v741_v37 = vpop.permute.xlu0 %740 }
 0x3d4   :  { %v726_v43 = vsel %vm229_vm11, %v2125_v41, %v2126_v40 }
 0x3d5   :  { %839 = vmatpush.msra.mxu0 %v817_v32  ;;  %859 = vmatpush.msra.mxu2 %v818_v36  ;;  %v793_v17 = vrot.slane %v726_v43, 4 }
 0x3d7   :  { %840 = vmatpush.msra.mxu0 %v815_v39  ;;  %860 = vmatpush.msra.mxu2 %v816_v38  ;;  %v812_v21 = vsel %vm325_vm1, %v715_v14, %v793_v17  ;;  %v1001_v38 = vld.sshfl [vmem:[#allocation1] sm:$0xff pattern:$0x73625140] }
 0x3d9   :  { %v2119_v31 = vpop.permute.xlu1 %2118 }
 0x3da   :  { %v2121_v47 = vunpack.i.h.bf16 %v2119_v31  ;;  %v2120_v2 = vunpack.i.l.bf16 %v2119_v31 }
 0x3db   :  { %v708_v20 = vpop.permute.xlu0 %707 }
 0x3dc   :  { %v747_v25 = vsel %vm3458_vm15, %v2120_v2, %v2121_v47  ;;  %v749_v35 = vsel %vm3459_vm14, %v741_v37, %v2120_v2  ;;  %vm3464_vm15 = vmmov %vm3462_vm9  ;;  %v1002_v37 = vld.sshfl [vmem:[#allocation1 + $0x8] sm:$0xff pattern:$0x73625140]  ;;  %vm3468_vm9 = vcmask 1041408  }
 0x3dd   :  { %v797_v10 = vrot.slane %v749_v35, 4  ;;  %v798_v12 = vrot.slane %v747_v25, 4  ;;  %v718_v26 = vsel %vm3464_vm15, %v708_v20, %v2135_v44  ;;  %vm3465_vm14 = vmmov %vm3463_vm10  ;;  %1052 = vst [vmem:[#allocation1] ss:$4 sm:$0xff] %v2785_v11 }
 0x3de   :  { %vm3470_vm15 = vmmov %vm3468_vm9 }
 0x3df   :  { %v813_v16 = vsel %vm325_vm1, %v739_v4, %v797_v10  ;;  %v814_v13 = vsel %vm325_vm1, %v736_v46, %v798_v12 }
 0x3e0   :  { %841 = vmatpush.msra.mxu0 %v813_v16  ;;  %861 = vmatpush.msra.mxu2 %v814_v13 }
 0x3e1   :  { %v720_v8 = vpop.permute.xlu1 %719 }
 0x3e2   :  { %v728_v22 = vsel %vm229_vm11, %v720_v8, %v2125_v41  ;;  %862 = vmatpush.msra.mxu2 %v812_v21 }
 0x3e3   :  { %v792_v7 = vrot.slane %v728_v22, 4  ;;  %2015 = vmatmul.msk.f32.vlgmr.msra.gmra.mxu2 %vm3463_vm10, %v705_v18  ;;  %vm3469_vm10 = vmmov %vm3468_vm9 }
 0x3e4   :  { %917 = vmatpush.msrb.mxu2 %v2639_v48  ;;  %v1054_v42 = vld.sshfl [vmem:[#allocation1 + $0x8] sm:$0xff pattern:$0x73625140] }
 0x3e5   :  { %v811_v30 = vsel %vm325_vm1, %v718_v26, %v792_v7  ;;  %2024 = vmatpush.msk.msra.mxu3 %vm3470_vm15, %v1054_v42  ;;  %vm3473_vm15 = vcmask 15360  }
 0x3e6   :  { %842 = vmatpush.msra.mxu0 %v811_v30  ;;  %918 = vmatpush.msrb.mxu2 %v2646_v49 }
 0x3e7   :  { %2013 = vmatmul.msk.f32.vlgmr.msra.gmra.mxu0 %vm3465_vm14, %v705_v18  ;;  %vm3471_vm14 = vcmask 11264   ;;  %v1053_v18 = vld.sshfl [vmem:[#allocation1] sm:$0xff pattern:$0x73625140] }
 0x3e8   :  { %919 = vmatpush.msrb.mxu2 %v2653_v50  ;;  %899 = vmatpush.msrb.mxu0 %v2552_v52  ;;  %1481 = vst [vmem:[#allocation1] ss:$4 sm:$0xff] %v2785_v11 }
 0x3ea   :  { %920 = vmatpush.msrb.mxu2 %v2660_v51  ;;  %900 = vmatpush.msrb.mxu0 %v2562_v58 }
 0x3ec   :  { %921 = vmatpush.msrb.mxu2 %v2667_v53  ;;  %901 = vmatpush.msrb.mxu0 %v2570_v3 }
 0x3ee   :  { %922 = vmatpush.msrb.mxu2 %v2674_v54  ;;  %902 = vmatpush.msrb.mxu0 %v2581_v9 }
 0x3f0   :  { %923 = vmatpush.msrb.mxu2 %v2682_v55  ;;  %903 = vmatpush.msrb.mxu0 %v2591_v15 }
 0x3f2   :  { %924 = vmatpush.msrb.mxu2 %v2689_v56  ;;  %904 = vmatpush.msrb.mxu0 %v2598_v19 }
 0x3f4   :  { %925 = vmatpush.msrb.mxu2 %v2696_v57  ;;  %905 = vmatpush.msrb.mxu0 %v2605_v23 }
 0x3f6   :  { %926 = vmatpush.msrb.mxu2 %v2703_v59  ;;  %906 = vmatpush.msrb.mxu0 %v2611_v24 }
 0x3f8   :  { %927 = vmatpush.msrb.mxu2 %v2710_v60  ;;  %907 = vmatpush.msrb.mxu0 %v2618_v27 }
 0x3fa   :  { %928 = vmatpush.msrb.mxu2 %v2717_v61  ;;  %2018 = vmatpush.msk.msra.mxu0 %vm3468_vm9, %v1001_v38 }
 0x3fc   :  { %929 = vmatpush.msrb.mxu2 %v2730_v62 }
 0x3fe   :  { %930 = vmatpush.msrb.mxu2 %v2735_v63 }
 0x400   :  { %931 = vmatpush.msrb.mxu2 %v2742_v0 }
 0x402   :  { %932 = vmatpush.msrb.mxu2 %v2751_v1 }
 0x436   :  { %v990_v22 = vpop.permute.xlu1 %989 }
 0x464   :  { %v2927_v28 = vpop.f32.mrf.mxu0 }
 0x465   :  { %v912_v32 = vmul.f32 %v2927_v28, %v2927_v28  ;;  %888 = vmatmul.f32.vlgmr.msrb.gmra.mxu1 %v2927_v28 }
 0x466   :  { %v2932_v36 = vpop.f32.mrf.mxu2 }
 0x467   :  { %v913_v39 = vmul.f32 %v2932_v36, %v2932_v36  ;;  %2016 = vmatmul.msk.f32.vlgmr.msrb.gmra.mxu0 %vm3466_vm12, %v2932_v36  ;;  %933 = vmatmul.f32.vlgmr.msrb.gmra.mxu2 %v912_v32  ;;  %vm3472_vm12 = vmmov %vm3471_vm14 }
 0x468   :  { %2020 = vmatpush.msk.msrb.mxu0 %vm3469_vm10, %v1002_v37 }
 0x469   :  { %2017 = vmatmul.msk.f32.vlgmr.msrb.gmra.mxu3 %vm3467_vm13, %v913_v39 }
 0x46a   :  { %1380 = vmatpush.msrb.mxu3 %v2552_v52 }
 0x46c   :  { %1381 = vmatpush.msrb.mxu3 %v2562_v58 }
 0x46e   :  { %1382 = vmatpush.msrb.mxu3 %v2570_v3 }
 0x470   :  { %1383 = vmatpush.msrb.mxu3 %v2581_v9 }
 0x472   :  { %1384 = vmatpush.msrb.mxu3 %v2591_v15 }
 0x474   :  { %1385 = vmatpush.msrb.mxu3 %v2598_v19 }
 0x476   :  { %1386 = vmatpush.msrb.mxu3 %v2605_v23 }
 0x478   :  { %1387 = vmatpush.msrb.mxu3 %v2611_v24 }
 0x47a   :  { %1388 = vmatpush.msrb.mxu3 %v2618_v27 }
 0x4e2   :  { %v889_v40 = vpop.f32.mrf.mxu1 }
 0x4e4   :  { %v909_v41 = vpop.f32.mrf.mxu0 }
 0x4e5   :  { %v910_v44 = vadd.f32 %v909_v41, %v889_v40 }
 0x4e7   :  { %v957_v31 = vsel %vm3471_vm14, %v910_v44, 0.0  ;;  %vm3474_vm14 = vcmask 1041408  }
 0x4e8   :  { %v958_v45 = vrot.slane %v957_v31, 4 }
 0x4ea   :  { %v959_v6 = vadd.f32 %v958_v45, %v957_v31  ;;  %v934_v47 = vpop.f32.mrf.mxu2 }
 0x4ec   :  { %v960_v2 = vrot.slane %v959_v6, 2  ;;  %v954_v43 = vpop.f32.mrf.mxu3 }
 0x4ed   :  { %v955_v25 = vadd.f32 %v954_v43, %v934_v47 }
 0x4ee   :  { %v961_v35 = vadd.f32 %v960_v2, %v959_v6 }
 0x4ef   :  { %v965_v5 = vsel %vm3472_vm12, %v955_v25, 0.0  ;;  %vm3475_vm12 = vmmov %vm3473_vm15 }
 0x4f0   :  { %v962_v52 = vrot.slane %v961_v35, 1  ;;  %v966_v10 = vrot.slane %v965_v5, 4  ;;  %vm3476_vm7 = vmmov %vm3475_vm12 }
 0x4f2   :  { %v967_v12 = vadd.f32 %v966_v10, %v965_v5  ;;  %v963_v4 = vadd.f32 %v962_v52, %v961_v35 }
 0x4f4   :  { %v968_v58 = vrot.slane %v967_v12, 2  ;;  %v964_v46 = vmul.f32 0.00390625, %v963_v4 }
 0x4f6   :  { %v969_v3 = vadd.f32 %v968_v58, %v967_v12  ;;  %v973_v16 = vmul.f32 %v964_v46, %v964_v46 }
 0x4f8   :  { %v970_v9 = vrot.slane %v969_v3, 1 }
 0x4fa   :  { %v971_v14 = vadd.f32 %v970_v9, %v969_v3 }
 0x4fc   :  { %v972_v15 = vmul.f32 0.00390625, %v971_v14 }
 0x4fe   :  { %v974_v13 = vsub.f32 %v972_v15, %v973_v16 }
 0x500   :  { %v975_v17 = vmax.f32 %v974_v13, 0.0 }
 0x502   :  { %v976_v19 = vadd.f32 1e-05, %v975_v17 }
 0x504   :  { %2213 = vrsqrt.f32 %v976_v19  ;;  %vm983_vm9 = vweird.f32 %v976_v19 }
 0x50a   :  { %v2214_v23 = vpop.eup %2213 }
 0x50b   :  { %v978_v20 = vmul.f32 %v2214_v23, %v976_v19  ;;  %vm984_vm13 = vweird.f32 %v2214_v23 }
 0x50c   :  { %vm985_vm10 = vmor %vm983_vm9, %vm984_vm13 }
 0x50d   :  { %v979_v8 = vmul.f32 %v2214_v23, %v978_v20  ;;  %vm3477_vm13 = vmmov %vm3476_vm7 }
 0x50f   :  { %v980_v21 = vmul.f32 0.5, %v979_v8 }
 0x511   :  { %v981_v24 = vsub.f32 1.5, %v980_v21 }
 0x513   :  { %v982_v27 = vmul.f32 %v2214_v23, %v981_v24 }
 0x515   :  { %v986_v7 = vsel %vm985_vm10, %v2214_v23, %v982_v27 }
 0x516   :  { %v992_v26 = vmul.f32 %v990_v22, %v986_v7 }
 0x518   :  { %v993_v30 = vmul.f32 %v992_v26, %v964_v46  ;;  %2019 = vmatmul.msk.f32.vlgmr.msra.gmra.mxu0 %vm3473_vm15, %v992_v26 }
 0x519   :  { %2022 = vmatpush.msk.msra.mxu0 %vm3474_vm14, %v1053_v18 }
 0x51a   :  { %v999_v32 = vsub.f32 %v997_v29, %v993_v30 }
 0x51c   :  { %2025 = vmatmul.msk.f32.vlgmr.msra.gmra.mxu3 %vm3475_vm12, %v999_v32 }
 0x520   :  { %2021 = vmatmul.msk.f32.vlgmr.msrb.gmra.mxu0 %vm3476_vm7, %v992_v26 }
 0x521   :  { %1353 = vmatpush.msrb.mxu0 %v2639_v48 }
 0x523   :  { %1354 = vmatpush.msrb.mxu0 %v2646_v49 }
 0x525   :  { %1355 = vmatpush.msrb.mxu0 %v2653_v50 }
 0x527   :  { %1356 = vmatpush.msrb.mxu0 %v2660_v51 }
 0x528   :  { %2023 = vmatmul.msk.f32.vlgmr.msra.gmra.mxu0 %vm3477_vm13, %v999_v32 }
 0x529   :  { %1357 = vmatpush.msrb.mxu0 %v2667_v53 }
 0x52b   :  { %1358 = vmatpush.msrb.mxu0 %v2674_v54 }
 0x52d   :  { %1359 = vmatpush.msrb.mxu0 %v2682_v55 }
 0x52f   :  { %1360 = vmatpush.msrb.mxu0 %v2689_v56 }
 0x531   :  { %1361 = vmatpush.msrb.mxu0 %v2696_v57 }
 0x533   :  { %1362 = vmatpush.msrb.mxu0 %v2703_v59 }
 0x535   :  { %1363 = vmatpush.msrb.mxu0 %v2710_v60 }
 0x537   :  { %1364 = vmatpush.msrb.mxu0 %v2717_v61 }
 0x539   :  { %1365 = vmatpush.msrb.mxu0 %v2730_v62 }
 0x53b   :  { %1366 = vmatpush.msrb.mxu0 %v2735_v63 }
 0x53d   :  { %1367 = vmatpush.msrb.mxu0 %v2742_v0 }
 0x53f   :  { %1368 = vmatpush.msrb.mxu0 %v2751_v1 }
 0x595   :  { %v1027_v48 = vpop.f32.mrf.mxu0 }
 0x596   :  { %v1050_v55 = vmul.f32 %v1027_v48, %v2927_v28 }
 0x59d   :  { %v1047_v49 = vpop.f32.mrf.mxu0 }
 0x59e   :  { %v1051_v50 = vmul.f32 %v1047_v49, %v2932_v36 }
 0x59f   :  { %v1099_v51 = vpop.f32.mrf.mxu3 }
 0x5a0   :  { %v1103_v53 = vadd.f32 %v1099_v51, %v1051_v50 }
 0x5a2   :  { %v2978_v54 = vadd.f32 %v1103_v53, %v2510_v34 }
 0x5a4   :  { %v2982_v56 = vmul.f32 0.70710677, %v2978_v54 }
 0x5a5   :  { %v1079_v57 = vpop.f32.mrf.mxu0 }
 0x5a6   :  { %v1111_v59 = vand.u32 2147483647, %v2982_v56  ;;  %v1102_v60 = vadd.f32 %v1079_v57, %v1050_v55  ;;  %v1107_v55 = vmul.f32 0.5, %v2978_v54 }
 0x5a8   :  { %v1113_v61 = vmul.f32 0.3275911, %v1111_v59  ;;  %v2986_v62 = vadd.f32 %v1102_v60, %v2508_v33  ;;  %v1165_v47 = vsub.f32 0.0, %v1111_v59 }
 0x5aa   :  { %v1115_v63 = vadd.f32 1.0, %v1113_v61  ;;  %v2989_v0 = vmul.f32 0.70710677, %v2986_v62  ;;  %v1167_v10 = vmul.f32 %v1165_v47, %v1111_v59 }
 0x5ac   :  { %2215 = vrcp.f32 %v1115_v63  ;;  %v1110_v34 = vand.u32 2147483647, %v2989_v0  ;;  %v1142_v37 = vand.u32 2147483648, %v1115_v63  ;;  %v1140_v41 = vand.u32 2147483647, %v1115_v63 }
 0x5ad   :  { %vm1136_vm9 = vweird.f32 %v1115_v63  ;;  %v1170_v15 = vmul.f32 1.442695, %v1167_v10 }
 0x5ae   :  { %v1112_v1 = vmul.f32 0.3275911, %v1110_v34  ;;  %v1143_v44 = vor.u32 1.1754944e-38, %v1142_v37  ;;  %vm1141_vm15 = vcmp.eq.f32.partialorder %v1140_v41, 8.507059e+37  ;;  %v1164_v14 = vsub.f32 0.0, %v1110_v34 }
 0x5b0   :  { %v1114_v28 = vadd.f32 1.0, %v1112_v1  ;;  %v1166_v19 = vmul.f32 %v1164_v14, %v1110_v34  ;;  %v1106_v1 = vmul.f32 0.5, %v2986_v62  ;;  %v1348_v62 = vld [vmem:[%s3406_s15] sm:$0xff] }
 0x5b2   :  { %v2216_v36 = vpop.eup %2215  ;;  %2217 = vrcp.f32 %v1114_v28  ;;  %v1127_v25 = vand.u32 2147483648, %v1114_v28  ;;  %v1125_v5 = vand.u32 2147483647, %v1114_v28  ;;  %vm1121_vm12 = vweird.f32 %v1114_v28 }
 0x5b3   :  { %v1132_v39 = vmul.f32 %v2216_v36, %v1115_v63  ;;  %vm1137_vm7 = vweird.f32 %v2216_v36  ;;  %2219 = vpow2.f32 %v1170_v15  ;;  %v1168_v24 = vmul.f32 1.442695, %v1166_v19 }
 0x5b4   :  { %vm1138_vm10 = vmor %vm1136_vm9, %vm1137_vm7  ;;  %v1128_v4 = vor.u32 1.1754944e-38, %v1127_v25  ;;  %vm1126_vm7 = vcmp.eq.f32.partialorder %v1125_v5, 8.507059e+37  ;;  %vm1177_vm9 = vcmp.ge.f32.partialorder %v2982_v56, 0.0 }
 0x5b5   :  { %v1133_v38 = vsub.f32 1.0, %v1132_v39  ;;  %2221 = vpow2.f32 %v1168_v24 }
 0x5b7   :  { %v1134_v40 = vmul.f32 %v2216_v36, %v1133_v38 }
 0x5b8   :  { %v2218_v42 = vpop.eup %2217 }
 0x5b9   :  { %v1135_v33 = vadd.f32 %v2216_v36, %v1134_v40  ;;  %v1117_v31 = vmul.f32 %v2218_v42, %v1114_v28  ;;  %vm1122_vm14 = vweird.f32 %v2218_v42  ;;  %v2220_v7 = vpop.eup %2219 }
 0x5ba   :  { %vm1123_vm13 = vmor %vm1121_vm12, %vm1122_vm14  ;;  %vm3479_vm14 = vcmask 72704   ;;  %vm3480_vm12 = vcmask 89088  }
 0x5bb   :  { %v1139_v45 = vsel %vm1138_vm10, %v2216_v36, %v1135_v33  ;;  %v1118_v2 = vsub.f32 1.0, %v1117_v31  ;;  %v2222_v51 = vpop.eup %2221  ;;  %vm1176_vm10 = vcmp.ge.f32.partialorder %v2989_v0, 0.0  ;;  %v1349_v36 = vld [vmem:[%s3407_s16] sm:$0xff] }
 0x5bc   :  { %v1144_v6 = vsel %vm1141_vm15, %v1143_v44, %v1139_v45  ;;  %vm3478_vm15 = vcmask 7168  }
 0x5bd   :  { %v1147_v43 = vmul.f32 1.0614054, %v1144_v6  ;;  %v1119_v35 = vmul.f32 %v2218_v42, %v1118_v2 }
 0x5bf   :  { %v1149_v52 = vadd.f32 -1.4531521, %v1147_v43  ;;  %v1120_v12 = vadd.f32 %v2218_v42, %v1119_v35 }
 0x5c1   :  { %v1151_v58 = vmul.f32 %v1149_v52, %v1144_v6  ;;  %v1124_v3 = vsel %vm1123_vm13, %v2218_v42, %v1120_v12  ;;  %vm3481_vm13 = vcmask 293888  }
 0x5c2   :  { %v1129_v46 = vsel %vm1126_vm7, %v1128_v4, %v1124_v3  ;;  %vm3482_vm7 = vmmov %vm3478_vm15 }
 0x5c3   :  { %v1153_v9 = vadd.f32 1.4214138, %v1151_v58  ;;  %v1146_v16 = vmul.f32 1.0614054, %v1129_v46 }
 0x5c5   :  { %v1155_v13 = vmul.f32 %v1153_v9, %v1144_v6  ;;  %v1148_v17 = vadd.f32 -1.4531521, %v1146_v16 }
 0x5c7   :  { %v1157_v18 = vadd.f32 -0.28449672, %v1155_v13  ;;  %v1150_v23 = vmul.f32 %v1148_v17, %v1129_v46 }
 0x5c9   :  { %v1159_v20 = vmul.f32 %v1157_v18, %v1144_v6  ;;  %v1152_v8 = vadd.f32 1.4214138, %v1150_v23 }
 0x5cb   :  { %v1161_v21 = vadd.f32 0.2548296, %v1159_v20  ;;  %v1154_v22 = vmul.f32 %v1152_v8, %v1129_v46 }
 0x5cd   :  { %v1163_v27 = vmul.f32 %v1161_v21, %v1144_v6  ;;  %v1156_v26 = vadd.f32 -0.28449672, %v1154_v22 }
 0x5cf   :  { %v1173_v30 = vmul.f32 %v2220_v7, %v1163_v27  ;;  %v1158_v29 = vmul.f32 %v1156_v26, %v1129_v46 }
 0x5d1   :  { %v1175_v32 = vsub.f32 1.0, %v1173_v30  ;;  %v1160_v48 = vadd.f32 0.2548296, %v1158_v29  ;;  %v1186_v30 = vld [vmem:[%s3405_s14] sm:$0xff] }
 0x5d3   :  { %v1179_v49 = vsub.f32 0.0, %v1175_v32  ;;  %v1162_v50 = vmul.f32 %v1160_v48, %v1129_v46 }
 0x5d5   :  { %v1181_v53 = vsel %vm1177_vm9, %v1175_v32, %v1179_v49  ;;  %v1172_v59 = vmul.f32 %v2222_v51, %v1162_v50  ;;  %vm3483_vm9 = vcmask 973824  }
 0x5d6   :  { %v1183_v57 = vadd.f32 1.0, %v1181_v53  ;;  %v2235_v53 = vld [vmem:[%s3449_s29 + $0xc0] sm:$0xff] }
 0x5d7   :  { %v1174_v61 = vsub.f32 1.0, %v1172_v59 }
 0x5d8   :  { %v1185_v60 = vmul.f32 %v1183_v57, %v1107_v55 }
 0x5d9   :  { %v1178_v63 = vsub.f32 0.0, %v1174_v61 }
 0x5da   :  { %1243 = vrot.lane.b32.xlu0 %v1185_v60, %s2294_s25  ;;  %1233 = vrot.lane.b32.xlu1 %v1185_v60, %s3440_s23 }
 0x5db   :  { %1264 = vrot.lane.b32.xlu2 %v1185_v60, %s2286_s30  ;;  %v1180_v34 = vsel %vm1176_vm10, %v1174_v61, %v1178_v63  ;;  %v2236_v63 = vld [vmem:[%s3449_s29 + $0xb8] sm:$0xff]  ;;  %vm3484_vm10 = vmmov %vm3479_vm14 }
 0x5dc   :  { %v1182_v56 = vadd.f32 1.0, %v1180_v34 }
 0x5de   :  { %v2999_v28 = vmul.f32 %v1182_v56, %v1106_v1 }
 0x5e0   :  { %v2138_v54 = vpack.i.bf16 %v2999_v28, %v1185_v60  ;;  %v2143_v0 = vpack.i.bf16 %v1185_v60, %v2999_v28 }
 0x5e2   :  { %1221 = vrot.lane.b32.xlu0 %v1185_v60, %s3452_s28  ;;  %1258 = vrot.lane.b32.xlu1 %v2999_v28, %s2291_s22 }
 0x5e3   :  { %1237 = vrot.lane.b32.xlu2 %v2999_v28, %s3441_s1 }
 0x5ea   :  { %1248 = vrot.lane.b32.xlu1 %v2999_v28, %s2292_s24  ;;  %2139 = vrot.lane.b32.xlu0 %v2138_v54, %s2288_s0 }
 0x5eb   :  { %2144 = vrot.lane.b32.xlu2 %v2143_v0, %s3453_s27 }
 0x5f2   :  { %2154 = vrot.lane.b32.xlu1 %v2143_v0, %s3450_s5  ;;  %1268 = vrot.lane.b32.xlu0 %v2999_v28, %s2289_s21 }
 0x5f3   :  { %2159 = vrot.lane.b32.xlu2 %v2143_v0, %s3454_s4 }
 0x5fa   :  { %1231 = vrot.lane.b32.xlu1 %v2999_v28, %s3440_s23  ;;  %2149 = vrot.lane.b32.xlu0 %v2143_v0, %s3451_s2  ;;  %v2237_v0 = vld [vmem:[%s3449_s29 + $0xb0] sm:$0xff] }
 0x5fb   :  { %1241 = vrot.lane.b32.xlu2 %v2999_v28, %s2294_s25 }
 0x602   :  { %1200 = vrot.lane.b32.xlu1 %v1185_v60, %s3456_s26  ;;  %1262 = vrot.lane.b32.xlu0 %v2999_v28, %s2286_s30 }
 0x603   :  { %1210 = vrot.lane.b32.xlu2 %v1185_v60, %s3457_s8 }
 0x60a   :  { %1470 = vperm.xlu1 %2137, %v1348_v62   ;;  %1188 = vrot.lane.b32.xlu0 %v1185_v60, %s3455_s3 }
 0x60b   :  { %1477 = vperm.xlu2 %2100, %v1349_v36   ;;  %v2238_v36 = vld [vmem:[%s3449_s29 + $0xa8] sm:$0xff] }
 0x635   :  { %v1265_v39 = vpop.permute.xlu2 %1264 }
 0x63d   :  { %v1238_v40 = vpop.permute.xlu2 %1237 }
 0x645   :  { %v2145_v33 = vpop.permute.xlu2 %2144 }
 0x646   :  { %v2147_v47 = vunpack.i.h.bf16 %v2145_v33  ;;  %v2146_v2 = vunpack.i.l.bf16 %v2145_v33  ;;  %v2242_v33 = vld [vmem:[%s3449_s29 + $0x90] sm:$0xff] }
 0x648   :  { %v1228_v3 = vsel %vm3478_vm15, %v2146_v2, %v2147_v47  ;;  %vm3485_vm15 = vmmov %vm3480_vm12  ;;  %v2247_v47 = vld [vmem:[%s3449_s29 + $0x60] sm:$0xff] }
 0x649   :  { %v1279_v16 = vrot.slane %v1228_v3, 4  ;;  %v2258_v3 = vld [vmem:[%s3449_s29 + $0x8] sm:$0xff] }
 0x64c   :  { %v1244_v38 = vpop.permute.xlu0 %1243  ;;  %v1234_v37 = vpop.permute.xlu1 %1233 }
 0x64d   :  { %v1240_v43 = vsel %vm266_vm3, %v1234_v37, %v1238_v40  ;;  %v3034_v25 = vpop.permute.xlu2 %2159 }
 0x64e   :  { %v1284_v10 = vrot.slane %v1240_v43, 4  ;;  %v2162_v23 = vunpack.i.h.bf16 %v3034_v25  ;;  %v2161_v20 = vunpack.i.l.bf16 %v3034_v25  ;;  %v2249_v43 = vld [vmem:[%s3449_s29 + $0x50] sm:$0xff]  ;;  %v2250_v25 = vld [vmem:[%s3449_s29 + $0x48] sm:$0xff] }
 0x650   :  { %v1297_v15 = vsel %vm325_vm1, %v1185_v60, %v1284_v10  ;;  %v1196_v26 = vsel %vm3480_vm12, %v2161_v20, %v2162_v23  ;;  %v2254_v10 = vld [vmem:[%s3449_s29 + $0x28] sm:$0xff] }
 0x654   :  { %v1222_v41 = vpop.permute.xlu0 %1221  ;;  %v1259_v42 = vpop.permute.xlu1 %1258 }
 0x655   :  { %v1242_v8 = vpop.permute.xlu2 %1241  ;;  %v1230_v55 = vsel %vm3482_vm7, %v1222_v41, %v2146_v2  ;;  %v2240_v41 = vld [vmem:[%s3449_s29 + $0x98] sm:$0xff] }
 0x656   :  { %v1245_v57 = vsel %vm3483_vm9, %v1242_v8, %v1244_v38  ;;  %v1278_v56 = vrot.slane %v1230_v55, 4  ;;  %v2248_v2 = vld [vmem:[%s3449_s29 + $0x58] sm:$0xff]  ;;  %vm3491_vm9 = vcmask 1041408  }
 0x65c   :  { %v1249_v44 = vpop.permute.xlu1 %1248  ;;  %v2140_v31 = vpop.permute.xlu0 %2139 }
 0x65d   :  { %v2141_v45 = vunpack.i.l.bf16 %v2140_v31  ;;  %v1251_v9 = vsel %vm279_vm8, %v1244_v38, %v1249_v44  ;;  %v2142_v17 = vunpack.i.h.bf16 %v2140_v31  ;;  %v1211_v60 = vpop.permute.xlu2 %1210  ;;  %v2243_v44 = vld [vmem:[%s3449_s29 + $0x70] sm:$0xff]  ;;  %v2244_v31 = vld [vmem:[%s3449_s29 + $0x88] sm:$0xff] }
 0x65f   :  { %v1261_v6 = vsel %vm291_vm4, %v2141_v45, %v1259_v42  ;;  %v1256_v27 = vsel %vm285_vm5, %v2142_v17, %v2141_v45  ;;  %v2241_v42 = vld [vmem:[%s3449_s29 + $0x78] sm:$0xff]  ;;  %v2245_v45 = vld [vmem:[%s3449_s29 + $0x68] sm:$0xff] }
 0x660   :  { %v1289_v35 = vrot.slane %v1261_v6, 4  ;;  %v1288_v48 = vrot.slane %v1256_v27, 4  ;;  %v2246_v6 = vld [vmem:[%s3449_s29 + $0x80] sm:$0xff] }
 0x662   :  { %v1299_v46 = vsel %vm325_vm1, %v1251_v9, %v1289_v35  ;;  %v1298_v61 = vsel %vm325_vm1, %v1245_v57, %v1288_v48  ;;  %v2251_v35 = vld [vmem:[%s3449_s29 + $0x40] sm:$0xff] }
 0x663   :  { %v2259_v9 = vld [vmem:[%s3449_s29] sm:$0xff] }
 0x664   :  { %v2155_v5 = vpop.permute.xlu1 %2154  ;;  %v1269_v52 = vpop.permute.xlu0 %1268 }
 0x665   :  { %v2157_v12 = vunpack.i.h.bf16 %v2155_v5  ;;  %v2156_v58 = vunpack.i.l.bf16 %v2155_v5  ;;  %v1271_v4 = vsel %vm303_vm2, %v1265_v39, %v1269_v52  ;;  %v2252_v5 = vld [vmem:[%s3449_s29 + $0x38] sm:$0xff]  ;;  %v2253_v52 = vld [vmem:[%s3449_s29 + $0x30] sm:$0xff] }
 0x666   :  { %2028 = vmatpush.msk.msra.mxu2 %vm325_vm1, %v1271_v4  ;;  %v2257_v4 = vld [vmem:[%s3449_s29 + $0x10] sm:$0xff] }
 0x667   :  { %v1217_v14 = vsel %vm3479_vm14, %v2156_v58, %v2157_v12  ;;  %v1220_v34 = vsel %vm3484_vm10, %v1211_v60, %v2156_v58  ;;  %vm3486_vm14 = vmmov %vm3481_vm13  ;;  %v2255_v12 = vld [vmem:[%s3449_s29 + $0x20] sm:$0xff]  ;;  %v2256_v58 = vld [vmem:[%s3449_s29 + $0x18] sm:$0xff] }
 0x668   :  { %1340 = vmatpush.msra.mxu2 %v1299_v46  ;;  %v1295_v13 = vsel %vm325_vm1, %v1217_v14, %v1279_v16  ;;  %v1294_v62 = vsel %vm325_vm1, %v1220_v34, %v1278_v56  ;;  %vm3492_vm10 = vmmov %vm3491_vm9 }
 0x66a   :  { %1341 = vmatpush.msra.mxu2 %v1297_v15 }
 0x66c   :  { %v1232_v18 = vpop.permute.xlu1 %1231  ;;  %v2150_v19 = vpop.permute.xlu0 %2149  ;;  %1342 = vmatpush.msra.mxu2 %v1295_v13 }
 0x66d   :  { %v2152_v21 = vunpack.i.h.bf16 %v2150_v19  ;;  %v2151_v24 = vunpack.i.l.bf16 %v2150_v19  ;;  %v1235_v29 = vsel %vm260_vm6, %v1232_v18, %v1234_v37 }
 0x66e   :  { %v1283_v50 = vrot.slane %v1235_v29, 4 }
 0x66f   :  { %v1207_v22 = vsel %vm229_vm11, %v2151_v24, %v2152_v21 }
 0x670   :  { %v1274_v7 = vrot.slane %v1207_v22, 4  ;;  %v1296_v54 = vsel %vm325_vm1, %v2999_v28, %v1283_v50  ;;  %v2239_v28 = vld [vmem:[%s3449_s29 + $0xa0] sm:$0xff]  ;;  %s3498_s29 = smov 71  }
 0x672   :  { %v1293_v32 = vsel %vm325_vm1, %v1196_v26, %v1274_v7  ;;  %v1482_v7 = vld.sshfl [vmem:[#allocation1] sm:$0xff pattern:$0x73625140]  ;;  %v1483_v26 = vld.sshfl [vmem:[#allocation1 + $0x8] sm:$0xff pattern:$0x73625140] }
 0x673   :  { %1343 = vmatpush.msra.mxu2 %v1293_v32  ;;  %2032 = vmatpush.msk.msra.mxu3 %vm3491_vm9, %v1482_v7  ;;  %1533 = vst [vmem:[#allocation1] ss:$4 sm:$0xff] %v2785_v11 }
 0x674   :  { %v1263_v49 = vpop.permute.xlu0 %1262  ;;  %2029 = vmatmul.msk.f32.vlgmr.msra.gmra.mxu2 %vm3481_vm13, %v1186_v30  ;;  %v1201_v59 = vpop.permute.xlu1 %1200  ;;  %vm3489_vm13 = vcmask 15360  }
 0x675   :  { %v1266_v51 = vsel %vm297_vm0, %v1263_v49, %v1265_v39  ;;  %1425 = vmatpush.msrb.mxu2 %v2235_v53  ;;  %v1209_v1 = vsel %vm229_vm11, %v1201_v59, %v2151_v24  ;;  %vm3490_vm7 = vmmov %vm3489_vm13 }
 0x676   :  { %2026 = vmatpush.msk.msra.mxu1 %vm325_vm1, %v1266_v51  ;;  %v1273_v39 = vrot.slane %v1209_v1, 4 }
 0x677   :  { %1426 = vmatpush.msrb.mxu2 %v2236_v63 }
 0x678   :  { %1320 = vmatpush.msra.mxu1 %v1298_v61 }
 0x679   :  { %1427 = vmatpush.msrb.mxu2 %v2237_v0 }
 0x67a   :  { %1321 = vmatpush.msra.mxu1 %v1296_v54  ;;  %v1534_v55 = vld.sshfl [vmem:[#allocation1] sm:$0xff pattern:$0x73625140]  ;;  %v1535_v57 = vld.sshfl [vmem:[#allocation1 + $0x8] sm:$0xff pattern:$0x73625140] }
 0x67b   :  { %1428 = vmatpush.msrb.mxu2 %v2238_v36 }
 0x67c   :  { %v1189_v38 = vpop.permute.xlu0 %1188  ;;  %1322 = vmatpush.msra.mxu1 %v1294_v62 }
 0x67d   :  { %v1199_v37 = vsel %vm3485_vm15, %v1189_v38, %v2161_v20  ;;  %1429 = vmatpush.msrb.mxu2 %v2239_v28  ;;  %vm3493_vm15 = vmmov %vm3491_vm9  ;;  %v1471_v38 = vpop.permute.xlu1 %1470 }
 0x67e   :  { %v1292_v40 = vsel %vm325_vm1, %v1199_v37, %v1273_v39  ;;  %vm3487_vm1 = vcmask 588800  }
 0x67f   :  { %1323 = vmatpush.msra.mxu1 %v1292_v40  ;;  %1430 = vmatpush.msrb.mxu2 %v2240_v41  ;;  %vm3488_vm12 = vmmov %vm3487_vm1  ;;  %v1478_v41 = vpop.permute.xlu2 %1477 }
 0x680   :  { %2027 = vmatmul.msk.f32.vlgmr.msra.gmra.mxu1 %vm3486_vm14, %v1186_v30  ;;  %vm3494_vm14 = vmmov %vm3491_vm9 }
 0x681   :  { %1398 = vmatpush.msrb.mxu1 %v2241_v42  ;;  %1431 = vmatpush.msrb.mxu2 %v2242_v33  ;;  %vm3495_vm9 = vmmov %vm3490_vm7 }
 0x682   :  { %2038 = vmatpush.msk.msra.mxu0 %vm3494_vm14, %v1535_v57 }
 0x683   :  { %1399 = vmatpush.msrb.mxu1 %v2243_v44  ;;  %1432 = vmatpush.msrb.mxu2 %v2244_v31 }
 0x685   :  { %1400 = vmatpush.msrb.mxu1 %v2245_v45  ;;  %1433 = vmatpush.msrb.mxu2 %v2246_v6 }
 0x687   :  { %1401 = vmatpush.msrb.mxu1 %v2247_v47  ;;  %2034 = vmatpush.msk.msra.mxu2 %vm3492_vm10, %v1483_v26  ;;  %vm3496_vm10 = vmmov %vm3490_vm7 }
 0x689   :  { %1402 = vmatpush.msrb.mxu1 %v2248_v2 }
 0x68b   :  { %1403 = vmatpush.msrb.mxu1 %v2249_v43 }
 0x68d   :  { %1404 = vmatpush.msrb.mxu1 %v2250_v25 }
 0x68f   :  { %1405 = vmatpush.msrb.mxu1 %v2251_v35 }
 0x691   :  { %1406 = vmatpush.msrb.mxu1 %v2252_v5 }
 0x693   :  { %1407 = vmatpush.msrb.mxu1 %v2253_v52 }
 0x695   :  { %1408 = vmatpush.msrb.mxu1 %v2254_v10 }
 0x697   :  { %1409 = vmatpush.msrb.mxu1 %v2255_v12 }
 0x699   :  { %1410 = vmatpush.msrb.mxu1 %v2256_v58 }
 0x69b   :  { %1411 = vmatpush.msrb.mxu1 %v2257_v4 }
 0x69d   :  { %1412 = vmatpush.msrb.mxu1 %v2258_v3 }
 0x69f   :  { %1413 = vmatpush.msrb.mxu1 %v2259_v9 }
 0x6f7   :  { %v3143_v46 = vpop.f32.mrf.mxu2 }
 0x6f8   :  { %v1394_v14 = vmul.f32 %v3143_v46, %v3143_v46  ;;  %2030 = vmatmul.msk.f32.vlgmr.msrb.gmra.mxu3 %vm3487_vm1, %v3143_v46 }
 0x6f9   :  { %2036 = vmatpush.msk.msrb.mxu3 %vm3493_vm15, %v1534_v55  ;;  %vm3497_vm15 = vmmov %vm3490_vm7 }
 0x6fa   :  { %2031 = vmatmul.msk.f32.vlgmr.msrb.gmra.mxu2 %vm3488_vm12, %v1394_v14 }
 0x6fd   :  { %v3150_v15 = vpop.f32.mrf.mxu1 }
 0x6fe   :  { %v1393_v16 = vmul.f32 %v3150_v15, %v3150_v15  ;;  %1369 = vmatmul.f32.vlgmr.msrb.gmra.mxu0 %v3150_v15 }
 0x700   :  { %1414 = vmatmul.f32.vlgmr.msrb.gmra.mxu1 %v1393_v16 }
 0x77b   :  { %v1370_v13 = vpop.f32.mrf.mxu0  ;;  %v1390_v17 = vpop.f32.mrf.mxu3 }
 0x77c   :  { %v1391_v18 = vadd.f32 %v1390_v17, %v1370_v13 }
 0x77d   :  { %v1415_v19 = vpop.f32.mrf.mxu1  ;;  %v1435_v23 = vpop.f32.mrf.mxu2 }
 0x77e   :  { %v1438_v20 = vsel %vm3489_vm13, %v1391_v18, 0.0  ;;  %v1436_v8 = vadd.f32 %v1435_v23, %v1415_v19 }
 0x77f   :  { %v1439_v21 = vrot.slane %v1438_v20, 4 }
 0x780   :  { %v1446_v24 = vsel %vm3490_vm7, %v1436_v8, 0.0 }
 0x781   :  { %v1440_v22 = vadd.f32 %v1439_v21, %v1438_v20  ;;  %v1447_v27 = vrot.slane %v1446_v24, 4 }
 0x783   :  { %v1441_v30 = vrot.slane %v1440_v22, 2  ;;  %v1448_v29 = vadd.f32 %v1447_v27, %v1446_v24 }
 0x785   :  { %v1442_v32 = vadd.f32 %v1441_v30, %v1440_v22  ;;  %v1449_v48 = vrot.slane %v1448_v29, 2 }
 0x787   :  { %v1443_v49 = vrot.slane %v1442_v32, 1  ;;  %v1450_v50 = vadd.f32 %v1449_v48, %v1448_v29 }
 0x789   :  { %v1444_v51 = vadd.f32 %v1443_v49, %v1442_v32  ;;  %v1451_v53 = vrot.slane %v1450_v50, 1 }
 0x78b   :  { %v1445_v59 = vmul.f32 0.001953125, %v1444_v51  ;;  %v1452_v60 = vadd.f32 %v1451_v53, %v1450_v50 }
 0x78d   :  { %v1454_v61 = vmul.f32 %v1445_v59, %v1445_v59  ;;  %v1453_v63 = vmul.f32 0.001953125, %v1452_v60 }
 0x78f   :  { %v1455_v34 = vsub.f32 %v1453_v63, %v1454_v61 }
 0x791   :  { %v1456_v56 = vmax.f32 %v1455_v34, 0.0 }
 0x793   :  { %v1457_v1 = vadd.f32 1e-05, %v1456_v56 }
 0x795   :  { %2223 = vrsqrt.f32 %v1457_v1  ;;  %vm1464_vm12 = vweird.f32 %v1457_v1 }
 0x79b   :  { %v2224_v11 = vpop.eup %2223 }
 0x79c   :  { %v1459_v54 = vmul.f32 %v2224_v11, %v1457_v1  ;;  %vm1465_vm1 = vweird.f32 %v2224_v11 }
 0x79d   :  { %vm1466_vm13 = vmor %vm1464_vm12, %vm1465_vm1 }
 0x79e   :  { %v1460_v0 = vmul.f32 %v2224_v11, %v1459_v54 }
 0x7a0   :  { %v1461_v62 = vmul.f32 0.5, %v1460_v0 }
 0x7a2   :  { %v1462_v36 = vsub.f32 1.5, %v1461_v62 }
 0x7a4   :  { %v1463_v39 = vmul.f32 %v2224_v11, %v1462_v36 }
 0x7a6   :  { %v1467_v37 = vsel %vm1466_vm13, %v2224_v11, %v1463_v39 }
 0x7a7   :  { %v1473_v28 = vmul.f32 %v1471_v38, %v1467_v37 }
 0x7a9   :  { %2033 = vmatmul.msk.f32.vlgmr.msra.gmra.mxu3 %vm3490_vm7, %v1473_v28  ;;  %2035 = vmatmul.msk.f32.vlgmr.msra.gmra.mxu2 %vm3495_vm9, %v1473_v28  ;;  %v1474_v40 = vmul.f32 %v1473_v28, %v1445_v59 }
 0x7ab   :  { %v1480_v42 = vsub.f32 %v1478_v41, %v1474_v40 }
 0x7ad   :  { %2039 = vmatmul.msk.f32.vlgmr.msra.gmra.mxu0 %vm3496_vm10, %v1480_v42 }
 0x7b1   :  { %2037 = vmatmul.msk.f32.vlgmr.msrb.gmra.mxu3 %vm3497_vm15, %v1480_v42 }
 0x82a   :  { %v1580_v45 = vpop.f32.mrf.mxu0 }
 0x82c   :  { %v1508_v33 = vpop.f32.mrf.mxu3  ;;  %v1528_v44 = vpop.f32.mrf.mxu2 }
 0x82d   :  { %v1532_v31 = vmul.f32 %v1528_v44, %v3143_v46  ;;  %v1531_v2 = vmul.f32 %v1508_v33, %v3150_v15 }
 0x82f   :  { %v3167_v6 = vadd.f32 %v1580_v45, %v1532_v31 }
 0x831   :  { %v3170_v47 = vmul.f32 0.70710677, %v3167_v6  ;;  %v1586_v31 = vmul.f32 0.5, %v3167_v6 }
 0x833   :  { %v1590_v43 = vand.u32 2147483647, %v3170_v47 }
 0x834   :  { %v1560_v25 = vpop.f32.mrf.mxu3 }
 0x835   :  { %v1592_v35 = vmul.f32 0.3275911, %v1590_v43  ;;  %v3174_v5 = vadd.f32 %v1560_v25, %v1531_v2  ;;  %v1644_v8 = vsub.f32 0.0, %v1590_v43 }
 0x837   :  { %v1594_v52 = vadd.f32 1.0, %v1592_v35  ;;  %v3177_v10 = vmul.f32 0.70710677, %v3174_v5  ;;  %v1646_v30 = vmul.f32 %v1644_v8, %v1590_v43  ;;  %v1585_v6 = vmul.f32 0.5, %v3174_v5  ;;  %v1913_v5 = vld [vmem:[%s3409_s18] sm:$0xff] }
 0x839   :  { %2225 = vrcp.f32 %v1594_v52  ;;  %v1589_v12 = vand.u32 2147483647, %v3177_v10  ;;  %v1621_v14 = vand.u32 2147483648, %v1594_v52  ;;  %v1619_v16 = vand.u32 2147483647, %v1594_v52 }
 0x83a   :  { %vm1615_vm1 = vweird.f32 %v1594_v52  ;;  %v1649_v55 = vmul.f32 1.442695, %v1646_v30 }
 0x83b   :  { %v1591_v58 = vmul.f32 0.3275911, %v1589_v12  ;;  %v1622_v18 = vor.u32 1.1754944e-38, %v1621_v14  ;;  %vm1620_vm13 = vcmp.eq.f32.partialorder %v1619_v16, 8.507059e+37  ;;  %v1643_v53 = vsub.f32 0.0, %v1589_v12 }
 0x83d   :  { %v1593_v4 = vadd.f32 1.0, %v1591_v58  ;;  %v1645_v63 = vmul.f32 %v1643_v53, %v1589_v12 }
 0x83f   :  { %v2226_v3 = vpop.eup %2225  ;;  %2227 = vrcp.f32 %v1593_v4  ;;  %v1606_v22 = vand.u32 2147483648, %v1593_v4  ;;  %v1604_v7 = vand.u32 2147483647, %v1593_v4  ;;  %vm1600_vm9 = vweird.f32 %v1593_v4 }
 0x840   :  { %v1611_v9 = vmul.f32 %v2226_v3, %v1594_v52  ;;  %vm1616_vm14 = vweird.f32 %v2226_v3  ;;  %2229 = vpow2.f32 %v1649_v55  ;;  %v1647_v54 = vmul.f32 1.442695, %v1645_v63 }
 0x841   :  { %vm1617_vm12 = vmor %vm1615_vm1, %vm1616_vm14  ;;  %v1607_v48 = vor.u32 1.1754944e-38, %v1606_v22  ;;  %vm1605_vm15 = vcmp.eq.f32.partialorder %v1604_v7, 8.507059e+37  ;;  %vm1656_vm14 = vcmp.ge.f32.partialorder %v3170_v47, 0.0  ;;  %vm1655_vm1 = vcmp.ge.f32.partialorder %v3177_v10, 0.0  ;;  %v1920_v10 = vld [vmem:[%s3410_s19] sm:$0xff] }
 0x842   :  { %v1612_v46 = vsub.f32 1.0, %v1611_v9  ;;  %2231 = vpow2.f32 %v1647_v54 }
 0x844   :  { %v1613_v15 = vmul.f32 %v2226_v3, %v1612_v46 }
 0x845   :  { %v2228_v13 = vpop.eup %2227 }
 0x846   :  { %v1614_v17 = vadd.f32 %v2226_v3, %v1613_v15  ;;  %v1596_v19 = vmul.f32 %v2228_v13, %v1593_v4  ;;  %vm1601_vm7 = vweird.f32 %v2228_v13  ;;  %v2230_v36 = vpop.eup %2229 }
 0x847   :  { %vm1602_vm10 = vmor %vm1600_vm9, %vm1601_vm7  ;;  %vm3511_vm7 = vcmask 15360  }
 0x848   :  { %v1618_v23 = vsel %vm1617_vm12, %v2226_v3, %v1614_v17  ;;  %v1597_v21 = vsub.f32 1.0, %v1596_v19  ;;  %v2232_v33 = vpop.eup %2231  ;;  %vm3512_vm9 = vmmov %vm3511_vm7 }
 0x849   :  { %v1623_v20 = vsel %vm1620_vm13, %v1622_v18, %v1618_v23 }
 0x84a   :  { %v1626_v24 = vmul.f32 1.0614054, %v1623_v20  ;;  %v1598_v27 = vmul.f32 %v2228_v13, %v1597_v21 }
 0x84c   :  { %v1628_v26 = vadd.f32 -1.4531521, %v1626_v24  ;;  %v1599_v29 = vadd.f32 %v2228_v13, %v1598_v27 }
 0x84e   :  { %v1630_v32 = vmul.f32 %v1628_v26, %v1623_v20  ;;  %v1603_v49 = vsel %vm1602_vm10, %v2228_v13, %v1599_v29  ;;  %vm3513_vm10 = vcmask 1041408  }
 0x84f   :  { %v1608_v51 = vsel %vm1605_vm15, %v1607_v48, %v1603_v49  ;;  %vm3514_vm15 = vmmov %vm3513_vm10 }
 0x850   :  { %v1632_v50 = vadd.f32 1.4214138, %v1630_v32  ;;  %v1625_v57 = vmul.f32 1.0614054, %v1608_v51 }
 0x852   :  { %v1634_v59 = vmul.f32 %v1632_v50, %v1623_v20  ;;  %v1627_v60 = vadd.f32 -1.4531521, %v1625_v57 }
 0x854   :  { %v1636_v61 = vadd.f32 -0.28449672, %v1634_v59  ;;  %v1629_v34 = vmul.f32 %v1627_v60, %v1608_v51 }
 0x856   :  { %v1638_v56 = vmul.f32 %v1636_v61, %v1623_v20  ;;  %v1631_v1 = vadd.f32 1.4214138, %v1629_v34 }
 0x858   :  { %v1640_v11 = vadd.f32 0.2548296, %v1638_v56  ;;  %v1633_v0 = vmul.f32 %v1631_v1, %v1608_v51 }
 0x85a   :  { %v1642_v62 = vmul.f32 %v1640_v11, %v1623_v20  ;;  %v1635_v39 = vadd.f32 -0.28449672, %v1633_v0 }
 0x85c   :  { %v1652_v38 = vmul.f32 %v2230_v36, %v1642_v62  ;;  %v1637_v37 = vmul.f32 %v1635_v39, %v1608_v51 }
 0x85e   :  { %v1654_v28 = vsub.f32 1.0, %v1652_v38  ;;  %v1639_v40 = vadd.f32 0.2548296, %v1637_v37 }
 0x860   :  { %v1658_v41 = vsub.f32 0.0, %v1654_v28  ;;  %v1641_v42 = vmul.f32 %v1639_v40, %v1608_v51 }
 0x862   :  { %v1660_v44 = vsel %vm1656_vm14, %v1654_v28, %v1658_v41  ;;  %v1651_v2 = vmul.f32 %v2232_v33, %v1641_v42 }
 0x863   :  { %v1662_v45 = vadd.f32 1.0, %v1660_v44 }
 0x864   :  { %v1653_v25 = vsub.f32 1.0, %v1651_v2 }
 0x865   :  { %v3182_v43 = vmul.f32 %v1662_v45, %v1586_v31 }
 0x866   :  { %v1657_v35 = vsub.f32 0.0, %v1653_v25 }
 0x867   :  { %1679 = vrot.lane.b32.xlu0 %v3182_v43, %s3456_s26  ;;  %1690 = vrot.lane.b32.xlu1 %v3182_v43, %s3457_s8  ;;  %s1989_s8 = sshll.u32 %s3411_s20, 4  ;;  %s1990_s8 = int_to_ptr.hbm [resolvable:$true] %s1989_s8 }
 0x868   :  { %1701 = vrot.lane.b32.xlu2 %v3182_v43, %s3452_s28  ;;  %v1659_v47 = vsel %vm1655_vm1, %v1653_v25, %v1657_v35  ;;  %s3499_s28 = smov 127  }
 0x869   :  { %v1661_v52 = vadd.f32 1.0, %v1659_v47 }
 0x86b   :  { %v3192_v12 = vmul.f32 %v1661_v52, %v1585_v6 }
 0x86d   :  { %v2168_v58 = vpack.i.bf16 %v3182_v43, %v3192_v12 }
 0x86f   :  { %1752 = vrot.lane.b32.xlu1 %v3192_v12, %s2289_s21  ;;  %2164 = vrot.lane.b32.xlu0 %v2168_v58, %s2286_s30 }
 0x870   :  { %2169 = vrot.lane.b32.xlu2 %v2168_v58, %s2288_s0 }
 0x877   :  { %2174 = vrot.lane.b32.xlu1 %v2168_v58, %s2294_s25  ;;  %1741 = vrot.lane.b32.xlu0 %v3192_v12, %s2291_s22 }
 0x878   :  { %1730 = vrot.lane.b32.xlu2 %v3192_v12, %s2292_s24  ;;  %s3500_s24 = sld [smem:[#allocation8_spill]] }
 0x87e   :  { %v113_v8 = vld [vmem:[%s3500_s24 + $0x78] sm:$0xff]  ;;  %v112_v21 = vld [vmem:[%s3500_s24 + $0x70] sm:$0xff]  ;;  %v111_v22 = vld [vmem:[%s3500_s24 + $0x68] sm:$0xff] }
 0x87f   :  { %1719 = vrot.lane.b32.xlu1 %v3192_v12, %s3498_s29  ;;  %2179 = vrot.lane.b32.xlu0 %v2168_v58, %s3499_s28  ;;  %v122_v27 = vld [vmem:[%s3500_s24 + $0xc0] sm:$0xff]  ;;  %v121_v29 = vld [vmem:[%s3500_s24 + $0xb8] sm:$0xff] }
 0x880   :  { %2189 = vrot.lane.b32.xlu2 %v2168_v58, %s3450_s5  ;;  %1802 = vmatpush.msra.mxu1 %v113_v8  ;;  %v110_v49 = vld [vmem:[%s3500_s24 + $0x60] sm:$0xff]  ;;  %v120_v53 = vld [vmem:[%s3500_s24 + $0xb0] sm:$0xff]  ;;  %v109_v55 = vld [vmem:[%s3500_s24 + $0x58] sm:$0xff] }
 0x881   :  { %1829 = vmatpush.msrb.mxu0 %v122_v27  ;;  %v119_v57 = vld [vmem:[%s3500_s24 + $0xa8] sm:$0xff]  ;;  %v108_v59 = vld [vmem:[%s3500_s24 + $0x50] sm:$0xff]  ;;  %v118_v60 = vld [vmem:[%s3500_s24 + $0xa0] sm:$0xff] }
 0x882   :  { %1803 = vmatpush.msra.mxu1 %v112_v21  ;;  %v107_v63 = vld [vmem:[%s3500_s24 + $0x48] sm:$0xff]  ;;  %v117_v56 = vld [vmem:[%s3500_s24 + $0x98] sm:$0xff]  ;;  %v106_v54 = vld [vmem:[%s3500_s24 + $0x40] sm:$0xff] }
 0x883   :  { %1830 = vmatpush.msrb.mxu0 %v121_v29  ;;  %v116_v0 = vld [vmem:[%s3500_s24 + $0x90] sm:$0xff]  ;;  %v105_v39 = vld [vmem:[%s3500_s24 + $0x38] sm:$0xff]  ;;  %v115_v38 = vld [vmem:[%s3500_s24 + $0x88] sm:$0xff] }
 0x884   :  { %1804 = vmatpush.msra.mxu1 %v111_v22  ;;  %v104_v28 = vld [vmem:[%s3500_s24 + $0x30] sm:$0xff]  ;;  %v103_v42 = vld [vmem:[%s3500_s24 + $0x28] sm:$0xff]  ;;  %v102_v2 = vld [vmem:[%s3500_s24 + $0x20] sm:$0xff] }
 0x885   :  { %1831 = vmatpush.msrb.mxu0 %v120_v53  ;;  %v101_v6 = vld [vmem:[%s3500_s24 + $0x18] sm:$0xff]  ;;  %v161_v8 = vld [vmem:[%s3397_s6 + $0x60] sm:$0xff]  ;;  %v158_v22 = vld [vmem:[%s3397_s6 + $0x48] sm:$0xff] }
 0x886   :  { %1805 = vmatpush.msra.mxu1 %v110_v49  ;;  %v160_v21 = vld [vmem:[%s3397_s6 + $0x58] sm:$0xff]  ;;  %v157_v27 = vld [vmem:[%s3397_s6 + $0x40] sm:$0xff] }
 0x887   :  { %2194 = vrot.lane.b32.xlu1 %v2168_v58, %s3451_s2  ;;  %2184 = vrot.lane.b32.xlu0 %v2168_v58, %s3453_s27  ;;  %v153_v29 = vld [vmem:[%s3397_s6 + $0x20] sm:$0xff]  ;;  %s3516_s27 = sld [smem:[#allocation6_spill]] }
 0x888   :  { %1667 = vrot.lane.b32.xlu2 %v3182_v43, %s3455_s3  ;;  %1806 = vmatpush.msra.mxu1 %v109_v55  ;;  %v149_v53 = vld [vmem:[%s3397_s6] sm:$0xff] }
 0x889   :  { %1832 = vmatpush.msrb.mxu0 %v119_v57 }
 0x88a   :  { %1807 = vmatpush.msra.mxu1 %v108_v59 }
 0x88b   :  { %1833 = vmatpush.msrb.mxu0 %v118_v60 }
 0x88c   :  { %1808 = vmatpush.msra.mxu1 %v107_v63 }
 0x88d   :  { %1834 = vmatpush.msrb.mxu0 %v117_v56 }
 0x88e   :  { %1809 = vmatpush.msra.mxu1 %v106_v54 }
 0x88f   :  { %1916 = vperm.xlu1 %2137, %v1913_v5   ;;  %2199 = vrot.lane.b32.xlu0 %v2168_v58, %s3454_s4  ;;  %v100_v58 = vld [vmem:[%s3500_s24 + $0x10] sm:$0xff] }
 0x890   :  { %1924 = vperm.xlu2 %2100, %v1920_v10   ;;  %1835 = vmatpush.msrb.mxu0 %v116_v0  ;;  %v165_v0 = vld [vmem:[%s3398_s7] sm:$0x3] }
 0x891   :  { %1810 = vmatpush.msra.mxu1 %v105_v39 }
 0x892   :  { %1836 = vmatpush.msrb.mxu0 %v115_v38 }
 0x893   :  { %1811 = vmatpush.msra.mxu1 %v104_v28 }
 0x895   :  { %1812 = vmatpush.msra.mxu1 %v103_v42 }
 0x897   :  { %1813 = vmatpush.msra.mxu1 %v102_v2 }
 0x899   :  { %1814 = vmatpush.msra.mxu1 %v101_v6 }
 0x89b   :  { %1815 = vmatpush.msra.mxu1 %v100_v58 }
 0x8c2   :  { %v3220_v4 = vpop.permute.xlu2 %1701 }
 0x8ca   :  { %v2170_v46 = vpop.permute.xlu2 %2169 }
 0x8cb   :  { %v2172_v16 = vunpack.i.h.bf16 %v2170_v46  ;;  %v2171_v13 = vunpack.i.l.bf16 %v2170_v46 }
 0x8cd   :  { %v1738_v20 = vsel %vm285_vm5, %v2171_v13, %v2172_v16 }
 0x8d2   :  { %v1731_v32 = vpop.permute.xlu2 %1730 }
 0x8d9   :  { %v3222_v3 = vpop.permute.xlu0 %1679  ;;  %v3224_v9 = vpop.permute.xlu1 %1690 }
 0x8da   :  { %v2190_v37 = vpop.permute.xlu2 %2189 }
 0x8db   :  { %v2192_v33 = vunpack.i.h.bf16 %v2190_v37  ;;  %v2191_v44 = vunpack.i.l.bf16 %v2190_v37 }
 0x8e1   :  { %v1753_v14 = vpop.permute.xlu1 %1752  ;;  %v2165_v15 = vpop.permute.xlu0 %2164 }
 0x8e2   :  { %v2167_v17 = vunpack.i.h.bf16 %v2165_v15  ;;  %v2166_v18 = vunpack.i.l.bf16 %v2165_v15  ;;  %v1668_v15 = vpop.permute.xlu2 %1667 }
 0x8e4   :  { %v1749_v19 = vsel %vm297_vm0, %v2166_v18, %v2167_v17  ;;  %v1755_v23 = vsel %vm303_vm2, %v2167_v17, %v1753_v14  ;;  %vm3501_vm0 = vcmask 973824   ;;  %vm3502_vm2 = vcmask 7168   ;;  %v98_v17 = vld [vmem:[%s3500_s24] sm:$0xff] }
 0x8e5   :  { %1766 = vmatpush.msrb.mxu2 %v1749_v19  ;;  %1786 = vmatpush.msra.mxu3 %v1755_v23  ;;  %v114_v18 = vld [vmem:[%s3500_s24 + $0x80] sm:$0xff]  ;;  %v164_v19 = vld [vmem:[%s3397_s6 + $0x78] sm:$0xff]  ;;  %v163_v23 = vld [vmem:[%s3397_s6 + $0x70] sm:$0xff] }
 0x8e6   :  { %1837 = vmatpush.msrb.mxu0 %v114_v18 }
 0x8e7   :  { %1767 = vmatpush.msrb.mxu2 %v1738_v20  ;;  %v162_v20 = vld [vmem:[%s3397_s6 + $0x68] sm:$0xff] }
 0x8e8   :  { %2043 = vmatpush.msk.msra.mxu0 %vm3513_vm10, %v165_v0 }
 0x8e9   :  { %v2175_v24 = vpop.permute.xlu1 %2174  ;;  %v1742_v30 = vpop.permute.xlu0 %1741 }
 0x8ea   :  { %v2177_v7 = vunpack.i.h.bf16 %v2175_v24  ;;  %v2176_v26 = vunpack.i.l.bf16 %v2175_v24  ;;  %v1744_v48 = vsel %vm291_vm4, %v2172_v16, %v1742_v30  ;;  %vm3504_vm4 = vcmask 72704   ;;  %v1665_v16 = vld [vmem:[%s3408_s17] sm:$0xff]  ;;  %v159_v24 = vld [vmem:[%s3397_s6 + $0x50] sm:$0xff]  ;;  %v154_v30 = vld [vmem:[%s3397_s6 + $0x28] sm:$0xff] }
 0x8eb   :  { %1787 = vmatpush.msra.mxu3 %v1744_v48  ;;  %v1700_v52 = vsel %vm3504_vm4, %v3224_v9, %v2191_v44  ;;  %vm3505_vm5 = vmmov %vm3504_vm4  ;;  %v99_v9 = vld [vmem:[%s3500_s24 + $0x8] sm:$0xff]  ;;  %v151_v48 = vld [vmem:[%s3397_s6 + $0x10] sm:$0xff]  ;;  %s2303_s24 = smov [#allocation2]  }
 0x8ec   :  { %v1727_v50 = vsel %vm3501_vm0, %v2176_v26, %v2177_v7  ;;  %v1733_v51 = vsel %vm279_vm8, %v2177_v7, %v1731_v32  ;;  %1816 = vmatpush.msra.mxu1 %v99_v9  ;;  %v156_v7 = vld [vmem:[%s3397_s6 + $0x38] sm:$0xff]  ;;  %v155_v26 = vld [vmem:[%s3397_s6 + $0x30] sm:$0xff]  ;;  %v1925_v9 = vpop.permute.xlu2 %1924  ;;  %s1987_s4 = sshll.u32 %s2303_s24, 4  ;;  %s1988_s4 = int_to_ptr.vmem [resolvable:$true] %s1987_s4 }
 0x8ed   :  { %1768 = vmatpush.msrb.mxu2 %v1727_v50  ;;  %1788 = vmatpush.msra.mxu3 %v1733_v51  ;;  %v152_v32 = vld [vmem:[%s3397_s6 + $0x18] sm:$0xff]  ;;  %v150_v51 = vld [vmem:[%s3397_s6 + $0x8] sm:$0xff] }
 0x8ee   :  { %1817 = vmatpush.msra.mxu1 %v98_v17 }
 0x8f1   :  { %v1720_v61 = vpop.permute.xlu1 %1719  ;;  %v2180_v34 = vpop.permute.xlu0 %2179 }
 0x8f2   :  { %v2182_v1 = vunpack.i.h.bf16 %v2180_v34  ;;  %v2181_v11 = vunpack.i.l.bf16 %v2180_v34 }
 0x8f4   :  { %v1716_v62 = vsel %vm260_vm6, %v2181_v11, %v2182_v1  ;;  %v1722_v36 = vsel %vm266_vm3, %v2182_v1, %v1720_v61  ;;  %vm3503_vm3 = vmmov %vm3502_vm2  ;;  %vm3506_vm6 = vcmask 89088  }
 0x8f5   :  { %1769 = vmatpush.msrb.mxu2 %v1716_v62  ;;  %1789 = vmatpush.msra.mxu3 %v1722_v36  ;;  %vm3507_vm8 = vmmov %vm3506_vm6 }
 0x8f7   :  { %1770 = vmatpush.msrb.mxu2 %v3192_v12  ;;  %1790 = vmatpush.msra.mxu3 %v3182_v43  ;;  %v1697_v12 = vsel %vm3505_vm5, %v2191_v44, %v2192_v33 }
 0x8f9   :  { %v2195_v40 = vpop.permute.xlu1 %2194  ;;  %v2185_v41 = vpop.permute.xlu0 %2184 }
 0x8fa   :  { %v2187_v31 = vunpack.i.h.bf16 %v2185_v41  ;;  %v2186_v45 = vunpack.i.l.bf16 %v2185_v41  ;;  %v2197_v43 = vunpack.i.h.bf16 %v2195_v40  ;;  %v2196_v25 = vunpack.i.l.bf16 %v2195_v40 }
 0x8fc   :  { %v1711_v35 = vsel %vm3502_vm2, %v3220_v4, %v2186_v45  ;;  %v1708_v47 = vsel %vm3503_vm3, %v2186_v45, %v2187_v31  ;;  %v1689_v5 = vsel %vm229_vm11, %v3222_v3, %v2196_v25  ;;  %v1686_v10 = vsel %vm229_vm11, %v2196_v25, %v2197_v43  ;;  %vm3515_vm2 = vmmov %vm3511_vm7 }
 0x8fd   :  { %1771 = vmatpush.msrb.mxu2 %v1711_v35  ;;  %1791 = vmatpush.msra.mxu3 %v1708_v47  ;;  %vm3508_vm11 = vcmask 588800   ;;  %vm3517_vm3 = vmmov %vm3515_vm2 }
 0x8fe   :  { %vm3509_vm12 = vmmov %vm3508_vm11 }
 0x8ff   :  { %1772 = vmatpush.msrb.mxu2 %v1700_v52  ;;  %1792 = vmatpush.msra.mxu3 %v1697_v12  ;;  %vm3510_vm13 = vmmov %vm3508_vm11 }
 0x901   :  { %v2200_v4 = vpop.permute.xlu0 %2199  ;;  %1773 = vmatpush.msrb.mxu2 %v1689_v5  ;;  %1793 = vmatpush.msra.mxu3 %v1686_v10  ;;  %v1917_v58 = vpop.permute.xlu1 %1916 }
 0x902   :  { %v2202_v46 = vunpack.i.h.bf16 %v2200_v4  ;;  %v2201_v14 = vunpack.i.l.bf16 %v2200_v4 }
 0x904   :  { %v1678_v3 = vsel %vm3506_vm6, %v1668_v15, %v2201_v14  ;;  %v1675_v13 = vsel %vm3507_vm8, %v2201_v14, %v2202_v46  ;;  %v1928_v14 = vld [vmem:[%s3516_s27] sm:$0xff] }
 0x905   :  { %1774 = vmatpush.msrb.mxu2 %v1678_v3  ;;  %1794 = vmatpush.msra.mxu3 %v1675_v13 }
 0x906   :  { %2040 = vmatmul.msk.f32.vlgmr.msrb.gmra.mxu2 %vm3508_vm11, %v1665_v16  ;;  %2041 = vmatmul.msk.f32.vlgmr.msra.gmra.mxu3 %vm3509_vm12, %v1665_v16 }
 0x907   :  { %1842 = vmatpush.msra.mxu2 %v164_v19  ;;  %1863 = vmatpush.msrb.mxu3 %v164_v19 }
 0x909   :  { %1843 = vmatpush.msra.mxu2 %v163_v23  ;;  %1864 = vmatpush.msrb.mxu3 %v163_v23 }
 0x90b   :  { %1844 = vmatpush.msra.mxu2 %v162_v20  ;;  %1865 = vmatpush.msrb.mxu3 %v162_v20 }
 0x90d   :  { %1845 = vmatpush.msra.mxu2 %v161_v8  ;;  %1866 = vmatpush.msrb.mxu3 %v161_v8 }
 0x90f   :  { %1846 = vmatpush.msra.mxu2 %v160_v21  ;;  %1867 = vmatpush.msrb.mxu3 %v160_v21 }
 0x911   :  { %1847 = vmatpush.msra.mxu2 %v159_v24  ;;  %1868 = vmatpush.msrb.mxu3 %v159_v24 }
 0x913   :  { %1848 = vmatpush.msra.mxu2 %v158_v22  ;;  %1869 = vmatpush.msrb.mxu3 %v158_v22 }
 0x915   :  { %1849 = vmatpush.msra.mxu2 %v157_v27  ;;  %1870 = vmatpush.msrb.mxu3 %v157_v27 }
 0x917   :  { %1850 = vmatpush.msra.mxu2 %v156_v7  ;;  %1871 = vmatpush.msrb.mxu3 %v156_v7 }
 0x919   :  { %1851 = vmatpush.msra.mxu2 %v155_v26  ;;  %1872 = vmatpush.msrb.mxu3 %v155_v26 }
 0x91b   :  { %1852 = vmatpush.msra.mxu2 %v154_v30  ;;  %1873 = vmatpush.msrb.mxu3 %v154_v30 }
 0x91d   :  { %1853 = vmatpush.msra.mxu2 %v153_v29  ;;  %1874 = vmatpush.msrb.mxu3 %v153_v29 }
 0x91f   :  { %1854 = vmatpush.msra.mxu2 %v152_v32  ;;  %1875 = vmatpush.msrb.mxu3 %v152_v32 }
 0x921   :  { %1855 = vmatpush.msra.mxu2 %v151_v48  ;;  %1876 = vmatpush.msrb.mxu3 %v151_v48 }
 0x923   :  { %1856 = vmatpush.msra.mxu2 %v150_v51  ;;  %1877 = vmatpush.msrb.mxu3 %v150_v51 }
 0x925   :  { %1857 = vmatpush.msra.mxu2 %v149_v53  ;;  %1878 = vmatpush.msrb.mxu3 %v149_v53 }
 0x989   :  { %v1776_v49 = vpop.f32.mrf.mxu2  ;;  %v1796_v50 = vpop.f32.mrf.mxu3 }
 0x98a   :  { %1818 = vmatmul.f32.vlgmr.msra.gmra.mxu1 %v1776_v49  ;;  %2042 = vmatmul.msk.f32.vlgmr.msrb.gmra.mxu0 %vm3510_vm13, %v1796_v50 }
 0x98b   :  { %2045 = vmatpush.msk.msrb.mxu0 %vm3514_vm15, %v165_v0 }
 0xa07   :  { %v1819_v55 = vpop.f32.mrf.mxu1  ;;  %v1839_v57 = vpop.f32.mrf.mxu0 }
 0xa08   :  { %v1840_v59 = vadd.f32 %v1839_v57, %v1819_v55 }
 0xa0a   :  { %v1862_v60 = vmul.f32 %v1840_v59, %v1840_v59  ;;  %1858 = vmatmul.f32.vlgmr.msra.gmra.mxu2 %v1840_v59 }
 0xa0c   :  { %1879 = vmatmul.f32.vlgmr.msrb.gmra.mxu3 %v1862_v60 }
 0xa8d   :  { %v1859_v61 = vpop.f32.mrf.mxu2 }
 0xa8e   :  { %v1883_v63 = vsel %vm3511_vm7, %v1859_v61, 0.0 }
 0xa8f   :  { %v1884_v34 = vrot.slane %v1883_v63, 4  ;;  %v1880_v56 = vpop.f32.mrf.mxu3 }
 0xa90   :  { %v1891_v1 = vsel %vm3512_vm9, %v1880_v56, 0.0 }
 0xa91   :  { %v1885_v11 = vadd.f32 %v1884_v34, %v1883_v63  ;;  %v1892_v54 = vrot.slane %v1891_v1, 4 }
 0xa93   :  { %v1886_v62 = vrot.slane %v1885_v11, 2  ;;  %v1893_v36 = vadd.f32 %v1892_v54, %v1891_v1 }
 0xa95   :  { %v1887_v39 = vadd.f32 %v1886_v62, %v1885_v11  ;;  %v1894_v38 = vrot.slane %v1893_v36, 2 }
 0xa97   :  { %v1888_v37 = vrot.slane %v1887_v39, 1  ;;  %v1895_v28 = vadd.f32 %v1894_v38, %v1893_v36 }
 0xa99   :  { %v1889_v40 = vadd.f32 %v1888_v37, %v1887_v39  ;;  %v1896_v41 = vrot.slane %v1895_v28, 1 }
 0xa9b   :  { %v1890_v42 = vmul.f32 0.001953125, %v1889_v40  ;;  %v1897_v33 = vadd.f32 %v1896_v41, %v1895_v28 }
 0xa9d   :  { %v1899_v44 = vmul.f32 %v1890_v42, %v1890_v42  ;;  %v1898_v31 = vmul.f32 0.001953125, %v1897_v33 }
 0xa9f   :  { %v1900_v45 = vsub.f32 %v1898_v31, %v1899_v44 }
 0xaa1   :  { %v1901_v2 = vmax.f32 %v1900_v45, 0.0 }
 0xaa3   :  { %v1902_v43 = vadd.f32 1e-05, %v1901_v2 }
 0xaa5   :  { %2233 = vrsqrt.f32 %v1902_v43  ;;  %vm1909_vm1 = vweird.f32 %v1902_v43 }
 0xaab   :  { %v2234_v25 = vpop.eup %2233 }
 0xaac   :  { %v1904_v35 = vmul.f32 %v2234_v25, %v1902_v43  ;;  %vm1910_vm14 = vweird.f32 %v2234_v25 }
 0xaad   :  { %vm1911_vm0 = vmor %vm1909_vm1, %vm1910_vm14 }
 0xaae   :  { %v1905_v47 = vmul.f32 %v2234_v25, %v1904_v35 }
 0xab0   :  { %v1906_v6 = vmul.f32 0.5, %v1905_v47 }
 0xab2   :  { %v1907_v52 = vsub.f32 1.5, %v1906_v6 }
 0xab4   :  { %v1908_v12 = vmul.f32 %v2234_v25, %v1907_v52 }
 0xab6   :  { %v1912_v5 = vsel %vm1911_vm0, %v2234_v25, %v1908_v12 }
 0xab7   :  { %v1919_v10 = vmul.f32 %v1917_v58, %v1912_v5 }
 0xab9   :  { %v1921_v4 = vmul.f32 %v1919_v10, %v1890_v42  ;;  %2044 = vmatmul.msk.f32.vlgmr.msra.gmra.mxu0 %vm3515_vm2, %v1919_v10 }
 0xabb   :  { %v1927_v46 = vsub.f32 %v1925_v9, %v1921_v4 }
 0xabd   :  { %v1929_v15 = vadd.f32 %v1928_v14, %v1927_v46 }
 0xac1   :  { %2046 = vmatmul.msk.f32.vlgmr.msrb.gmra.mxu0 %vm3517_vm3, %v1929_v15 }
 0xb36   :  { %v1953_v16 = vpop.f32.mrf.mxu0 }
 0xb37   :  { %v1956_v3 = vmul.f32 %v1953_v16, %v1840_v59 }
 0xb3e   :  { %v1977_v13 = vpop.f32.mrf.mxu0 }
 0xb3f   :  { %v1980_v17 = vadd.f32 %v1977_v13, %v1956_v3 }
 0xb41   :  { %1981 = vst [vmem:[#allocation2] sm:$0xff] %v1980_v17 }
 0xb42   :  { %1992 = dma.vmem_to_hbm [thread:$0]  %s1988_s4, 128, %s1990_s8, [#allocation3]  }
 0xb43   :  { %2284 = dma.done.wait [#allocation3], 128  }
 0xb44   :  { %2285 = vsyncadd [#allocation3], 4294967168 }
 0xb45   :  { %1997 = vsyncpa [#allocation3], 1 }

</bundles_post_ra>
